<compile_context>
chip_gen: v6e
topology: v6e:2x2x1
jax: 0.10.0
libtpu: 0.0.40
codegen_flags: <defaults>
</compile_context>

<pallas_src>
import jax
import jax.numpy as jnp
from jax.experimental import pallas as pl
from jax.experimental.pallas import tpu as pltpu


# ----------------------------------------------------------------------------
# pallas_call plumbing
# ----------------------------------------------------------------------------
def _vmem():
    return pl.BlockSpec(memory_space=pltpu.MemorySpace.VMEM)


def _smem():
    return pl.BlockSpec(memory_space=pltpu.MemorySpace.SMEM)


# ----------------------------------------------------------------------------
# In-kernel encoder:
#   in_proj -> +pos_emb -> L x [LN1 -> MHA -> +res, LN2 -> MLP(QuickGELU) -> +res]
#   -> @ projection -> mean-pool over time
# ----------------------------------------------------------------------------
def _layer_norm(x2, g, b):
    # f32 LayerNorm over last dim (matches the fp16-safe LayerNorm).
    mu = jnp.mean(x2, axis=-1, keepdims=True)
    var = jnp.mean(jnp.square(x2 - mu), axis=-1, keepdims=True)
    return (x2 - mu) * jax.lax.rsqrt(var + 1e-5) * g + b


def _encode(x_ref, inw_ref, inbpos_ref, wqkv_ref, wo_ref, fcw_ref, pjw_ref,
            vecs_ref, fcb_ref, proj_ref, heads):
    B, T, Din = x_ref.shape
    L, W, _ = wo_ref.shape
    H = heads
    Dh = W // H
    E = proj_ref.shape[1]
    BT = B * T

    inbpos = inbpos_ref[...]                               # (1+T, W) f32
    in_b = inbpos[0:1, :]                                  # (1, W)  in_proj bias
    posb = jnp.concatenate([inbpos[1:, :]] * B, axis=0)    # (BT, W) pos over batch

    # input projection + positional embedding; residual stream stays (BT, W) f32
    x2 = x_ref[...].reshape(BT, Din).astype(jnp.bfloat16)
    h = (jnp.dot(x2, inw_ref[...], preferred_element_type=jnp.float32)
         + in_b + posb)

    for l in range(L):
        vl = vecs_ref[l]                                   # (9, W) packed vectors
        # ---- attention branch -------------------------------------------
        hn = _layer_norm(h, vl[0:1], vl[1:2]).astype(jnp.bfloat16)
        qkv = jnp.dot(hn, wqkv_ref[l],
                      preferred_element_type=jnp.float32)  # (BT, 3W), one MXU push
        q = qkv[:, 0 * W:1 * W] + vl[2:3]                  # 1/sqrt(Dh) pre-folded
        k = qkv[:, 1 * W:2 * W] + vl[3:4]
        v = qkv[:, 2 * W:3 * W] + vl[4:5]
        heads_out = []
        for hh in range(H):
            sl = slice(hh * Dh, (hh + 1) * Dh)
            qh = q[:, sl].reshape(B, T, Dh).astype(jnp.bfloat16)
            kh = k[:, sl].reshape(B, T, Dh).astype(jnp.bfloat16)
            vh = v[:, sl].reshape(B, T, Dh).astype(jnp.bfloat16)
            # TODO(synk): reference attn_mask is uninitialized torch.empty;
            # treated as "no mask" and dropped entirely.
            s = jnp.einsum("btd,bsd->bts", qh, kh,
                           preferred_element_type=jnp.float32)
            s = s - jnp.max(s, axis=-1, keepdims=True)
            p = jnp.exp(s)
            p = p * pl.reciprocal(jnp.sum(p, axis=-1, keepdims=True), approx=True)
            oh = jnp.einsum("bts,bsd->btd", p.astype(jnp.bfloat16), vh,
                            preferred_element_type=jnp.float32)
            heads_out.append(oh.reshape(BT, Dh))
        concat = jnp.concatenate(heads_out, axis=-1).astype(jnp.bfloat16)   # (BT, W)
        h = h + jnp.dot(concat, wo_ref[l],
                        preferred_element_type=jnp.float32) + vl[5:6]
        # ---- MLP branch ---------------------------------------------------
        hn = _layer_norm(h, vl[6:7], vl[7:8]).astype(jnp.bfloat16)
        z = (jnp.dot(hn, fcw_ref[l], preferred_element_type=jnp.float32)
             + fcb_ref[l])                                                  # (BT, 4W)
        z = z * jax.nn.sigmoid(1.702 * z)                                   # QuickGELU
        h = h + (jnp.dot(z.astype(jnp.bfloat16), pjw_ref[l],
                         preferred_element_type=jnp.float32) + vl[8:9])

    # NOTE: *_ln_final exists in __init__ but is never applied in encode_*
    # (matches the PyTorch reference).
    out = jnp.dot(h.astype(jnp.bfloat16), proj_ref[...],
                  preferred_element_type=jnp.float32)                       # (BT, E)
    return jnp.mean(out.reshape(B, T, E), axis=1)                           # (B, E)


# ----------------------------------------------------------------------------
# Fully fused CLIP forward kernel (both encoders + contrastive head).
# ----------------------------------------------------------------------------
def _make_clip_kernel(motion_heads, speech_heads):
    def kernel(scale_ref,
               m_x, m_inw, m_inbpos, m_wqkv, m_wo, m_fcw, m_pjw, m_vecs, m_fcb, m_proj,
               s_x, s_inw, s_inbpos, s_wqkv, s_wo, s_fcw, s_pjw, s_vecs, s_fcb, s_proj,
               lm_ref, ls_ref):
        mf = _encode(m_x, m_inw, m_inbpos, m_wqkv, m_wo, m_fcw, m_pjw,
                     m_vecs, m_fcb, m_proj, motion_heads)
        sf = _encode(s_x, s_inw, s_inbpos, s_wqkv, s_wo, s_fcw, s_pjw,
                     s_vecs, s_fcb, s_proj, speech_heads)
        # L2 normalize (tiny eps only guards the zero-vector corner case)
        mf = mf * jax.lax.rsqrt(jnp.sum(mf * mf, axis=-1, keepdims=True) + 1e-12)
        sf = sf * jax.lax.rsqrt(jnp.sum(sf * sf, axis=-1, keepdims=True) + 1e-12)
        # exp(logit_scale) folded in-kernel: splat SMEM scalar to a (1,1) vreg,
        # vector exp on the EUP, broadcast-multiply into the logits.
        scale = jnp.exp(jnp.full((1, 1), scale_ref[0, 0], dtype=jnp.float32))
        lm_ref[...] = jnp.einsum("be,ce->bc", mf, sf,
                                 preferred_element_type=jnp.float32) * scale
        ls_ref[...] = jnp.einsum("be,ce->bc", sf, mf,
                                 preferred_element_type=jnp.float32) * scale
    return kernel


def make_clip_forward(motion_heads, speech_heads):
    kernel = _make_clip_kernel(motion_heads, speech_heads)

    @jax.jit
    def clip_forward(speech, motion, params):
        B = motion.shape[0]
        me, se = params["motion_enc"], params["speech_enc"]
        args = (
            params["logit_scale"].reshape(1, 1).astype(jnp.float32),
            motion, params["motion_inw"], params["motion_inbpos"],
            me["wqkv"], me["wo"], me["fcw"], me["pjw"], me["vecs"], me["fcb"],
            params["motion_projection"],
            speech, params["speech_inw"], params["speech_inbpos"],
            se["wqkv"], se["wo"], se["fcw"], se["pjw"], se["vecs"], se["fcb"],
            params["speech_projection"],
        )
        return pl.pallas_call(
            kernel,
            out_shape=(jax.ShapeDtypeStruct((B, B), jnp.float32),
                       jax.ShapeDtypeStruct((B, B), jnp.float32)),
            in_specs=[_smem()] + [_vmem()] * (len(args) - 1),
            out_specs=(_vmem(), _vmem()),
            compiler_params=pltpu.CompilerParams(
                vmem_limit_bytes=32 * 1024 * 1024),
        )(*args)

    return clip_forward


# ----------------------------------------------------------------------------
# Parameter setup (plain JAX, runs once).
# ----------------------------------------------------------------------------
def positional_embedding(seq_len, demb):
    inv_freq = 1.0 / (10000.0 ** (jnp.arange(0.0, demb, 2.0) / demb))
    pos = jnp.arange(seq_len, dtype=jnp.float32)
    sinusoid = pos[:, None] * inv_freq[None, :]
    return jnp.concatenate([jnp.sin(sinusoid), jnp.cos(sinusoid)], axis=1)  # (T, demb)


def init_encoder_params(key, width, layers, heads):
    """PyTorch-style init, then: fuse QKV into one (W,3W) weight with the
    1/sqrt(Dh) attention scale folded into the Q columns/bias, pre-transpose
    all weights for x@W layout, and pack the small per-layer vectors into one
    (L, 9, W) bank."""
    W = width
    Dh = W // heads
    proj_std = W ** -0.5 * (2 * layers) ** -0.5
    attn_std = W ** -0.5
    fc_std = (2 * W) ** -0.5
    scale = Dh ** -0.5
    ones_w = jnp.ones((W,), jnp.float32)
    zeros_w = jnp.zeros((W,), jnp.float32)
    wqkv, wo, fcw, pjw, vecs, fcb = [], [], [], [], [], []
    for _ in range(layers):
        key, k1, k2, k3, k4 = jax.random.split(key, 5)
        in_proj_w = jax.random.normal(k1, (3 * W, W), jnp.float32) * attn_std
        out_proj_w = jax.random.normal(k2, (W, W), jnp.float32) * proj_std
        c_fc_w = jax.random.normal(k3, (4 * W, W), jnp.float32) * fc_std
        c_proj_w = jax.random.normal(k4, (W, 4 * W), jnp.float32) * proj_std
        in_proj_b = jnp.zeros((3 * W,), jnp.float32)

        wqkv.append(jnp.concatenate(
            [in_proj_w[:W].T * scale,            # Q  (attention scale folded)
             in_proj_w[W:2 * W].T,               # K
             in_proj_w[2 * W:].T], axis=1))      # V   -> (W, 3W)
        wo.append(out_proj_w.T)                  # (W, W)
        fcw.append(c_fc_w.T)                     # (W, 4W)
        pjw.append(c_proj_w.T)                   # (4W, W)
        vecs.append(jnp.stack([
            ones_w, zeros_w,                     # ln1 gamma / beta
            in_proj_b[:W] * scale,               # bq (scale folded)
            in_proj_b[W:2 * W],                  # bk
            in_proj_b[2 * W:],                   # bv
            zeros_w,                             # out_proj bias
            ones_w, zeros_w,                     # ln2 gamma / beta
            zeros_w,                             # c_proj bias
        ]))                                      # (9, W)
        fcb.append(jnp.zeros((1, 4 * W), jnp.float32))
    enc = {
        "wqkv": jnp.stack(wqkv).astype(jnp.bfloat16),
        "wo":   jnp.stack(wo).astype(jnp.bfloat16),
        "fcw":  jnp.stack(fcw).astype(jnp.bfloat16),
        "pjw":  jnp.stack(pjw).astype(jnp.bfloat16),
        "vecs": jnp.stack(vecs),                 # f32 (VPU path)
        "fcb":  jnp.stack(fcb),                  # f32 (VPU path)
    }
    return enc, key


def init_clip_params(key, *, embed_dim, speech_ctx, speech_size, sW, sH, sL,
                     motion_ctx, motion_size, mW, mH, mL):
    params = {}
    key, k1, k2, k3, k4 = jax.random.split(key, 5)
    speech_inw = (jax.random.normal(k1, (sW, speech_size), jnp.float32)
                  * speech_size ** -0.5).T
    motion_inw = (jax.random.normal(k2, (mW, motion_size), jnp.float32)
                  * motion_size ** -0.5).T
    params["speech_inw"] = speech_inw.astype(jnp.bfloat16)
    params["motion_inw"] = motion_inw.astype(jnp.bfloat16)
    # in_proj bias (row 0) packed together with the positional embedding.
    params["speech_inbpos"] = jnp.concatenate(
        [jnp.zeros((1, sW), jnp.float32), positional_embedding(speech_ctx, sW)], axis=0)
    params["motion_inbpos"] = jnp.concatenate(
        [jnp.zeros((1, mW), jnp.float32), positional_embedding(motion_ctx, mW)], axis=0)
    params["speech_projection"] = (jax.random.normal(k3, (sW, embed_dim), jnp.float32)
                                   * sW ** -0.5).astype(jnp.bfloat16)
    params["motion_projection"] = (jax.random.normal(k4, (mW, embed_dim), jnp.float32)
                                   * mW ** -0.5).astype(jnp.bfloat16)
    params["speech_enc"], key = init_encoder_params(key, sW, sL, sH)
    params["motion_enc"], key = init_encoder_params(key, mW, mL, mH)
    params["logit_scale"] = jnp.float32(jnp.log(1.0 / 0.07))
    return params


# ----------------------------------------------------------------------------
# Main
# ----------------------------------------------------------------------------
if __name__ == "__main__":
    B = 2
    embed_dim = 16
    speech_ctx, speech_size, sW, sH, sL = 8, 16, 32, 4, 2
    motion_ctx, motion_size, mW, mH, mL = 8, 12, 32, 4, 2

    root = jax.random.PRNGKey(0)
    k_speech, k_motion, k_params = jax.random.split(root, 3)
    # TODO(synk): the pretrained Data2VecAudioModel speech_pre_encoder is not
    # reproducible in-script; `speech` here stands for its last_hidden_state
    # of shape (B, speech_ctx, speech_size).
    speech = jax.random.normal(k_speech, (B, speech_ctx, speech_size), jnp.float32)
    motion = jax.random.normal(k_motion, (B, motion_ctx, motion_size), jnp.float32)

    params = init_clip_params(
        k_params, embed_dim=embed_dim,
        speech_ctx=speech_ctx, speech_size=speech_size, sW=sW, sH=sH, sL=sL,
        motion_ctx=motion_ctx, motion_size=motion_size, mW=mW, mH=mH, mL=mL)

    clip_forward = make_clip_forward(mH, sH)
    logits_per_motion, logits_per_speech = clip_forward(speech, motion, params)
    jax.block_until_ready((logits_per_motion, logits_per_speech))

    assert logits_per_motion.shape == (B, B)
    assert logits_per_speech.shape == (B, B)
    assert bool(jnp.all(jnp.isfinite(logits_per_motion)))
    assert bool(jnp.all(jnp.isfinite(logits_per_speech)))
    print("KERNEL_OK")
</pallas_src>

<mosaic_0001>
module attributes {stable_mosaic.version = 11 : i64} {
  func.func @kernel(%arg0: memref<1x1xf32, #tpu.memory_space<smem>>, %arg1: memref<2x8x12xf32, #tpu.memory_space<vmem>>, %arg2: memref<12x32xbf16, #tpu.memory_space<vmem>>, %arg3: memref<9x32xf32, #tpu.memory_space<vmem>>, %arg4: memref<2x32x96xbf16, #tpu.memory_space<vmem>>, %arg5: memref<2x32x32xbf16, #tpu.memory_space<vmem>>, %arg6: memref<2x32x128xbf16, #tpu.memory_space<vmem>>, %arg7: memref<2x128x32xbf16, #tpu.memory_space<vmem>>, %arg8: memref<2x9x32xf32, #tpu.memory_space<vmem>>, %arg9: memref<2x1x128xf32, #tpu.memory_space<vmem>>, %arg10: memref<32x16xbf16, #tpu.memory_space<vmem>>, %arg11: memref<2x8x16xf32, #tpu.memory_space<vmem>>, %arg12: memref<16x32xbf16, #tpu.memory_space<vmem>>, %arg13: memref<9x32xf32, #tpu.memory_space<vmem>>, %arg14: memref<2x32x96xbf16, #tpu.memory_space<vmem>>, %arg15: memref<2x32x32xbf16, #tpu.memory_space<vmem>>, %arg16: memref<2x32x128xbf16, #tpu.memory_space<vmem>>, %arg17: memref<2x128x32xbf16, #tpu.memory_space<vmem>>, %arg18: memref<2x9x32xf32, #tpu.memory_space<vmem>>, %arg19: memref<2x1x128xf32, #tpu.memory_space<vmem>>, %arg20: memref<32x16xbf16, #tpu.memory_space<vmem>>, %arg21: memref<2x2xf32, #tpu.memory_space<vmem>>, %arg22: memref<2x2xf32, #tpu.memory_space<vmem>>) attributes {dimension_semantics = [], scalar_prefetch = 0 : i64, scratch_operands = 0 : i64, tpu.core_type = #tpu.core_type<tc>} {
    %c0 = arith.constant 0 : index
    %c0_0 = arith.constant 0 : index
    %0 = vector.load %arg3[%c0, %c0_0] : memref<9x32xf32, #tpu.memory_space<vmem>>, vector<9x32xf32>
    %1 = vector.extract_strided_slice %0 {offsets = [0, 0], sizes = [1, 32], strides = [1, 1]} : vector<9x32xf32> to vector<1x32xf32>
    %2 = vector.extract_strided_slice %0 {offsets = [1, 0], sizes = [8, 32], strides = [1, 1]} : vector<9x32xf32> to vector<8x32xf32>
    %3 = tpu.concatenate %2, %2 in 0 : vector<8x32xf32>, vector<8x32xf32> -> vector<16x32xf32>
    %c0_1 = arith.constant 0 : index
    %c0_2 = arith.constant 0 : index
    %c0_3 = arith.constant 0 : index
    %4 = vector.load %arg1[%c0_1, %c0_2, %c0_3] : memref<2x8x12xf32, #tpu.memory_space<vmem>>, vector<2x8x12xf32>
    %5 = vector.shape_cast %4 : vector<2x8x12xf32> to vector<16x12xf32>
    %6 = arith.truncf %5 : vector<16x12xf32> to vector<16x12xbf16>
    %c0_4 = arith.constant 0 : index
    %c0_5 = arith.constant 0 : index
    %7 = vector.load %arg2[%c0_4, %c0_5] : memref<12x32xbf16, #tpu.memory_space<vmem>>, vector<12x32xbf16>
    %cst = arith.constant dense<0.000000e+00> : vector<16x32xf32>
    %8 = tpu.matmul %6, %7, %cst {dimension_numbers = #tpu.dot_dimension_numbers<[1], [0], [0], [1], [0, 0, 1, 1], [], []>} : vector<16x12xbf16>, vector<12x32xbf16>, vector<16x32xf32> -> vector<16x32xf32>
    %9 = vector.broadcast %1 : vector<1x32xf32> to vector<16x32xf32>
    %10 = arith.addf %8, %9 : vector<16x32xf32>
    %11 = arith.addf %10, %3 : vector<16x32xf32>
    %c0_6 = arith.constant 0 : index
    %c0_7 = arith.constant 0 : index
    %c0_8 = arith.constant 0 : index
    %12 = vector.load %arg8[%c0_6, %c0_7, %c0_8] : memref<2x9x32xf32, #tpu.memory_space<vmem>>, vector<1x9x32xf32>
    %13 = vector.shape_cast %12 : vector<1x9x32xf32> to vector<9x32xf32>
    %14 = vector.extract_strided_slice %13 {offsets = [0, 0], sizes = [1, 32], strides = [1, 1]} : vector<9x32xf32> to vector<1x32xf32>
    %15 = vector.extract_strided_slice %13 {offsets = [1, 0], sizes = [1, 32], strides = [1, 1]} : vector<9x32xf32> to vector<1x32xf32>
    %cst_9 = arith.constant dense<0.000000e+00> : vector<16xf32>
    %16 = vector.multi_reduction <add>, %11, %cst_9 [1] : vector<16x32xf32> to vector<16xf32>
    %17 = vector.shape_cast %16 : vector<16xf32> to vector<16x1xf32>
    %cst_10 = arith.constant 3.200000e+01 : f32
    %18 = vector.broadcast %cst_10 : f32 to vector<16x1xf32>
    %19 = arith.divf %17, %18 : vector<16x1xf32>
    %20 = vector.broadcast %19 : vector<16x1xf32> to vector<16x32xf32>
    %21 = arith.subf %11, %20 : vector<16x32xf32>
    %22 = arith.mulf %21, %21 : vector<16x32xf32>
    %cst_11 = arith.constant dense<0.000000e+00> : vector<16xf32>
    %23 = vector.multi_reduction <add>, %22, %cst_11 [1] : vector<16x32xf32> to vector<16xf32>
    %24 = vector.shape_cast %23 : vector<16xf32> to vector<16x1xf32>
    %cst_12 = arith.constant 3.200000e+01 : f32
    %25 = vector.broadcast %cst_12 : f32 to vector<16x1xf32>
    %26 = arith.divf %24, %25 : vector<16x1xf32>
    %27 = vector.broadcast %19 : vector<16x1xf32> to vector<16x32xf32>
    %28 = arith.subf %11, %27 : vector<16x32xf32>
    %cst_13 = arith.constant 9.99999974E-6 : f32
    %29 = vector.broadcast %cst_13 : f32 to vector<16x1xf32>
    %30 = arith.addf %26, %29 : vector<16x1xf32>
    %31 = math.rsqrt %30 : vector<16x1xf32>
    %32 = vector.broadcast %31 : vector<16x1xf32> to vector<16x32xf32>
    %33 = arith.mulf %28, %32 : vector<16x32xf32>
    %34 = vector.broadcast %14 : vector<1x32xf32> to vector<16x32xf32>
    %35 = arith.mulf %33, %34 : vector<16x32xf32>
    %36 = vector.broadcast %15 : vector<1x32xf32> to vector<16x32xf32>
    %37 = arith.addf %35, %36 : vector<16x32xf32>
    %38 = arith.truncf %37 : vector<16x32xf32> to vector<16x32xbf16>
    %c0_14 = arith.constant 0 : index
    %c0_15 = arith.constant 0 : index
    %c0_16 = arith.constant 0 : index
    %39 = vector.load %arg4[%c0_14, %c0_15, %c0_16] : memref<2x32x96xbf16, #tpu.memory_space<vmem>>, vector<1x32x96xbf16>
    %40 = vector.shape_cast %39 : vector<1x32x96xbf16> to vector<32x96xbf16>
    %cst_17 = arith.constant dense<0.000000e+00> : vector<16x96xf32>
    %41 = tpu.matmul %38, %40, %cst_17 {dimension_numbers = #tpu.dot_dimension_numbers<[1], [0], [0], [1], [0, 0, 1, 1], [], []>} : vector<16x32xbf16>, vector<32x96xbf16>, vector<16x96xf32> -> vector<16x96xf32>
    %42 = vector.extract_strided_slice %41 {offsets = [0, 0], sizes = [16, 32], strides = [1, 1]} : vector<16x96xf32> to vector<16x32xf32>
    %43 = vector.extract_strided_slice %13 {offsets = [2, 0], sizes = [1, 32], strides = [1, 1]} : vector<9x32xf32> to vector<1x32xf32>
    %44 = vector.broadcast %43 : vector<1x32xf32> to vector<16x32xf32>
    %45 = arith.addf %42, %44 : vector<16x32xf32>
    %46 = vector.extract_strided_slice %41 {offsets = [0, 32], sizes = [16, 32], strides = [1, 1]} : vector<16x96xf32> to vector<16x32xf32>
    %47 = vector.extract_strided_slice %13 {offsets = [3, 0], sizes = [1, 32], strides = [1, 1]} : vector<9x32xf32> to vector<1x32xf32>
    %48 = vector.broadcast %47 : vector<1x32xf32> to vector<16x32xf32>
    %49 = arith.addf %46, %48 : vector<16x32xf32>
    %50 = vector.extract_strided_slice %41 {offsets = [0, 64], sizes = [16, 32], strides = [1, 1]} : vector<16x96xf32> to vector<16x32xf32>
    %51 = vector.extract_strided_slice %13 {offsets = [4, 0], sizes = [1, 32], strides = [1, 1]} : vector<9x32xf32> to vector<1x32xf32>
    %52 = vector.broadcast %51 : vector<1x32xf32> to vector<16x32xf32>
    %53 = arith.addf %50, %52 : vector<16x32xf32>
    %54 = vector.extract_strided_slice %45 {offsets = [0, 0], sizes = [16, 8], strides = [1, 1]} : vector<16x32xf32> to vector<16x8xf32>
    %55 = vector.shape_cast %54 : vector<16x8xf32> to vector<2x8x8xf32>
    %56 = arith.truncf %55 : vector<2x8x8xf32> to vector<2x8x8xbf16>
    %57 = vector.extract_strided_slice %49 {offsets = [0, 0], sizes = [16, 8], strides = [1, 1]} : vector<16x32xf32> to vector<16x8xf32>
    %58 = vector.shape_cast %57 : vector<16x8xf32> to vector<2x8x8xf32>
    %59 = arith.truncf %58 : vector<2x8x8xf32> to vector<2x8x8xbf16>
    %60 = vector.extract_strided_slice %53 {offsets = [0, 0], sizes = [16, 8], strides = [1, 1]} : vector<16x32xf32> to vector<16x8xf32>
    %61 = vector.shape_cast %60 : vector<16x8xf32> to vector<2x8x8xf32>
    %62 = arith.truncf %61 : vector<2x8x8xf32> to vector<2x8x8xbf16>
    "tpu.trace_start"() <{level = 10 : i32, message = "btd,bsd->bts"}> : () -> ()
    %cst_18 = arith.constant dense<0.000000e+00> : vector<2x8x8xf32>
    %63 = tpu.matmul %56, %59, %cst_18 {dimension_numbers = #tpu.dot_dimension_numbers<[2], [2], [1], [1], [0, 0, 0, 1, 1, 1], [0], [0]>} : vector<2x8x8xbf16>, vector<2x8x8xbf16>, vector<2x8x8xf32> -> vector<2x8x8xf32>
    "tpu.trace_stop"() : () -> ()
    %cst_19 = arith.constant dense<0xFF800000> : vector<2x8xf32>
    %64 = vector.multi_reduction <maximumf>, %63, %cst_19 [2] : vector<2x8x8xf32> to vector<2x8xf32>
    %65 = vector.shape_cast %64 : vector<2x8xf32> to vector<2x8x1xf32>
    %66 = vector.broadcast %65 : vector<2x8x1xf32> to vector<2x8x8xf32>
    %67 = arith.subf %63, %66 : vector<2x8x8xf32>
    %68 = math.exp %67 : vector<2x8x8xf32>
    %cst_20 = arith.constant dense<0.000000e+00> : vector<2x8xf32>
    %69 = vector.multi_reduction <add>, %68, %cst_20 [2] : vector<2x8x8xf32> to vector<2x8xf32>
    %70 = vector.shape_cast %69 : vector<2x8xf32> to vector<2x8x1xf32>
    %71 = tpu.reciprocal %70 {approx = true} : vector<2x8x1xf32> -> vector<2x8x1xf32>
    %72 = vector.broadcast %71 : vector<2x8x1xf32> to vector<2x8x8xf32>
    %73 = arith.mulf %68, %72 : vector<2x8x8xf32>
    %74 = arith.truncf %73 : vector<2x8x8xf32> to vector<2x8x8xbf16>
    "tpu.trace_start"() <{level = 10 : i32, message = "bts,bsd->btd"}> : () -> ()
    %cst_21 = arith.constant dense<0.000000e+00> : vector<2x8x8xf32>
    %75 = tpu.matmul %74, %62, %cst_21 {dimension_numbers = #tpu.dot_dimension_numbers<[2], [1], [1], [2], [0, 0, 0, 1, 1, 2], [0], [0]>} : vector<2x8x8xbf16>, vector<2x8x8xbf16>, vector<2x8x8xf32> -> vector<2x8x8xf32>
    "tpu.trace_stop"() : () -> ()
    %76 = vector.shape_cast %75 : vector<2x8x8xf32> to vector<16x8xf32>
    %77 = vector.extract_strided_slice %45 {offsets = [0, 8], sizes = [16, 8], strides = [1, 1]} : vector<16x32xf32> to vector<16x8xf32>
    %78 = vector.shape_cast %77 : vector<16x8xf32> to vector<2x8x8xf32>
    %79 = arith.truncf %78 : vector<2x8x8xf32> to vector<2x8x8xbf16>
    %80 = vector.extract_strided_slice %49 {offsets = [0, 8], sizes = [16, 8], strides = [1, 1]} : vector<16x32xf32> to vector<16x8xf32>
    %81 = vector.shape_cast %80 : vector<16x8xf32> to vector<2x8x8xf32>
    %82 = arith.truncf %81 : vector<2x8x8xf32> to vector<2x8x8xbf16>
    %83 = vector.extract_strided_slice %53 {offsets = [0, 8], sizes = [16, 8], strides = [1, 1]} : vector<16x32xf32> to vector<16x8xf32>
    %84 = vector.shape_cast %83 : vector<16x8xf32> to vector<2x8x8xf32>
    %85 = arith.truncf %84 : vector<2x8x8xf32> to vector<2x8x8xbf16>
    "tpu.trace_start"() <{level = 10 : i32, message = "btd,bsd->bts"}> : () -> ()
    %cst_22 = arith.constant dense<0.000000e+00> : vector<2x8x8xf32>
    %86 = tpu.matmul %79, %82, %cst_22 {dimension_numbers = #tpu.dot_dimension_numbers<[2], [2], [1], [1], [0, 0, 0, 1, 1, 1], [0], [0]>} : vector<2x8x8xbf16>, vector<2x8x8xbf16>, vector<2x8x8xf32> -> vector<2x8x8xf32>
    "tpu.trace_stop"() : () -> ()
    %cst_23 = arith.constant dense<0xFF800000> : vector<2x8xf32>
    %87 = vector.multi_reduction <maximumf>, %86, %cst_23 [2] : vector<2x8x8xf32> to vector<2x8xf32>
    %88 = vector.shape_cast %87 : vector<2x8xf32> to vector<2x8x1xf32>
    %89 = vector.broadcast %88 : vector<2x8x1xf32> to vector<2x8x8xf32>
    %90 = arith.subf %86, %89 : vector<2x8x8xf32>
    %91 = math.exp %90 : vector<2x8x8xf32>
    %cst_24 = arith.constant dense<0.000000e+00> : vector<2x8xf32>
    %92 = vector.multi_reduction <add>, %91, %cst_24 [2] : vector<2x8x8xf32> to vector<2x8xf32>
    %93 = vector.shape_cast %92 : vector<2x8xf32> to vector<2x8x1xf32>
    %94 = tpu.reciprocal %93 {approx = true} : vector<2x8x1xf32> -> vector<2x8x1xf32>
    %95 = vector.broadcast %94 : vector<2x8x1xf32> to vector<2x8x8xf32>
    %96 = arith.mulf %91, %95 : vector<2x8x8xf32>
    %97 = arith.truncf %96 : vector<2x8x8xf32> to vector<2x8x8xbf16>
    "tpu.trace_start"() <{level = 10 : i32, message = "bts,bsd->btd"}> : () -> ()
    %cst_25 = arith.constant dense<0.000000e+00> : vector<2x8x8xf32>
    %98 = tpu.matmul %97, %85, %cst_25 {dimension_numbers = #tpu.dot_dimension_numbers<[2], [1], [1], [2], [0, 0, 0, 1, 1, 2], [0], [0]>} : vector<2x8x8xbf16>, vector<2x8x8xbf16>, vector<2x8x8xf32> -> vector<2x8x8xf32>
    "tpu.trace_stop"() : () -> ()
    %99 = vector.shape_cast %98 : vector<2x8x8xf32> to vector<16x8xf32>
    %100 = vector.extract_strided_slice %45 {offsets = [0, 16], sizes = [16, 8], strides = [1, 1]} : vector<16x32xf32> to vector<16x8xf32>
    %101 = vector.shape_cast %100 : vector<16x8xf32> to vector<2x8x8xf32>
    %102 = arith.truncf %101 : vector<2x8x8xf32> to vector<2x8x8xbf16>
    %103 = vector.extract_strided_slice %49 {offsets = [0, 16], sizes = [16, 8], strides = [1, 1]} : vector<16x32xf32> to vector<16x8xf32>
    %104 = vector.shape_cast %103 : vector<16x8xf32> to vector<2x8x8xf32>
    %105 = arith.truncf %104 : vector<2x8x8xf32> to vector<2x8x8xbf16>
    %106 = vector.extract_strided_slice %53 {offsets = [0, 16], sizes = [16, 8], strides = [1, 1]} : vector<16x32xf32> to vector<16x8xf32>
    %107 = vector.shape_cast %106 : vector<16x8xf32> to vector<2x8x8xf32>
    %108 = arith.truncf %107 : vector<2x8x8xf32> to vector<2x8x8xbf16>
    "tpu.trace_start"() <{level = 10 : i32, message = "btd,bsd->bts"}> : () -> ()
    %cst_26 = arith.constant dense<0.000000e+00> : vector<2x8x8xf32>
    %109 = tpu.matmul %102, %105, %cst_26 {dimension_numbers = #tpu.dot_dimension_numbers<[2], [2], [1], [1], [0, 0, 0, 1, 1, 1], [0], [0]>} : vector<2x8x8xbf16>, vector<2x8x8xbf16>, vector<2x8x8xf32> -> vector<2x8x8xf32>
    "tpu.trace_stop"() : () -> ()
    %cst_27 = arith.constant dense<0xFF800000> : vector<2x8xf32>
    %110 = vector.multi_reduction <maximumf>, %109, %cst_27 [2] : vector<2x8x8xf32> to vector<2x8xf32>
    %111 = vector.shape_cast %110 : vector<2x8xf32> to vector<2x8x1xf32>
    %112 = vector.broadcast %111 : vector<2x8x1xf32> to vector<2x8x8xf32>
    %113 = arith.subf %109, %112 : vector<2x8x8xf32>
    %114 = math.exp %113 : vector<2x8x8xf32>
    %cst_28 = arith.constant dense<0.000000e+00> : vector<2x8xf32>
    %115 = vector.multi_reduction <add>, %114, %cst_28 [2] : vector<2x8x8xf32> to vector<2x8xf32>
    %116 = vector.shape_cast %115 : vector<2x8xf32> to vector<2x8x1xf32>
    %117 = tpu.reciprocal %116 {approx = true} : vector<2x8x1xf32> -> vector<2x8x1xf32>
    %118 = vector.broadcast %117 : vector<2x8x1xf32> to vector<2x8x8xf32>
    %119 = arith.mulf %114, %118 : vector<2x8x8xf32>
    %120 = arith.truncf %119 : vector<2x8x8xf32> to vector<2x8x8xbf16>
    "tpu.trace_start"() <{level = 10 : i32, message = "bts,bsd->btd"}> : () -> ()
    %cst_29 = arith.constant dense<0.000000e+00> : vector<2x8x8xf32>
    %121 = tpu.matmul %120, %108, %cst_29 {dimension_numbers = #tpu.dot_dimension_numbers<[2], [1], [1], [2], [0, 0, 0, 1, 1, 2], [0], [0]>} : vector<2x8x8xbf16>, vector<2x8x8xbf16>, vector<2x8x8xf32> -> vector<2x8x8xf32>
    "tpu.trace_stop"() : () -> ()
    %122 = vector.shape_cast %121 : vector<2x8x8xf32> to vector<16x8xf32>
    %123 = vector.extract_strided_slice %45 {offsets = [0, 24], sizes = [16, 8], strides = [1, 1]} : vector<16x32xf32> to vector<16x8xf32>
    %124 = vector.shape_cast %123 : vector<16x8xf32> to vector<2x8x8xf32>
    %125 = arith.truncf %124 : vector<2x8x8xf32> to vector<2x8x8xbf16>
    %126 = vector.extract_strided_slice %49 {offsets = [0, 24], sizes = [16, 8], strides = [1, 1]} : vector<16x32xf32> to vector<16x8xf32>
    %127 = vector.shape_cast %126 : vector<16x8xf32> to vector<2x8x8xf32>
    %128 = arith.truncf %127 : vector<2x8x8xf32> to vector<2x8x8xbf16>
    %129 = vector.extract_strided_slice %53 {offsets = [0, 24], sizes = [16, 8], strides = [1, 1]} : vector<16x32xf32> to vector<16x8xf32>
    %130 = vector.shape_cast %129 : vector<16x8xf32> to vector<2x8x8xf32>
    %131 = arith.truncf %130 : vector<2x8x8xf32> to vector<2x8x8xbf16>
    "tpu.trace_start"() <{level = 10 : i32, message = "btd,bsd->bts"}> : () -> ()
    %cst_30 = arith.constant dense<0.000000e+00> : vector<2x8x8xf32>
    %132 = tpu.matmul %125, %128, %cst_30 {dimension_numbers = #tpu.dot_dimension_numbers<[2], [2], [1], [1], [0, 0, 0, 1, 1, 1], [0], [0]>} : vector<2x8x8xbf16>, vector<2x8x8xbf16>, vector<2x8x8xf32> -> vector<2x8x8xf32>
    "tpu.trace_stop"() : () -> ()
    %cst_31 = arith.constant dense<0xFF800000> : vector<2x8xf32>
    %133 = vector.multi_reduction <maximumf>, %132, %cst_31 [2] : vector<2x8x8xf32> to vector<2x8xf32>
    %134 = vector.shape_cast %133 : vector<2x8xf32> to vector<2x8x1xf32>
    %135 = vector.broadcast %134 : vector<2x8x1xf32> to vector<2x8x8xf32>
    %136 = arith.subf %132, %135 : vector<2x8x8xf32>
    %137 = math.exp %136 : vector<2x8x8xf32>
    %cst_32 = arith.constant dense<0.000000e+00> : vector<2x8xf32>
    %138 = vector.multi_reduction <add>, %137, %cst_32 [2] : vector<2x8x8xf32> to vector<2x8xf32>
    %139 = vector.shape_cast %138 : vector<2x8xf32> to vector<2x8x1xf32>
    %140 = tpu.reciprocal %139 {approx = true} : vector<2x8x1xf32> -> vector<2x8x1xf32>
    %141 = vector.broadcast %140 : vector<2x8x1xf32> to vector<2x8x8xf32>
    %142 = arith.mulf %137, %141 : vector<2x8x8xf32>
    %143 = arith.truncf %142 : vector<2x8x8xf32> to vector<2x8x8xbf16>
    "tpu.trace_start"() <{level = 10 : i32, message = "bts,bsd->btd"}> : () -> ()
    %cst_33 = arith.constant dense<0.000000e+00> : vector<2x8x8xf32>
    %144 = tpu.matmul %143, %131, %cst_33 {dimension_numbers = #tpu.dot_dimension_numbers<[2], [1], [1], [2], [0, 0, 0, 1, 1, 2], [0], [0]>} : vector<2x8x8xbf16>, vector<2x8x8xbf16>, vector<2x8x8xf32> -> vector<2x8x8xf32>
    "tpu.trace_stop"() : () -> ()
    %145 = vector.shape_cast %144 : vector<2x8x8xf32> to vector<16x8xf32>
    %146 = tpu.concatenate %76, %99, %122, %145 in 1 : vector<16x8xf32>, vector<16x8xf32>, vector<16x8xf32>, vector<16x8xf32> -> vector<16x32xf32>
    %147 = arith.truncf %146 : vector<16x32xf32> to vector<16x32xbf16>
    %c0_34 = arith.constant 0 : index
    %c0_35 = arith.constant 0 : index
    %c0_36 = arith.constant 0 : index
    %148 = vector.load %arg5[%c0_34, %c0_35, %c0_36] : memref<2x32x32xbf16, #tpu.memory_space<vmem>>, vector<1x32x32xbf16>
    %149 = vector.shape_cast %148 : vector<1x32x32xbf16> to vector<32x32xbf16>
    %cst_37 = arith.constant dense<0.000000e+00> : vector<16x32xf32>
    %150 = tpu.matmul %147, %149, %cst_37 {dimension_numbers = #tpu.dot_dimension_numbers<[1], [0], [0], [1], [0, 0, 1, 1], [], []>} : vector<16x32xbf16>, vector<32x32xbf16>, vector<16x32xf32> -> vector<16x32xf32>
    %151 = arith.addf %11, %150 : vector<16x32xf32>
    %152 = vector.extract_strided_slice %13 {offsets = [5, 0], sizes = [1, 32], strides = [1, 1]} : vector<9x32xf32> to vector<1x32xf32>
    %153 = vector.broadcast %152 : vector<1x32xf32> to vector<16x32xf32>
    %154 = arith.addf %151, %153 : vector<16x32xf32>
    %155 = vector.extract_strided_slice %13 {offsets = [6, 0], sizes = [1, 32], strides = [1, 1]} : vector<9x32xf32> to vector<1x32xf32>
    %156 = vector.extract_strided_slice %13 {offsets = [7, 0], sizes = [1, 32], strides = [1, 1]} : vector<9x32xf32> to vector<1x32xf32>
    %cst_38 = arith.constant dense<0.000000e+00> : vector<16xf32>
    %157 = vector.multi_reduction <add>, %154, %cst_38 [1] : vector<16x32xf32> to vector<16xf32>
    %158 = vector.shape_cast %157 : vector<16xf32> to vector<16x1xf32>
    %cst_39 = arith.constant 3.200000e+01 : f32
    %159 = vector.broadcast %cst_39 : f32 to vector<16x1xf32>
    %160 = arith.divf %158, %159 : vector<16x1xf32>
    %161 = vector.broadcast %160 : vector<16x1xf32> to vector<16x32xf32>
    %162 = arith.subf %154, %161 : vector<16x32xf32>
    %163 = arith.mulf %162, %162 : vector<16x32xf32>
    %cst_40 = arith.constant dense<0.000000e+00> : vector<16xf32>
    %164 = vector.multi_reduction <add>, %163, %cst_40 [1] : vector<16x32xf32> to vector<16xf32>
    %165 = vector.shape_cast %164 : vector<16xf32> to vector<16x1xf32>
    %cst_41 = arith.constant 3.200000e+01 : f32
    %166 = vector.broadcast %cst_41 : f32 to vector<16x1xf32>
    %167 = arith.divf %165, %166 : vector<16x1xf32>
    %168 = vector.broadcast %160 : vector<16x1xf32> to vector<16x32xf32>
    %169 = arith.subf %154, %168 : vector<16x32xf32>
    %cst_42 = arith.constant 9.99999974E-6 : f32
    %170 = vector.broadcast %cst_42 : f32 to vector<16x1xf32>
    %171 = arith.addf %167, %170 : vector<16x1xf32>
    %172 = math.rsqrt %171 : vector<16x1xf32>
    %173 = vector.broadcast %172 : vector<16x1xf32> to vector<16x32xf32>
    %174 = arith.mulf %169, %173 : vector<16x32xf32>
    %175 = vector.broadcast %155 : vector<1x32xf32> to vector<16x32xf32>
    %176 = arith.mulf %174, %175 : vector<16x32xf32>
    %177 = vector.broadcast %156 : vector<1x32xf32> to vector<16x32xf32>
    %178 = arith.addf %176, %177 : vector<16x32xf32>
    %179 = arith.truncf %178 : vector<16x32xf32> to vector<16x32xbf16>
    %c0_43 = arith.constant 0 : index
    %c0_44 = arith.constant 0 : index
    %c0_45 = arith.constant 0 : index
    %180 = vector.load %arg6[%c0_43, %c0_44, %c0_45] : memref<2x32x128xbf16, #tpu.memory_space<vmem>>, vector<1x32x128xbf16>
    %181 = vector.shape_cast %180 : vector<1x32x128xbf16> to vector<32x128xbf16>
    %cst_46 = arith.constant dense<0.000000e+00> : vector<16x128xf32>
    %182 = tpu.matmul %179, %181, %cst_46 {dimension_numbers = #tpu.dot_dimension_numbers<[1], [0], [0], [1], [0, 0, 1, 1], [], []>} : vector<16x32xbf16>, vector<32x128xbf16>, vector<16x128xf32> -> vector<16x128xf32>
    %c0_47 = arith.constant 0 : index
    %c0_48 = arith.constant 0 : index
    %c0_49 = arith.constant 0 : index
    %183 = vector.load %arg9[%c0_47, %c0_48, %c0_49] : memref<2x1x128xf32, #tpu.memory_space<vmem>>, vector<1x1x128xf32>
    %184 = vector.shape_cast %183 : vector<1x1x128xf32> to vector<1x128xf32>
    %185 = vector.broadcast %184 : vector<1x128xf32> to vector<16x128xf32>
    %186 = arith.addf %182, %185 : vector<16x128xf32>
    %cst_50 = arith.constant 1.702000e+00 : f32
    %187 = vector.broadcast %cst_50 : f32 to vector<16x128xf32>
    %188 = arith.mulf %187, %186 : vector<16x128xf32>
    %189 = arith.negf %188 : vector<16x128xf32>
    %190 = math.exp %189 : vector<16x128xf32>
    %cst_51 = arith.constant 1.000000e+00 : f32
    %191 = vector.broadcast %cst_51 : f32 to vector<16x128xf32>
    %192 = arith.addf %191, %190 : vector<16x128xf32>
    %193 = arith.divf %191, %192 : vector<16x128xf32>
    %194 = arith.mulf %186, %193 : vector<16x128xf32>
    %195 = arith.truncf %194 : vector<16x128xf32> to vector<16x128xbf16>
    %c0_52 = arith.constant 0 : index
    %c0_53 = arith.constant 0 : index
    %c0_54 = arith.constant 0 : index
    %196 = vector.load %arg7[%c0_52, %c0_53, %c0_54] : memref<2x128x32xbf16, #tpu.memory_space<vmem>>, vector<1x128x32xbf16>
    %197 = vector.shape_cast %196 : vector<1x128x32xbf16> to vector<128x32xbf16>
    %cst_55 = arith.constant dense<0.000000e+00> : vector<16x32xf32>
    %198 = tpu.matmul %195, %197, %cst_55 {dimension_numbers = #tpu.dot_dimension_numbers<[1], [0], [0], [1], [0, 0, 1, 1], [], []>} : vector<16x128xbf16>, vector<128x32xbf16>, vector<16x32xf32> -> vector<16x32xf32>
    %199 = vector.extract_strided_slice %13 {offsets = [8, 0], sizes = [1, 32], strides = [1, 1]} : vector<9x32xf32> to vector<1x32xf32>
    %200 = vector.broadcast %199 : vector<1x32xf32> to vector<16x32xf32>
    %201 = arith.addf %198, %200 : vector<16x32xf32>
    %202 = arith.addf %154, %201 : vector<16x32xf32>
    %c1 = arith.constant 1 : index
    %c0_56 = arith.constant 0 : index
    %c0_57 = arith.constant 0 : index
    %203 = vector.load %arg8[%c1, %c0_56, %c0_57] : memref<2x9x32xf32, #tpu.memory_space<vmem>>, vector<1x9x32xf32>
    %204 = vector.shape_cast %203 : vector<1x9x32xf32> to vector<9x32xf32>
    %205 = vector.extract_strided_slice %204 {offsets = [0, 0], sizes = [1, 32], strides = [1, 1]} : vector<9x32xf32> to vector<1x32xf32>
    %206 = vector.extract_strided_slice %204 {offsets = [1, 0], sizes = [1, 32], strides = [1, 1]} : vector<9x32xf32> to vector<1x32xf32>
    %cst_58 = arith.constant dense<0.000000e+00> : vector<16xf32>
    %207 = vector.multi_reduction <add>, %202, %cst_58 [1] : vector<16x32xf32> to vector<16xf32>
    %208 = vector.shape_cast %207 : vector<16xf32> to vector<16x1xf32>
    %cst_59 = arith.constant 3.200000e+01 : f32
    %209 = vector.broadcast %cst_59 : f32 to vector<16x1xf32>
    %210 = arith.divf %208, %209 : vector<16x1xf32>
    %211 = vector.broadcast %210 : vector<16x1xf32> to vector<16x32xf32>
    %212 = arith.subf %202, %211 : vector<16x32xf32>
    %213 = arith.mulf %212, %212 : vector<16x32xf32>
    %cst_60 = arith.constant dense<0.000000e+00> : vector<16xf32>
    %214 = vector.multi_reduction <add>, %213, %cst_60 [1] : vector<16x32xf32> to vector<16xf32>
    %215 = vector.shape_cast %214 : vector<16xf32> to vector<16x1xf32>
    %cst_61 = arith.constant 3.200000e+01 : f32
    %216 = vector.broadcast %cst_61 : f32 to vector<16x1xf32>
    %217 = arith.divf %215, %216 : vector<16x1xf32>
    %218 = vector.broadcast %210 : vector<16x1xf32> to vector<16x32xf32>
    %219 = arith.subf %202, %218 : vector<16x32xf32>
    %cst_62 = arith.constant 9.99999974E-6 : f32
    %220 = vector.broadcast %cst_62 : f32 to vector<16x1xf32>
    %221 = arith.addf %217, %220 : vector<16x1xf32>
    %222 = math.rsqrt %221 : vector<16x1xf32>
    %223 = vector.broadcast %222 : vector<16x1xf32> to vector<16x32xf32>
    %224 = arith.mulf %219, %223 : vector<16x32xf32>
    %225 = vector.broadcast %205 : vector<1x32xf32> to vector<16x32xf32>
    %226 = arith.mulf %224, %225 : vector<16x32xf32>
    %227 = vector.broadcast %206 : vector<1x32xf32> to vector<16x32xf32>
    %228 = arith.addf %226, %227 : vector<16x32xf32>
    %229 = arith.truncf %228 : vector<16x32xf32> to vector<16x32xbf16>
    %c1_63 = arith.constant 1 : index
    %c0_64 = arith.constant 0 : index
    %c0_65 = arith.constant 0 : index
    %230 = vector.load %arg4[%c1_63, %c0_64, %c0_65] : memref<2x32x96xbf16, #tpu.memory_space<vmem>>, vector<1x32x96xbf16>
    %231 = vector.shape_cast %230 : vector<1x32x96xbf16> to vector<32x96xbf16>
    %cst_66 = arith.constant dense<0.000000e+00> : vector<16x96xf32>
    %232 = tpu.matmul %229, %231, %cst_66 {dimension_numbers = #tpu.dot_dimension_numbers<[1], [0], [0], [1], [0, 0, 1, 1], [], []>} : vector<16x32xbf16>, vector<32x96xbf16>, vector<16x96xf32> -> vector<16x96xf32>
    %233 = vector.extract_strided_slice %232 {offsets = [0, 0], sizes = [16, 32], strides = [1, 1]} : vector<16x96xf32> to vector<16x32xf32>
    %234 = vector.extract_strided_slice %204 {offsets = [2, 0], sizes = [1, 32], strides = [1, 1]} : vector<9x32xf32> to vector<1x32xf32>
    %235 = vector.broadcast %234 : vector<1x32xf32> to vector<16x32xf32>
    %236 = arith.addf %233, %235 : vector<16x32xf32>
    %237 = vector.extract_strided_slice %232 {offsets = [0, 32], sizes = [16, 32], strides = [1, 1]} : vector<16x96xf32> to vector<16x32xf32>
    %238 = vector.extract_strided_slice %204 {offsets = [3, 0], sizes = [1, 32], strides = [1, 1]} : vector<9x32xf32> to vector<1x32xf32>
    %239 = vector.broadcast %238 : vector<1x32xf32> to vector<16x32xf32>
    %240 = arith.addf %237, %239 : vector<16x32xf32>
    %241 = vector.extract_strided_slice %232 {offsets = [0, 64], sizes = [16, 32], strides = [1, 1]} : vector<16x96xf32> to vector<16x32xf32>
    %242 = vector.extract_strided_slice %204 {offsets = [4, 0], sizes = [1, 32], strides = [1, 1]} : vector<9x32xf32> to vector<1x32xf32>
    %243 = vector.broadcast %242 : vector<1x32xf32> to vector<16x32xf32>
    %244 = arith.addf %241, %243 : vector<16x32xf32>
    %245 = vector.extract_strided_slice %236 {offsets = [0, 0], sizes = [16, 8], strides = [1, 1]} : vector<16x32xf32> to vector<16x8xf32>
    %246 = vector.shape_cast %245 : vector<16x8xf32> to vector<2x8x8xf32>
    %247 = arith.truncf %246 : vector<2x8x8xf32> to vector<2x8x8xbf16>
    %248 = vector.extract_strided_slice %240 {offsets = [0, 0], sizes = [16, 8], strides = [1, 1]} : vector<16x32xf32> to vector<16x8xf32>
    %249 = vector.shape_cast %248 : vector<16x8xf32> to vector<2x8x8xf32>
    %250 = arith.truncf %249 : vector<2x8x8xf32> to vector<2x8x8xbf16>
    %251 = vector.extract_strided_slice %244 {offsets = [0, 0], sizes = [16, 8], strides = [1, 1]} : vector<16x32xf32> to vector<16x8xf32>
    %252 = vector.shape_cast %251 : vector<16x8xf32> to vector<2x8x8xf32>
    %253 = arith.truncf %252 : vector<2x8x8xf32> to vector<2x8x8xbf16>
    "tpu.trace_start"() <{level = 10 : i32, message = "btd,bsd->bts"}> : () -> ()
    %cst_67 = arith.constant dense<0.000000e+00> : vector<2x8x8xf32>
    %254 = tpu.matmul %247, %250, %cst_67 {dimension_numbers = #tpu.dot_dimension_numbers<[2], [2], [1], [1], [0, 0, 0, 1, 1, 1], [0], [0]>} : vector<2x8x8xbf16>, vector<2x8x8xbf16>, vector<2x8x8xf32> -> vector<2x8x8xf32>
    "tpu.trace_stop"() : () -> ()
    %cst_68 = arith.constant dense<0xFF800000> : vector<2x8xf32>
    %255 = vector.multi_reduction <maximumf>, %254, %cst_68 [2] : vector<2x8x8xf32> to vector<2x8xf32>
    %256 = vector.shape_cast %255 : vector<2x8xf32> to vector<2x8x1xf32>
    %257 = vector.broadcast %256 : vector<2x8x1xf32> to vector<2x8x8xf32>
    %258 = arith.subf %254, %257 : vector<2x8x8xf32>
    %259 = math.exp %258 : vector<2x8x8xf32>
    %cst_69 = arith.constant dense<0.000000e+00> : vector<2x8xf32>
    %260 = vector.multi_reduction <add>, %259, %cst_69 [2] : vector<2x8x8xf32> to vector<2x8xf32>
    %261 = vector.shape_cast %260 : vector<2x8xf32> to vector<2x8x1xf32>
    %262 = tpu.reciprocal %261 {approx = true} : vector<2x8x1xf32> -> vector<2x8x1xf32>
    %263 = vector.broadcast %262 : vector<2x8x1xf32> to vector<2x8x8xf32>
    %264 = arith.mulf %259, %263 : vector<2x8x8xf32>
    %265 = arith.truncf %264 : vector<2x8x8xf32> to vector<2x8x8xbf16>
    "tpu.trace_start"() <{level = 10 : i32, message = "bts,bsd->btd"}> : () -> ()
    %cst_70 = arith.constant dense<0.000000e+00> : vector<2x8x8xf32>
    %266 = tpu.matmul %265, %253, %cst_70 {dimension_numbers = #tpu.dot_dimension_numbers<[2], [1], [1], [2], [0, 0, 0, 1, 1, 2], [0], [0]>} : vector<2x8x8xbf16>, vector<2x8x8xbf16>, vector<2x8x8xf32> -> vector<2x8x8xf32>
    "tpu.trace_stop"() : () -> ()
    %267 = vector.shape_cast %266 : vector<2x8x8xf32> to vector<16x8xf32>
    %268 = vector.extract_strided_slice %236 {offsets = [0, 8], sizes = [16, 8], strides = [1, 1]} : vector<16x32xf32> to vector<16x8xf32>
    %269 = vector.shape_cast %268 : vector<16x8xf32> to vector<2x8x8xf32>
    %270 = arith.truncf %269 : vector<2x8x8xf32> to vector<2x8x8xbf16>
    %271 = vector.extract_strided_slice %240 {offsets = [0, 8], sizes = [16, 8], strides = [1, 1]} : vector<16x32xf32> to vector<16x8xf32>
    %272 = vector.shape_cast %271 : vector<16x8xf32> to vector<2x8x8xf32>
    %273 = arith.truncf %272 : vector<2x8x8xf32> to vector<2x8x8xbf16>
    %274 = vector.extract_strided_slice %244 {offsets = [0, 8], sizes = [16, 8], strides = [1, 1]} : vector<16x32xf32> to vector<16x8xf32>
    %275 = vector.shape_cast %274 : vector<16x8xf32> to vector<2x8x8xf32>
    %276 = arith.truncf %275 : vector<2x8x8xf32> to vector<2x8x8xbf16>
    "tpu.trace_start"() <{level = 10 : i32, message = "btd,bsd->bts"}> : () -> ()
    %cst_71 = arith.constant dense<0.000000e+00> : vector<2x8x8xf32>
    %277 = tpu.matmul %270, %273, %cst_71 {dimension_numbers = #tpu.dot_dimension_numbers<[2], [2], [1], [1], [0, 0, 0, 1, 1, 1], [0], [0]>} : vector<2x8x8xbf16>, vector<2x8x8xbf16>, vector<2x8x8xf32> -> vector<2x8x8xf32>
    "tpu.trace_stop"() : () -> ()
    %cst_72 = arith.constant dense<0xFF800000> : vector<2x8xf32>
    %278 = vector.multi_reduction <maximumf>, %277, %cst_72 [2] : vector<2x8x8xf32> to vector<2x8xf32>
    %279 = vector.shape_cast %278 : vector<2x8xf32> to vector<2x8x1xf32>
    %280 = vector.broadcast %279 : vector<2x8x1xf32> to vector<2x8x8xf32>
    %281 = arith.subf %277, %280 : vector<2x8x8xf32>
    %282 = math.exp %281 : vector<2x8x8xf32>
    %cst_73 = arith.constant dense<0.000000e+00> : vector<2x8xf32>
    %283 = vector.multi_reduction <add>, %282, %cst_73 [2] : vector<2x8x8xf32> to vector<2x8xf32>
    %284 = vector.shape_cast %283 : vector<2x8xf32> to vector<2x8x1xf32>
    %285 = tpu.reciprocal %284 {approx = true} : vector<2x8x1xf32> -> vector<2x8x1xf32>
    %286 = vector.broadcast %285 : vector<2x8x1xf32> to vector<2x8x8xf32>
    %287 = arith.mulf %282, %286 : vector<2x8x8xf32>
    %288 = arith.truncf %287 : vector<2x8x8xf32> to vector<2x8x8xbf16>
    "tpu.trace_start"() <{level = 10 : i32, message = "bts,bsd->btd"}> : () -> ()
    %cst_74 = arith.constant dense<0.000000e+00> : vector<2x8x8xf32>
    %289 = tpu.matmul %288, %276, %cst_74 {dimension_numbers = #tpu.dot_dimension_numbers<[2], [1], [1], [2], [0, 0, 0, 1, 1, 2], [0], [0]>} : vector<2x8x8xbf16>, vector<2x8x8xbf16>, vector<2x8x8xf32> -> vector<2x8x8xf32>
    "tpu.trace_stop"() : () -> ()
    %290 = vector.shape_cast %289 : vector<2x8x8xf32> to vector<16x8xf32>
    %291 = vector.extract_strided_slice %236 {offsets = [0, 16], sizes = [16, 8], strides = [1, 1]} : vector<16x32xf32> to vector<16x8xf32>
    %292 = vector.shape_cast %291 : vector<16x8xf32> to vector<2x8x8xf32>
    %293 = arith.truncf %292 : vector<2x8x8xf32> to vector<2x8x8xbf16>
    %294 = vector.extract_strided_slice %240 {offsets = [0, 16], sizes = [16, 8], strides = [1, 1]} : vector<16x32xf32> to vector<16x8xf32>
    %295 = vector.shape_cast %294 : vector<16x8xf32> to vector<2x8x8xf32>
    %296 = arith.truncf %295 : vector<2x8x8xf32> to vector<2x8x8xbf16>
    %297 = vector.extract_strided_slice %244 {offsets = [0, 16], sizes = [16, 8], strides = [1, 1]} : vector<16x32xf32> to vector<16x8xf32>
    %298 = vector.shape_cast %297 : vector<16x8xf32> to vector<2x8x8xf32>
    %299 = arith.truncf %298 : vector<2x8x8xf32> to vector<2x8x8xbf16>
    "tpu.trace_start"() <{level = 10 : i32, message = "btd,bsd->bts"}> : () -> ()
    %cst_75 = arith.constant dense<0.000000e+00> : vector<2x8x8xf32>
    %300 = tpu.matmul %293, %296, %cst_75 {dimension_numbers = #tpu.dot_dimension_numbers<[2], [2], [1], [1], [0, 0, 0, 1, 1, 1], [0], [0]>} : vector<2x8x8xbf16>, vector<2x8x8xbf16>, vector<2x8x8xf32> -> vector<2x8x8xf32>
    "tpu.trace_stop"() : () -> ()
    %cst_76 = arith.constant dense<0xFF800000> : vector<2x8xf32>
    %301 = vector.multi_reduction <maximumf>, %300, %cst_76 [2] : vector<2x8x8xf32> to vector<2x8xf32>
    %302 = vector.shape_cast %301 : vector<2x8xf32> to vector<2x8x1xf32>
    %303 = vector.broadcast %302 : vector<2x8x1xf32> to vector<2x8x8xf32>
    %304 = arith.subf %300, %303 : vector<2x8x8xf32>
    %305 = math.exp %304 : vector<2x8x8xf32>
    %cst_77 = arith.constant dense<0.000000e+00> : vector<2x8xf32>
    %306 = vector.multi_reduction <add>, %305, %cst_77 [2] : vector<2x8x8xf32> to vector<2x8xf32>
    %307 = vector.shape_cast %306 : vector<2x8xf32> to vector<2x8x1xf32>
    %308 = tpu.reciprocal %307 {approx = true} : vector<2x8x1xf32> -> vector<2x8x1xf32>
    %309 = vector.broadcast %308 : vector<2x8x1xf32> to vector<2x8x8xf32>
    %310 = arith.mulf %305, %309 : vector<2x8x8xf32>
    %311 = arith.truncf %310 : vector<2x8x8xf32> to vector<2x8x8xbf16>
    "tpu.trace_start"() <{level = 10 : i32, message = "bts,bsd->btd"}> : () -> ()
    %cst_78 = arith.constant dense<0.000000e+00> : vector<2x8x8xf32>
    %312 = tpu.matmul %311, %299, %cst_78 {dimension_numbers = #tpu.dot_dimension_numbers<[2], [1], [1], [2], [0, 0, 0, 1, 1, 2], [0], [0]>} : vector<2x8x8xbf16>, vector<2x8x8xbf16>, vector<2x8x8xf32> -> vector<2x8x8xf32>
    "tpu.trace_stop"() : () -> ()
    %313 = vector.shape_cast %312 : vector<2x8x8xf32> to vector<16x8xf32>
    %314 = vector.extract_strided_slice %236 {offsets = [0, 24], sizes = [16, 8], strides = [1, 1]} : vector<16x32xf32> to vector<16x8xf32>
    %315 = vector.shape_cast %314 : vector<16x8xf32> to vector<2x8x8xf32>
    %316 = arith.truncf %315 : vector<2x8x8xf32> to vector<2x8x8xbf16>
    %317 = vector.extract_strided_slice %240 {offsets = [0, 24], sizes = [16, 8], strides = [1, 1]} : vector<16x32xf32> to vector<16x8xf32>
    %318 = vector.shape_cast %317 : vector<16x8xf32> to vector<2x8x8xf32>
    %319 = arith.truncf %318 : vector<2x8x8xf32> to vector<2x8x8xbf16>
    %320 = vector.extract_strided_slice %244 {offsets = [0, 24], sizes = [16, 8], strides = [1, 1]} : vector<16x32xf32> to vector<16x8xf32>
    %321 = vector.shape_cast %320 : vector<16x8xf32> to vector<2x8x8xf32>
    %322 = arith.truncf %321 : vector<2x8x8xf32> to vector<2x8x8xbf16>
    "tpu.trace_start"() <{level = 10 : i32, message = "btd,bsd->bts"}> : () -> ()
    %cst_79 = arith.constant dense<0.000000e+00> : vector<2x8x8xf32>
    %323 = tpu.matmul %316, %319, %cst_79 {dimension_numbers = #tpu.dot_dimension_numbers<[2], [2], [1], [1], [0, 0, 0, 1, 1, 1], [0], [0]>} : vector<2x8x8xbf16>, vector<2x8x8xbf16>, vector<2x8x8xf32> -> vector<2x8x8xf32>
    "tpu.trace_stop"() : () -> ()
    %cst_80 = arith.constant dense<0xFF800000> : vector<2x8xf32>
    %324 = vector.multi_reduction <maximumf>, %323, %cst_80 [2] : vector<2x8x8xf32> to vector<2x8xf32>
    %325 = vector.shape_cast %324 : vector<2x8xf32> to vector<2x8x1xf32>
    %326 = vector.broadcast %325 : vector<2x8x1xf32> to vector<2x8x8xf32>
    %327 = arith.subf %323, %326 : vector<2x8x8xf32>
    %328 = math.exp %327 : vector<2x8x8xf32>
    %cst_81 = arith.constant dense<0.000000e+00> : vector<2x8xf32>
    %329 = vector.multi_reduction <add>, %328, %cst_81 [2] : vector<2x8x8xf32> to vector<2x8xf32>
    %330 = vector.shape_cast %329 : vector<2x8xf32> to vector<2x8x1xf32>
    %331 = tpu.reciprocal %330 {approx = true} : vector<2x8x1xf32> -> vector<2x8x1xf32>
    %332 = vector.broadcast %331 : vector<2x8x1xf32> to vector<2x8x8xf32>
    %333 = arith.mulf %328, %332 : vector<2x8x8xf32>
    %334 = arith.truncf %333 : vector<2x8x8xf32> to vector<2x8x8xbf16>
    "tpu.trace_start"() <{level = 10 : i32, message = "bts,bsd->btd"}> : () -> ()
    %cst_82 = arith.constant dense<0.000000e+00> : vector<2x8x8xf32>
    %335 = tpu.matmul %334, %322, %cst_82 {dimension_numbers = #tpu.dot_dimension_numbers<[2], [1], [1], [2], [0, 0, 0, 1, 1, 2], [0], [0]>} : vector<2x8x8xbf16>, vector<2x8x8xbf16>, vector<2x8x8xf32> -> vector<2x8x8xf32>
    "tpu.trace_stop"() : () -> ()
    %336 = vector.shape_cast %335 : vector<2x8x8xf32> to vector<16x8xf32>
    %337 = tpu.concatenate %267, %290, %313, %336 in 1 : vector<16x8xf32>, vector<16x8xf32>, vector<16x8xf32>, vector<16x8xf32> -> vector<16x32xf32>
    %338 = arith.truncf %337 : vector<16x32xf32> to vector<16x32xbf16>
    %c1_83 = arith.constant 1 : index
    %c0_84 = arith.constant 0 : index
    %c0_85 = arith.constant 0 : index
    %339 = vector.load %arg5[%c1_83, %c0_84, %c0_85] : memref<2x32x32xbf16, #tpu.memory_space<vmem>>, vector<1x32x32xbf16>
    %340 = vector.shape_cast %339 : vector<1x32x32xbf16> to vector<32x32xbf16>
    %cst_86 = arith.constant dense<0.000000e+00> : vector<16x32xf32>
    %341 = tpu.matmul %338, %340, %cst_86 {dimension_numbers = #tpu.dot_dimension_numbers<[1], [0], [0], [1], [0, 0, 1, 1], [], []>} : vector<16x32xbf16>, vector<32x32xbf16>, vector<16x32xf32> -> vector<16x32xf32>
    %342 = arith.addf %202, %341 : vector<16x32xf32>
    %343 = vector.extract_strided_slice %204 {offsets = [5, 0], sizes = [1, 32], strides = [1, 1]} : vector<9x32xf32> to vector<1x32xf32>
    %344 = vector.broadcast %343 : vector<1x32xf32> to vector<16x32xf32>
    %345 = arith.addf %342, %344 : vector<16x32xf32>
    %346 = vector.extract_strided_slice %204 {offsets = [6, 0], sizes = [1, 32], strides = [1, 1]} : vector<9x32xf32> to vector<1x32xf32>
    %347 = vector.extract_strided_slice %204 {offsets = [7, 0], sizes = [1, 32], strides = [1, 1]} : vector<9x32xf32> to vector<1x32xf32>
    %cst_87 = arith.constant dense<0.000000e+00> : vector<16xf32>
    %348 = vector.multi_reduction <add>, %345, %cst_87 [1] : vector<16x32xf32> to vector<16xf32>
    %349 = vector.shape_cast %348 : vector<16xf32> to vector<16x1xf32>
    %cst_88 = arith.constant 3.200000e+01 : f32
    %350 = vector.broadcast %cst_88 : f32 to vector<16x1xf32>
    %351 = arith.divf %349, %350 : vector<16x1xf32>
    %352 = vector.broadcast %351 : vector<16x1xf32> to vector<16x32xf32>
    %353 = arith.subf %345, %352 : vector<16x32xf32>
    %354 = arith.mulf %353, %353 : vector<16x32xf32>
    %cst_89 = arith.constant dense<0.000000e+00> : vector<16xf32>
    %355 = vector.multi_reduction <add>, %354, %cst_89 [1] : vector<16x32xf32> to vector<16xf32>
    %356 = vector.shape_cast %355 : vector<16xf32> to vector<16x1xf32>
    %cst_90 = arith.constant 3.200000e+01 : f32
    %357 = vector.broadcast %cst_90 : f32 to vector<16x1xf32>
    %358 = arith.divf %356, %357 : vector<16x1xf32>
    %359 = vector.broadcast %351 : vector<16x1xf32> to vector<16x32xf32>
    %360 = arith.subf %345, %359 : vector<16x32xf32>
    %cst_91 = arith.constant 9.99999974E-6 : f32
    %361 = vector.broadcast %cst_91 : f32 to vector<16x1xf32>
    %362 = arith.addf %358, %361 : vector<16x1xf32>
    %363 = math.rsqrt %362 : vector<16x1xf32>
    %364 = vector.broadcast %363 : vector<16x1xf32> to vector<16x32xf32>
    %365 = arith.mulf %360, %364 : vector<16x32xf32>
    %366 = vector.broadcast %346 : vector<1x32xf32> to vector<16x32xf32>
    %367 = arith.mulf %365, %366 : vector<16x32xf32>
    %368 = vector.broadcast %347 : vector<1x32xf32> to vector<16x32xf32>
    %369 = arith.addf %367, %368 : vector<16x32xf32>
    %370 = arith.truncf %369 : vector<16x32xf32> to vector<16x32xbf16>
    %c1_92 = arith.constant 1 : index
    %c0_93 = arith.constant 0 : index
    %c0_94 = arith.constant 0 : index
    %371 = vector.load %arg6[%c1_92, %c0_93, %c0_94] : memref<2x32x128xbf16, #tpu.memory_space<vmem>>, vector<1x32x128xbf16>
    %372 = vector.shape_cast %371 : vector<1x32x128xbf16> to vector<32x128xbf16>
    %cst_95 = arith.constant dense<0.000000e+00> : vector<16x128xf32>
    %373 = tpu.matmul %370, %372, %cst_95 {dimension_numbers = #tpu.dot_dimension_numbers<[1], [0], [0], [1], [0, 0, 1, 1], [], []>} : vector<16x32xbf16>, vector<32x128xbf16>, vector<16x128xf32> -> vector<16x128xf32>
    %c1_96 = arith.constant 1 : index
    %c0_97 = arith.constant 0 : index
    %c0_98 = arith.constant 0 : index
    %374 = vector.load %arg9[%c1_96, %c0_97, %c0_98] : memref<2x1x128xf32, #tpu.memory_space<vmem>>, vector<1x1x128xf32>
    %375 = vector.shape_cast %374 : vector<1x1x128xf32> to vector<1x128xf32>
    %376 = vector.broadcast %375 : vector<1x128xf32> to vector<16x128xf32>
    %377 = arith.addf %373, %376 : vector<16x128xf32>
    %cst_99 = arith.constant 1.702000e+00 : f32
    %378 = vector.broadcast %cst_99 : f32 to vector<16x128xf32>
    %379 = arith.mulf %378, %377 : vector<16x128xf32>
    %380 = arith.negf %379 : vector<16x128xf32>
    %381 = math.exp %380 : vector<16x128xf32>
    %cst_100 = arith.constant 1.000000e+00 : f32
    %382 = vector.broadcast %cst_100 : f32 to vector<16x128xf32>
    %383 = arith.addf %382, %381 : vector<16x128xf32>
    %384 = arith.divf %382, %383 : vector<16x128xf32>
    %385 = arith.mulf %377, %384 : vector<16x128xf32>
    %386 = arith.truncf %385 : vector<16x128xf32> to vector<16x128xbf16>
    %c1_101 = arith.constant 1 : index
    %c0_102 = arith.constant 0 : index
    %c0_103 = arith.constant 0 : index
    %387 = vector.load %arg7[%c1_101, %c0_102, %c0_103] : memref<2x128x32xbf16, #tpu.memory_space<vmem>>, vector<1x128x32xbf16>
    %388 = vector.shape_cast %387 : vector<1x128x32xbf16> to vector<128x32xbf16>
    %cst_104 = arith.constant dense<0.000000e+00> : vector<16x32xf32>
    %389 = tpu.matmul %386, %388, %cst_104 {dimension_numbers = #tpu.dot_dimension_numbers<[1], [0], [0], [1], [0, 0, 1, 1], [], []>} : vector<16x128xbf16>, vector<128x32xbf16>, vector<16x32xf32> -> vector<16x32xf32>
    %390 = vector.extract_strided_slice %204 {offsets = [8, 0], sizes = [1, 32], strides = [1, 1]} : vector<9x32xf32> to vector<1x32xf32>
    %391 = vector.broadcast %390 : vector<1x32xf32> to vector<16x32xf32>
    %392 = arith.addf %389, %391 : vector<16x32xf32>
    %393 = arith.addf %345, %392 : vector<16x32xf32>
    %394 = arith.truncf %393 : vector<16x32xf32> to vector<16x32xbf16>
    %c0_105 = arith.constant 0 : index
    %c0_106 = arith.constant 0 : index
    %395 = vector.load %arg10[%c0_105, %c0_106] : memref<32x16xbf16, #tpu.memory_space<vmem>>, vector<32x16xbf16>
    %cst_107 = arith.constant dense<0.000000e+00> : vector<16x16xf32>
    %396 = tpu.matmul %394, %395, %cst_107 {dimension_numbers = #tpu.dot_dimension_numbers<[1], [0], [0], [1], [0, 0, 1, 1], [], []>} : vector<16x32xbf16>, vector<32x16xbf16>, vector<16x16xf32> -> vector<16x16xf32>
    %397 = vector.shape_cast %396 : vector<16x16xf32> to vector<2x8x16xf32>
    %cst_108 = arith.constant dense<0.000000e+00> : vector<2x16xf32>
    %398 = vector.multi_reduction <add>, %397, %cst_108 [1] : vector<2x8x16xf32> to vector<2x16xf32>
    %cst_109 = arith.constant 8.000000e+00 : f32
    %399 = vector.broadcast %cst_109 : f32 to vector<2x16xf32>
    %400 = arith.divf %398, %399 : vector<2x16xf32>
    %c0_110 = arith.constant 0 : index
    %c0_111 = arith.constant 0 : index
    %401 = vector.load %arg13[%c0_110, %c0_111] : memref<9x32xf32, #tpu.memory_space<vmem>>, vector<9x32xf32>
    %402 = vector.extract_strided_slice %401 {offsets = [0, 0], sizes = [1, 32], strides = [1, 1]} : vector<9x32xf32> to vector<1x32xf32>
    %403 = vector.extract_strided_slice %401 {offsets = [1, 0], sizes = [8, 32], strides = [1, 1]} : vector<9x32xf32> to vector<8x32xf32>
    %404 = tpu.concatenate %403, %403 in 0 : vector<8x32xf32>, vector<8x32xf32> -> vector<16x32xf32>
    %c0_112 = arith.constant 0 : index
    %c0_113 = arith.constant 0 : index
    %c0_114 = arith.constant 0 : index
    %405 = vector.load %arg11[%c0_112, %c0_113, %c0_114] : memref<2x8x16xf32, #tpu.memory_space<vmem>>, vector<2x8x16xf32>
    %406 = vector.shape_cast %405 : vector<2x8x16xf32> to vector<16x16xf32>
    %407 = arith.truncf %406 : vector<16x16xf32> to vector<16x16xbf16>
    %c0_115 = arith.constant 0 : index
    %c0_116 = arith.constant 0 : index
    %408 = vector.load %arg12[%c0_115, %c0_116] : memref<16x32xbf16, #tpu.memory_space<vmem>>, vector<16x32xbf16>
    %cst_117 = arith.constant dense<0.000000e+00> : vector<16x32xf32>
    %409 = tpu.matmul %407, %408, %cst_117 {dimension_numbers = #tpu.dot_dimension_numbers<[1], [0], [0], [1], [0, 0, 1, 1], [], []>} : vector<16x16xbf16>, vector<16x32xbf16>, vector<16x32xf32> -> vector<16x32xf32>
    %410 = vector.broadcast %402 : vector<1x32xf32> to vector<16x32xf32>
    %411 = arith.addf %409, %410 : vector<16x32xf32>
    %412 = arith.addf %411, %404 : vector<16x32xf32>
    %c0_118 = arith.constant 0 : index
    %c0_119 = arith.constant 0 : index
    %c0_120 = arith.constant 0 : index
    %413 = vector.load %arg18[%c0_118, %c0_119, %c0_120] : memref<2x9x32xf32, #tpu.memory_space<vmem>>, vector<1x9x32xf32>
    %414 = vector.shape_cast %413 : vector<1x9x32xf32> to vector<9x32xf32>
    %415 = vector.extract_strided_slice %414 {offsets = [0, 0], sizes = [1, 32], strides = [1, 1]} : vector<9x32xf32> to vector<1x32xf32>
    %416 = vector.extract_strided_slice %414 {offsets = [1, 0], sizes = [1, 32], strides = [1, 1]} : vector<9x32xf32> to vector<1x32xf32>
    %cst_121 = arith.constant dense<0.000000e+00> : vector<16xf32>
    %417 = vector.multi_reduction <add>, %412, %cst_121 [1] : vector<16x32xf32> to vector<16xf32>
    %418 = vector.shape_cast %417 : vector<16xf32> to vector<16x1xf32>
    %cst_122 = arith.constant 3.200000e+01 : f32
    %419 = vector.broadcast %cst_122 : f32 to vector<16x1xf32>
    %420 = arith.divf %418, %419 : vector<16x1xf32>
    %421 = vector.broadcast %420 : vector<16x1xf32> to vector<16x32xf32>
    %422 = arith.subf %412, %421 : vector<16x32xf32>
    %423 = arith.mulf %422, %422 : vector<16x32xf32>
    %cst_123 = arith.constant dense<0.000000e+00> : vector<16xf32>
    %424 = vector.multi_reduction <add>, %423, %cst_123 [1] : vector<16x32xf32> to vector<16xf32>
    %425 = vector.shape_cast %424 : vector<16xf32> to vector<16x1xf32>
    %cst_124 = arith.constant 3.200000e+01 : f32
    %426 = vector.broadcast %cst_124 : f32 to vector<16x1xf32>
    %427 = arith.divf %425, %426 : vector<16x1xf32>
    %428 = vector.broadcast %420 : vector<16x1xf32> to vector<16x32xf32>
    %429 = arith.subf %412, %428 : vector<16x32xf32>
    %cst_125 = arith.constant 9.99999974E-6 : f32
    %430 = vector.broadcast %cst_125 : f32 to vector<16x1xf32>
    %431 = arith.addf %427, %430 : vector<16x1xf32>
    %432 = math.rsqrt %431 : vector<16x1xf32>
    %433 = vector.broadcast %432 : vector<16x1xf32> to vector<16x32xf32>
    %434 = arith.mulf %429, %433 : vector<16x32xf32>
    %435 = vector.broadcast %415 : vector<1x32xf32> to vector<16x32xf32>
    %436 = arith.mulf %434, %435 : vector<16x32xf32>
    %437 = vector.broadcast %416 : vector<1x32xf32> to vector<16x32xf32>
    %438 = arith.addf %436, %437 : vector<16x32xf32>
    %439 = arith.truncf %438 : vector<16x32xf32> to vector<16x32xbf16>
    %c0_126 = arith.constant 0 : index
    %c0_127 = arith.constant 0 : index
    %c0_128 = arith.constant 0 : index
    %440 = vector.load %arg14[%c0_126, %c0_127, %c0_128] : memref<2x32x96xbf16, #tpu.memory_space<vmem>>, vector<1x32x96xbf16>
    %441 = vector.shape_cast %440 : vector<1x32x96xbf16> to vector<32x96xbf16>
    %cst_129 = arith.constant dense<0.000000e+00> : vector<16x96xf32>
    %442 = tpu.matmul %439, %441, %cst_129 {dimension_numbers = #tpu.dot_dimension_numbers<[1], [0], [0], [1], [0, 0, 1, 1], [], []>} : vector<16x32xbf16>, vector<32x96xbf16>, vector<16x96xf32> -> vector<16x96xf32>
    %443 = vector.extract_strided_slice %442 {offsets = [0, 0], sizes = [16, 32], strides = [1, 1]} : vector<16x96xf32> to vector<16x32xf32>
    %444 = vector.extract_strided_slice %414 {offsets = [2, 0], sizes = [1, 32], strides = [1, 1]} : vector<9x32xf32> to vector<1x32xf32>
    %445 = vector.broadcast %444 : vector<1x32xf32> to vector<16x32xf32>
    %446 = arith.addf %443, %445 : vector<16x32xf32>
    %447 = vector.extract_strided_slice %442 {offsets = [0, 32], sizes = [16, 32], strides = [1, 1]} : vector<16x96xf32> to vector<16x32xf32>
    %448 = vector.extract_strided_slice %414 {offsets = [3, 0], sizes = [1, 32], strides = [1, 1]} : vector<9x32xf32> to vector<1x32xf32>
    %449 = vector.broadcast %448 : vector<1x32xf32> to vector<16x32xf32>
    %450 = arith.addf %447, %449 : vector<16x32xf32>
    %451 = vector.extract_strided_slice %442 {offsets = [0, 64], sizes = [16, 32], strides = [1, 1]} : vector<16x96xf32> to vector<16x32xf32>
    %452 = vector.extract_strided_slice %414 {offsets = [4, 0], sizes = [1, 32], strides = [1, 1]} : vector<9x32xf32> to vector<1x32xf32>
    %453 = vector.broadcast %452 : vector<1x32xf32> to vector<16x32xf32>
    %454 = arith.addf %451, %453 : vector<16x32xf32>
    %455 = vector.extract_strided_slice %446 {offsets = [0, 0], sizes = [16, 8], strides = [1, 1]} : vector<16x32xf32> to vector<16x8xf32>
    %456 = vector.shape_cast %455 : vector<16x8xf32> to vector<2x8x8xf32>
    %457 = arith.truncf %456 : vector<2x8x8xf32> to vector<2x8x8xbf16>
    %458 = vector.extract_strided_slice %450 {offsets = [0, 0], sizes = [16, 8], strides = [1, 1]} : vector<16x32xf32> to vector<16x8xf32>
    %459 = vector.shape_cast %458 : vector<16x8xf32> to vector<2x8x8xf32>
    %460 = arith.truncf %459 : vector<2x8x8xf32> to vector<2x8x8xbf16>
    %461 = vector.extract_strided_slice %454 {offsets = [0, 0], sizes = [16, 8], strides = [1, 1]} : vector<16x32xf32> to vector<16x8xf32>
    %462 = vector.shape_cast %461 : vector<16x8xf32> to vector<2x8x8xf32>
    %463 = arith.truncf %462 : vector<2x8x8xf32> to vector<2x8x8xbf16>
    "tpu.trace_start"() <{level = 10 : i32, message = "btd,bsd->bts"}> : () -> ()
    %cst_130 = arith.constant dense<0.000000e+00> : vector<2x8x8xf32>
    %464 = tpu.matmul %457, %460, %cst_130 {dimension_numbers = #tpu.dot_dimension_numbers<[2], [2], [1], [1], [0, 0, 0, 1, 1, 1], [0], [0]>} : vector<2x8x8xbf16>, vector<2x8x8xbf16>, vector<2x8x8xf32> -> vector<2x8x8xf32>
    "tpu.trace_stop"() : () -> ()
    %cst_131 = arith.constant dense<0xFF800000> : vector<2x8xf32>
    %465 = vector.multi_reduction <maximumf>, %464, %cst_131 [2] : vector<2x8x8xf32> to vector<2x8xf32>
    %466 = vector.shape_cast %465 : vector<2x8xf32> to vector<2x8x1xf32>
    %467 = vector.broadcast %466 : vector<2x8x1xf32> to vector<2x8x8xf32>
    %468 = arith.subf %464, %467 : vector<2x8x8xf32>
    %469 = math.exp %468 : vector<2x8x8xf32>
    %cst_132 = arith.constant dense<0.000000e+00> : vector<2x8xf32>
    %470 = vector.multi_reduction <add>, %469, %cst_132 [2] : vector<2x8x8xf32> to vector<2x8xf32>
    %471 = vector.shape_cast %470 : vector<2x8xf32> to vector<2x8x1xf32>
    %472 = tpu.reciprocal %471 {approx = true} : vector<2x8x1xf32> -> vector<2x8x1xf32>
    %473 = vector.broadcast %472 : vector<2x8x1xf32> to vector<2x8x8xf32>
    %474 = arith.mulf %469, %473 : vector<2x8x8xf32>
    %475 = arith.truncf %474 : vector<2x8x8xf32> to vector<2x8x8xbf16>
    "tpu.trace_start"() <{level = 10 : i32, message = "bts,bsd->btd"}> : () -> ()
    %cst_133 = arith.constant dense<0.000000e+00> : vector<2x8x8xf32>
    %476 = tpu.matmul %475, %463, %cst_133 {dimension_numbers = #tpu.dot_dimension_numbers<[2], [1], [1], [2], [0, 0, 0, 1, 1, 2], [0], [0]>} : vector<2x8x8xbf16>, vector<2x8x8xbf16>, vector<2x8x8xf32> -> vector<2x8x8xf32>
    "tpu.trace_stop"() : () -> ()
    %477 = vector.shape_cast %476 : vector<2x8x8xf32> to vector<16x8xf32>
    %478 = vector.extract_strided_slice %446 {offsets = [0, 8], sizes = [16, 8], strides = [1, 1]} : vector<16x32xf32> to vector<16x8xf32>
    %479 = vector.shape_cast %478 : vector<16x8xf32> to vector<2x8x8xf32>
    %480 = arith.truncf %479 : vector<2x8x8xf32> to vector<2x8x8xbf16>
    %481 = vector.extract_strided_slice %450 {offsets = [0, 8], sizes = [16, 8], strides = [1, 1]} : vector<16x32xf32> to vector<16x8xf32>
    %482 = vector.shape_cast %481 : vector<16x8xf32> to vector<2x8x8xf32>
    %483 = arith.truncf %482 : vector<2x8x8xf32> to vector<2x8x8xbf16>
    %484 = vector.extract_strided_slice %454 {offsets = [0, 8], sizes = [16, 8], strides = [1, 1]} : vector<16x32xf32> to vector<16x8xf32>
    %485 = vector.shape_cast %484 : vector<16x8xf32> to vector<2x8x8xf32>
    %486 = arith.truncf %485 : vector<2x8x8xf32> to vector<2x8x8xbf16>
    "tpu.trace_start"() <{level = 10 : i32, message = "btd,bsd->bts"}> : () -> ()
    %cst_134 = arith.constant dense<0.000000e+00> : vector<2x8x8xf32>
    %487 = tpu.matmul %480, %483, %cst_134 {dimension_numbers = #tpu.dot_dimension_numbers<[2], [2], [1], [1], [0, 0, 0, 1, 1, 1], [0], [0]>} : vector<2x8x8xbf16>, vector<2x8x8xbf16>, vector<2x8x8xf32> -> vector<2x8x8xf32>
    "tpu.trace_stop"() : () -> ()
    %cst_135 = arith.constant dense<0xFF800000> : vector<2x8xf32>
    %488 = vector.multi_reduction <maximumf>, %487, %cst_135 [2] : vector<2x8x8xf32> to vector<2x8xf32>
    %489 = vector.shape_cast %488 : vector<2x8xf32> to vector<2x8x1xf32>
    %490 = vector.broadcast %489 : vector<2x8x1xf32> to vector<2x8x8xf32>
    %491 = arith.subf %487, %490 : vector<2x8x8xf32>
    %492 = math.exp %491 : vector<2x8x8xf32>
    %cst_136 = arith.constant dense<0.000000e+00> : vector<2x8xf32>
    %493 = vector.multi_reduction <add>, %492, %cst_136 [2] : vector<2x8x8xf32> to vector<2x8xf32>
    %494 = vector.shape_cast %493 : vector<2x8xf32> to vector<2x8x1xf32>
    %495 = tpu.reciprocal %494 {approx = true} : vector<2x8x1xf32> -> vector<2x8x1xf32>
    %496 = vector.broadcast %495 : vector<2x8x1xf32> to vector<2x8x8xf32>
    %497 = arith.mulf %492, %496 : vector<2x8x8xf32>
    %498 = arith.truncf %497 : vector<2x8x8xf32> to vector<2x8x8xbf16>
    "tpu.trace_start"() <{level = 10 : i32, message = "bts,bsd->btd"}> : () -> ()
    %cst_137 = arith.constant dense<0.000000e+00> : vector<2x8x8xf32>
    %499 = tpu.matmul %498, %486, %cst_137 {dimension_numbers = #tpu.dot_dimension_numbers<[2], [1], [1], [2], [0, 0, 0, 1, 1, 2], [0], [0]>} : vector<2x8x8xbf16>, vector<2x8x8xbf16>, vector<2x8x8xf32> -> vector<2x8x8xf32>
    "tpu.trace_stop"() : () -> ()
    %500 = vector.shape_cast %499 : vector<2x8x8xf32> to vector<16x8xf32>
    %501 = vector.extract_strided_slice %446 {offsets = [0, 16], sizes = [16, 8], strides = [1, 1]} : vector<16x32xf32> to vector<16x8xf32>
    %502 = vector.shape_cast %501 : vector<16x8xf32> to vector<2x8x8xf32>
    %503 = arith.truncf %502 : vector<2x8x8xf32> to vector<2x8x8xbf16>
    %504 = vector.extract_strided_slice %450 {offsets = [0, 16], sizes = [16, 8], strides = [1, 1]} : vector<16x32xf32> to vector<16x8xf32>
    %505 = vector.shape_cast %504 : vector<16x8xf32> to vector<2x8x8xf32>
    %506 = arith.truncf %505 : vector<2x8x8xf32> to vector<2x8x8xbf16>
    %507 = vector.extract_strided_slice %454 {offsets = [0, 16], sizes = [16, 8], strides = [1, 1]} : vector<16x32xf32> to vector<16x8xf32>
    %508 = vector.shape_cast %507 : vector<16x8xf32> to vector<2x8x8xf32>
    %509 = arith.truncf %508 : vector<2x8x8xf32> to vector<2x8x8xbf16>
    "tpu.trace_start"() <{level = 10 : i32, message = "btd,bsd->bts"}> : () -> ()
    %cst_138 = arith.constant dense<0.000000e+00> : vector<2x8x8xf32>
    %510 = tpu.matmul %503, %506, %cst_138 {dimension_numbers = #tpu.dot_dimension_numbers<[2], [2], [1], [1], [0, 0, 0, 1, 1, 1], [0], [0]>} : vector<2x8x8xbf16>, vector<2x8x8xbf16>, vector<2x8x8xf32> -> vector<2x8x8xf32>
    "tpu.trace_stop"() : () -> ()
    %cst_139 = arith.constant dense<0xFF800000> : vector<2x8xf32>
    %511 = vector.multi_reduction <maximumf>, %510, %cst_139 [2] : vector<2x8x8xf32> to vector<2x8xf32>
    %512 = vector.shape_cast %511 : vector<2x8xf32> to vector<2x8x1xf32>
    %513 = vector.broadcast %512 : vector<2x8x1xf32> to vector<2x8x8xf32>
    %514 = arith.subf %510, %513 : vector<2x8x8xf32>
    %515 = math.exp %514 : vector<2x8x8xf32>
    %cst_140 = arith.constant dense<0.000000e+00> : vector<2x8xf32>
    %516 = vector.multi_reduction <add>, %515, %cst_140 [2] : vector<2x8x8xf32> to vector<2x8xf32>
    %517 = vector.shape_cast %516 : vector<2x8xf32> to vector<2x8x1xf32>
    %518 = tpu.reciprocal %517 {approx = true} : vector<2x8x1xf32> -> vector<2x8x1xf32>
    %519 = vector.broadcast %518 : vector<2x8x1xf32> to vector<2x8x8xf32>
    %520 = arith.mulf %515, %519 : vector<2x8x8xf32>
    %521 = arith.truncf %520 : vector<2x8x8xf32> to vector<2x8x8xbf16>
    "tpu.trace_start"() <{level = 10 : i32, message = "bts,bsd->btd"}> : () -> ()
    %cst_141 = arith.constant dense<0.000000e+00> : vector<2x8x8xf32>
    %522 = tpu.matmul %521, %509, %cst_141 {dimension_numbers = #tpu.dot_dimension_numbers<[2], [1], [1], [2], [0, 0, 0, 1, 1, 2], [0], [0]>} : vector<2x8x8xbf16>, vector<2x8x8xbf16>, vector<2x8x8xf32> -> vector<2x8x8xf32>
    "tpu.trace_stop"() : () -> ()
    %523 = vector.shape_cast %522 : vector<2x8x8xf32> to vector<16x8xf32>
    %524 = vector.extract_strided_slice %446 {offsets = [0, 24], sizes = [16, 8], strides = [1, 1]} : vector<16x32xf32> to vector<16x8xf32>
    %525 = vector.shape_cast %524 : vector<16x8xf32> to vector<2x8x8xf32>
    %526 = arith.truncf %525 : vector<2x8x8xf32> to vector<2x8x8xbf16>
    %527 = vector.extract_strided_slice %450 {offsets = [0, 24], sizes = [16, 8], strides = [1, 1]} : vector<16x32xf32> to vector<16x8xf32>
    %528 = vector.shape_cast %527 : vector<16x8xf32> to vector<2x8x8xf32>
    %529 = arith.truncf %528 : vector<2x8x8xf32> to vector<2x8x8xbf16>
    %530 = vector.extract_strided_slice %454 {offsets = [0, 24], sizes = [16, 8], strides = [1, 1]} : vector<16x32xf32> to vector<16x8xf32>
    %531 = vector.shape_cast %530 : vector<16x8xf32> to vector<2x8x8xf32>
    %532 = arith.truncf %531 : vector<2x8x8xf32> to vector<2x8x8xbf16>
    "tpu.trace_start"() <{level = 10 : i32, message = "btd,bsd->bts"}> : () -> ()
    %cst_142 = arith.constant dense<0.000000e+00> : vector<2x8x8xf32>
    %533 = tpu.matmul %526, %529, %cst_142 {dimension_numbers = #tpu.dot_dimension_numbers<[2], [2], [1], [1], [0, 0, 0, 1, 1, 1], [0], [0]>} : vector<2x8x8xbf16>, vector<2x8x8xbf16>, vector<2x8x8xf32> -> vector<2x8x8xf32>
    "tpu.trace_stop"() : () -> ()
    %cst_143 = arith.constant dense<0xFF800000> : vector<2x8xf32>
    %534 = vector.multi_reduction <maximumf>, %533, %cst_143 [2] : vector<2x8x8xf32> to vector<2x8xf32>
    %535 = vector.shape_cast %534 : vector<2x8xf32> to vector<2x8x1xf32>
    %536 = vector.broadcast %535 : vector<2x8x1xf32> to vector<2x8x8xf32>
    %537 = arith.subf %533, %536 : vector<2x8x8xf32>
    %538 = math.exp %537 : vector<2x8x8xf32>
    %cst_144 = arith.constant dense<0.000000e+00> : vector<2x8xf32>
    %539 = vector.multi_reduction <add>, %538, %cst_144 [2] : vector<2x8x8xf32> to vector<2x8xf32>
    %540 = vector.shape_cast %539 : vector<2x8xf32> to vector<2x8x1xf32>
    %541 = tpu.reciprocal %540 {approx = true} : vector<2x8x1xf32> -> vector<2x8x1xf32>
    %542 = vector.broadcast %541 : vector<2x8x1xf32> to vector<2x8x8xf32>
    %543 = arith.mulf %538, %542 : vector<2x8x8xf32>
    %544 = arith.truncf %543 : vector<2x8x8xf32> to vector<2x8x8xbf16>
    "tpu.trace_start"() <{level = 10 : i32, message = "bts,bsd->btd"}> : () -> ()
    %cst_145 = arith.constant dense<0.000000e+00> : vector<2x8x8xf32>
    %545 = tpu.matmul %544, %532, %cst_145 {dimension_numbers = #tpu.dot_dimension_numbers<[2], [1], [1], [2], [0, 0, 0, 1, 1, 2], [0], [0]>} : vector<2x8x8xbf16>, vector<2x8x8xbf16>, vector<2x8x8xf32> -> vector<2x8x8xf32>
    "tpu.trace_stop"() : () -> ()
    %546 = vector.shape_cast %545 : vector<2x8x8xf32> to vector<16x8xf32>
    %547 = tpu.concatenate %477, %500, %523, %546 in 1 : vector<16x8xf32>, vector<16x8xf32>, vector<16x8xf32>, vector<16x8xf32> -> vector<16x32xf32>
    %548 = arith.truncf %547 : vector<16x32xf32> to vector<16x32xbf16>
    %c0_146 = arith.constant 0 : index
    %c0_147 = arith.constant 0 : index
    %c0_148 = arith.constant 0 : index
    %549 = vector.load %arg15[%c0_146, %c0_147, %c0_148] : memref<2x32x32xbf16, #tpu.memory_space<vmem>>, vector<1x32x32xbf16>
    %550 = vector.shape_cast %549 : vector<1x32x32xbf16> to vector<32x32xbf16>
    %cst_149 = arith.constant dense<0.000000e+00> : vector<16x32xf32>
    %551 = tpu.matmul %548, %550, %cst_149 {dimension_numbers = #tpu.dot_dimension_numbers<[1], [0], [0], [1], [0, 0, 1, 1], [], []>} : vector<16x32xbf16>, vector<32x32xbf16>, vector<16x32xf32> -> vector<16x32xf32>
    %552 = arith.addf %412, %551 : vector<16x32xf32>
    %553 = vector.extract_strided_slice %414 {offsets = [5, 0], sizes = [1, 32], strides = [1, 1]} : vector<9x32xf32> to vector<1x32xf32>
    %554 = vector.broadcast %553 : vector<1x32xf32> to vector<16x32xf32>
    %555 = arith.addf %552, %554 : vector<16x32xf32>
    %556 = vector.extract_strided_slice %414 {offsets = [6, 0], sizes = [1, 32], strides = [1, 1]} : vector<9x32xf32> to vector<1x32xf32>
    %557 = vector.extract_strided_slice %414 {offsets = [7, 0], sizes = [1, 32], strides = [1, 1]} : vector<9x32xf32> to vector<1x32xf32>
    %cst_150 = arith.constant dense<0.000000e+00> : vector<16xf32>
    %558 = vector.multi_reduction <add>, %555, %cst_150 [1] : vector<16x32xf32> to vector<16xf32>
    %559 = vector.shape_cast %558 : vector<16xf32> to vector<16x1xf32>
    %cst_151 = arith.constant 3.200000e+01 : f32
    %560 = vector.broadcast %cst_151 : f32 to vector<16x1xf32>
    %561 = arith.divf %559, %560 : vector<16x1xf32>
    %562 = vector.broadcast %561 : vector<16x1xf32> to vector<16x32xf32>
    %563 = arith.subf %555, %562 : vector<16x32xf32>
    %564 = arith.mulf %563, %563 : vector<16x32xf32>
    %cst_152 = arith.constant dense<0.000000e+00> : vector<16xf32>
    %565 = vector.multi_reduction <add>, %564, %cst_152 [1] : vector<16x32xf32> to vector<16xf32>
    %566 = vector.shape_cast %565 : vector<16xf32> to vector<16x1xf32>
    %cst_153 = arith.constant 3.200000e+01 : f32
    %567 = vector.broadcast %cst_153 : f32 to vector<16x1xf32>
    %568 = arith.divf %566, %567 : vector<16x1xf32>
    %569 = vector.broadcast %561 : vector<16x1xf32> to vector<16x32xf32>
    %570 = arith.subf %555, %569 : vector<16x32xf32>
    %cst_154 = arith.constant 9.99999974E-6 : f32
    %571 = vector.broadcast %cst_154 : f32 to vector<16x1xf32>
    %572 = arith.addf %568, %571 : vector<16x1xf32>
    %573 = math.rsqrt %572 : vector<16x1xf32>
    %574 = vector.broadcast %573 : vector<16x1xf32> to vector<16x32xf32>
    %575 = arith.mulf %570, %574 : vector<16x32xf32>
    %576 = vector.broadcast %556 : vector<1x32xf32> to vector<16x32xf32>
    %577 = arith.mulf %575, %576 : vector<16x32xf32>
    %578 = vector.broadcast %557 : vector<1x32xf32> to vector<16x32xf32>
    %579 = arith.addf %577, %578 : vector<16x32xf32>
    %580 = arith.truncf %579 : vector<16x32xf32> to vector<16x32xbf16>
    %c0_155 = arith.constant 0 : index
    %c0_156 = arith.constant 0 : index
    %c0_157 = arith.constant 0 : index
    %581 = vector.load %arg16[%c0_155, %c0_156, %c0_157] : memref<2x32x128xbf16, #tpu.memory_space<vmem>>, vector<1x32x128xbf16>
    %582 = vector.shape_cast %581 : vector<1x32x128xbf16> to vector<32x128xbf16>
    %cst_158 = arith.constant dense<0.000000e+00> : vector<16x128xf32>
    %583 = tpu.matmul %580, %582, %cst_158 {dimension_numbers = #tpu.dot_dimension_numbers<[1], [0], [0], [1], [0, 0, 1, 1], [], []>} : vector<16x32xbf16>, vector<32x128xbf16>, vector<16x128xf32> -> vector<16x128xf32>
    %c0_159 = arith.constant 0 : index
    %c0_160 = arith.constant 0 : index
    %c0_161 = arith.constant 0 : index
    %584 = vector.load %arg19[%c0_159, %c0_160, %c0_161] : memref<2x1x128xf32, #tpu.memory_space<vmem>>, vector<1x1x128xf32>
    %585 = vector.shape_cast %584 : vector<1x1x128xf32> to vector<1x128xf32>
    %586 = vector.broadcast %585 : vector<1x128xf32> to vector<16x128xf32>
    %587 = arith.addf %583, %586 : vector<16x128xf32>
    %cst_162 = arith.constant 1.702000e+00 : f32
    %588 = vector.broadcast %cst_162 : f32 to vector<16x128xf32>
    %589 = arith.mulf %588, %587 : vector<16x128xf32>
    %590 = arith.negf %589 : vector<16x128xf32>
    %591 = math.exp %590 : vector<16x128xf32>
    %cst_163 = arith.constant 1.000000e+00 : f32
    %592 = vector.broadcast %cst_163 : f32 to vector<16x128xf32>
    %593 = arith.addf %592, %591 : vector<16x128xf32>
    %594 = arith.divf %592, %593 : vector<16x128xf32>
    %595 = arith.mulf %587, %594 : vector<16x128xf32>
    %596 = arith.truncf %595 : vector<16x128xf32> to vector<16x128xbf16>
    %c0_164 = arith.constant 0 : index
    %c0_165 = arith.constant 0 : index
    %c0_166 = arith.constant 0 : index
    %597 = vector.load %arg17[%c0_164, %c0_165, %c0_166] : memref<2x128x32xbf16, #tpu.memory_space<vmem>>, vector<1x128x32xbf16>
    %598 = vector.shape_cast %597 : vector<1x128x32xbf16> to vector<128x32xbf16>
    %cst_167 = arith.constant dense<0.000000e+00> : vector<16x32xf32>
    %599 = tpu.matmul %596, %598, %cst_167 {dimension_numbers = #tpu.dot_dimension_numbers<[1], [0], [0], [1], [0, 0, 1, 1], [], []>} : vector<16x128xbf16>, vector<128x32xbf16>, vector<16x32xf32> -> vector<16x32xf32>
    %600 = vector.extract_strided_slice %414 {offsets = [8, 0], sizes = [1, 32], strides = [1, 1]} : vector<9x32xf32> to vector<1x32xf32>
    %601 = vector.broadcast %600 : vector<1x32xf32> to vector<16x32xf32>
    %602 = arith.addf %599, %601 : vector<16x32xf32>
    %603 = arith.addf %555, %602 : vector<16x32xf32>
    %c1_168 = arith.constant 1 : index
    %c0_169 = arith.constant 0 : index
    %c0_170 = arith.constant 0 : index
    %604 = vector.load %arg18[%c1_168, %c0_169, %c0_170] : memref<2x9x32xf32, #tpu.memory_space<vmem>>, vector<1x9x32xf32>
    %605 = vector.shape_cast %604 : vector<1x9x32xf32> to vector<9x32xf32>
    %606 = vector.extract_strided_slice %605 {offsets = [0, 0], sizes = [1, 32], strides = [1, 1]} : vector<9x32xf32> to vector<1x32xf32>
    %607 = vector.extract_strided_slice %605 {offsets = [1, 0], sizes = [1, 32], strides = [1, 1]} : vector<9x32xf32> to vector<1x32xf32>
    %cst_171 = arith.constant dense<0.000000e+00> : vector<16xf32>
    %608 = vector.multi_reduction <add>, %603, %cst_171 [1] : vector<16x32xf32> to vector<16xf32>
    %609 = vector.shape_cast %608 : vector<16xf32> to vector<16x1xf32>
    %cst_172 = arith.constant 3.200000e+01 : f32
    %610 = vector.broadcast %cst_172 : f32 to vector<16x1xf32>
    %611 = arith.divf %609, %610 : vector<16x1xf32>
    %612 = vector.broadcast %611 : vector<16x1xf32> to vector<16x32xf32>
    %613 = arith.subf %603, %612 : vector<16x32xf32>
    %614 = arith.mulf %613, %613 : vector<16x32xf32>
    %cst_173 = arith.constant dense<0.000000e+00> : vector<16xf32>
    %615 = vector.multi_reduction <add>, %614, %cst_173 [1] : vector<16x32xf32> to vector<16xf32>
    %616 = vector.shape_cast %615 : vector<16xf32> to vector<16x1xf32>
    %cst_174 = arith.constant 3.200000e+01 : f32
    %617 = vector.broadcast %cst_174 : f32 to vector<16x1xf32>
    %618 = arith.divf %616, %617 : vector<16x1xf32>
    %619 = vector.broadcast %611 : vector<16x1xf32> to vector<16x32xf32>
    %620 = arith.subf %603, %619 : vector<16x32xf32>
    %cst_175 = arith.constant 9.99999974E-6 : f32
    %621 = vector.broadcast %cst_175 : f32 to vector<16x1xf32>
    %622 = arith.addf %618, %621 : vector<16x1xf32>
    %623 = math.rsqrt %622 : vector<16x1xf32>
    %624 = vector.broadcast %623 : vector<16x1xf32> to vector<16x32xf32>
    %625 = arith.mulf %620, %624 : vector<16x32xf32>
    %626 = vector.broadcast %606 : vector<1x32xf32> to vector<16x32xf32>
    %627 = arith.mulf %625, %626 : vector<16x32xf32>
    %628 = vector.broadcast %607 : vector<1x32xf32> to vector<16x32xf32>
    %629 = arith.addf %627, %628 : vector<16x32xf32>
    %630 = arith.truncf %629 : vector<16x32xf32> to vector<16x32xbf16>
    %c1_176 = arith.constant 1 : index
    %c0_177 = arith.constant 0 : index
    %c0_178 = arith.constant 0 : index
    %631 = vector.load %arg14[%c1_176, %c0_177, %c0_178] : memref<2x32x96xbf16, #tpu.memory_space<vmem>>, vector<1x32x96xbf16>
    %632 = vector.shape_cast %631 : vector<1x32x96xbf16> to vector<32x96xbf16>
    %cst_179 = arith.constant dense<0.000000e+00> : vector<16x96xf32>
    %633 = tpu.matmul %630, %632, %cst_179 {dimension_numbers = #tpu.dot_dimension_numbers<[1], [0], [0], [1], [0, 0, 1, 1], [], []>} : vector<16x32xbf16>, vector<32x96xbf16>, vector<16x96xf32> -> vector<16x96xf32>
    %634 = vector.extract_strided_slice %633 {offsets = [0, 0], sizes = [16, 32], strides = [1, 1]} : vector<16x96xf32> to vector<16x32xf32>
    %635 = vector.extract_strided_slice %605 {offsets = [2, 0], sizes = [1, 32], strides = [1, 1]} : vector<9x32xf32> to vector<1x32xf32>
    %636 = vector.broadcast %635 : vector<1x32xf32> to vector<16x32xf32>
    %637 = arith.addf %634, %636 : vector<16x32xf32>
    %638 = vector.extract_strided_slice %633 {offsets = [0, 32], sizes = [16, 32], strides = [1, 1]} : vector<16x96xf32> to vector<16x32xf32>
    %639 = vector.extract_strided_slice %605 {offsets = [3, 0], sizes = [1, 32], strides = [1, 1]} : vector<9x32xf32> to vector<1x32xf32>
    %640 = vector.broadcast %639 : vector<1x32xf32> to vector<16x32xf32>
    %641 = arith.addf %638, %640 : vector<16x32xf32>
    %642 = vector.extract_strided_slice %633 {offsets = [0, 64], sizes = [16, 32], strides = [1, 1]} : vector<16x96xf32> to vector<16x32xf32>
    %643 = vector.extract_strided_slice %605 {offsets = [4, 0], sizes = [1, 32], strides = [1, 1]} : vector<9x32xf32> to vector<1x32xf32>
    %644 = vector.broadcast %643 : vector<1x32xf32> to vector<16x32xf32>
    %645 = arith.addf %642, %644 : vector<16x32xf32>
    %646 = vector.extract_strided_slice %637 {offsets = [0, 0], sizes = [16, 8], strides = [1, 1]} : vector<16x32xf32> to vector<16x8xf32>
    %647 = vector.shape_cast %646 : vector<16x8xf32> to vector<2x8x8xf32>
    %648 = arith.truncf %647 : vector<2x8x8xf32> to vector<2x8x8xbf16>
    %649 = vector.extract_strided_slice %641 {offsets = [0, 0], sizes = [16, 8], strides = [1, 1]} : vector<16x32xf32> to vector<16x8xf32>
    %650 = vector.shape_cast %649 : vector<16x8xf32> to vector<2x8x8xf32>
    %651 = arith.truncf %650 : vector<2x8x8xf32> to vector<2x8x8xbf16>
    %652 = vector.extract_strided_slice %645 {offsets = [0, 0], sizes = [16, 8], strides = [1, 1]} : vector<16x32xf32> to vector<16x8xf32>
    %653 = vector.shape_cast %652 : vector<16x8xf32> to vector<2x8x8xf32>
    %654 = arith.truncf %653 : vector<2x8x8xf32> to vector<2x8x8xbf16>
    "tpu.trace_start"() <{level = 10 : i32, message = "btd,bsd->bts"}> : () -> ()
    %cst_180 = arith.constant dense<0.000000e+00> : vector<2x8x8xf32>
    %655 = tpu.matmul %648, %651, %cst_180 {dimension_numbers = #tpu.dot_dimension_numbers<[2], [2], [1], [1], [0, 0, 0, 1, 1, 1], [0], [0]>} : vector<2x8x8xbf16>, vector<2x8x8xbf16>, vector<2x8x8xf32> -> vector<2x8x8xf32>
    "tpu.trace_stop"() : () -> ()
    %cst_181 = arith.constant dense<0xFF800000> : vector<2x8xf32>
    %656 = vector.multi_reduction <maximumf>, %655, %cst_181 [2] : vector<2x8x8xf32> to vector<2x8xf32>
    %657 = vector.shape_cast %656 : vector<2x8xf32> to vector<2x8x1xf32>
    %658 = vector.broadcast %657 : vector<2x8x1xf32> to vector<2x8x8xf32>
    %659 = arith.subf %655, %658 : vector<2x8x8xf32>
    %660 = math.exp %659 : vector<2x8x8xf32>
    %cst_182 = arith.constant dense<0.000000e+00> : vector<2x8xf32>
    %661 = vector.multi_reduction <add>, %660, %cst_182 [2] : vector<2x8x8xf32> to vector<2x8xf32>
    %662 = vector.shape_cast %661 : vector<2x8xf32> to vector<2x8x1xf32>
    %663 = tpu.reciprocal %662 {approx = true} : vector<2x8x1xf32> -> vector<2x8x1xf32>
    %664 = vector.broadcast %663 : vector<2x8x1xf32> to vector<2x8x8xf32>
    %665 = arith.mulf %660, %664 : vector<2x8x8xf32>
    %666 = arith.truncf %665 : vector<2x8x8xf32> to vector<2x8x8xbf16>
    "tpu.trace_start"() <{level = 10 : i32, message = "bts,bsd->btd"}> : () -> ()
    %cst_183 = arith.constant dense<0.000000e+00> : vector<2x8x8xf32>
    %667 = tpu.matmul %666, %654, %cst_183 {dimension_numbers = #tpu.dot_dimension_numbers<[2], [1], [1], [2], [0, 0, 0, 1, 1, 2], [0], [0]>} : vector<2x8x8xbf16>, vector<2x8x8xbf16>, vector<2x8x8xf32> -> vector<2x8x8xf32>
    "tpu.trace_stop"() : () -> ()
    %668 = vector.shape_cast %667 : vector<2x8x8xf32> to vector<16x8xf32>
    %669 = vector.extract_strided_slice %637 {offsets = [0, 8], sizes = [16, 8], strides = [1, 1]} : vector<16x32xf32> to vector<16x8xf32>
    %670 = vector.shape_cast %669 : vector<16x8xf32> to vector<2x8x8xf32>
    %671 = arith.truncf %670 : vector<2x8x8xf32> to vector<2x8x8xbf16>
    %672 = vector.extract_strided_slice %641 {offsets = [0, 8], sizes = [16, 8], strides = [1, 1]} : vector<16x32xf32> to vector<16x8xf32>
    %673 = vector.shape_cast %672 : vector<16x8xf32> to vector<2x8x8xf32>
    %674 = arith.truncf %673 : vector<2x8x8xf32> to vector<2x8x8xbf16>
    %675 = vector.extract_strided_slice %645 {offsets = [0, 8], sizes = [16, 8], strides = [1, 1]} : vector<16x32xf32> to vector<16x8xf32>
    %676 = vector.shape_cast %675 : vector<16x8xf32> to vector<2x8x8xf32>
    %677 = arith.truncf %676 : vector<2x8x8xf32> to vector<2x8x8xbf16>
    "tpu.trace_start"() <{level = 10 : i32, message = "btd,bsd->bts"}> : () -> ()
    %cst_184 = arith.constant dense<0.000000e+00> : vector<2x8x8xf32>
    %678 = tpu.matmul %671, %674, %cst_184 {dimension_numbers = #tpu.dot_dimension_numbers<[2], [2], [1], [1], [0, 0, 0, 1, 1, 1], [0], [0]>} : vector<2x8x8xbf16>, vector<2x8x8xbf16>, vector<2x8x8xf32> -> vector<2x8x8xf32>
    "tpu.trace_stop"() : () -> ()
    %cst_185 = arith.constant dense<0xFF800000> : vector<2x8xf32>
    %679 = vector.multi_reduction <maximumf>, %678, %cst_185 [2] : vector<2x8x8xf32> to vector<2x8xf32>
    %680 = vector.shape_cast %679 : vector<2x8xf32> to vector<2x8x1xf32>
    %681 = vector.broadcast %680 : vector<2x8x1xf32> to vector<2x8x8xf32>
    %682 = arith.subf %678, %681 : vector<2x8x8xf32>
    %683 = math.exp %682 : vector<2x8x8xf32>
    %cst_186 = arith.constant dense<0.000000e+00> : vector<2x8xf32>
    %684 = vector.multi_reduction <add>, %683, %cst_186 [2] : vector<2x8x8xf32> to vector<2x8xf32>
    %685 = vector.shape_cast %684 : vector<2x8xf32> to vector<2x8x1xf32>
    %686 = tpu.reciprocal %685 {approx = true} : vector<2x8x1xf32> -> vector<2x8x1xf32>
    %687 = vector.broadcast %686 : vector<2x8x1xf32> to vector<2x8x8xf32>
    %688 = arith.mulf %683, %687 : vector<2x8x8xf32>
    %689 = arith.truncf %688 : vector<2x8x8xf32> to vector<2x8x8xbf16>
    "tpu.trace_start"() <{level = 10 : i32, message = "bts,bsd->btd"}> : () -> ()
    %cst_187 = arith.constant dense<0.000000e+00> : vector<2x8x8xf32>
    %690 = tpu.matmul %689, %677, %cst_187 {dimension_numbers = #tpu.dot_dimension_numbers<[2], [1], [1], [2], [0, 0, 0, 1, 1, 2], [0], [0]>} : vector<2x8x8xbf16>, vector<2x8x8xbf16>, vector<2x8x8xf32> -> vector<2x8x8xf32>
    "tpu.trace_stop"() : () -> ()
    %691 = vector.shape_cast %690 : vector<2x8x8xf32> to vector<16x8xf32>
    %692 = vector.extract_strided_slice %637 {offsets = [0, 16], sizes = [16, 8], strides = [1, 1]} : vector<16x32xf32> to vector<16x8xf32>
    %693 = vector.shape_cast %692 : vector<16x8xf32> to vector<2x8x8xf32>
    %694 = arith.truncf %693 : vector<2x8x8xf32> to vector<2x8x8xbf16>
    %695 = vector.extract_strided_slice %641 {offsets = [0, 16], sizes = [16, 8], strides = [1, 1]} : vector<16x32xf32> to vector<16x8xf32>
    %696 = vector.shape_cast %695 : vector<16x8xf32> to vector<2x8x8xf32>
    %697 = arith.truncf %696 : vector<2x8x8xf32> to vector<2x8x8xbf16>
    %698 = vector.extract_strided_slice %645 {offsets = [0, 16], sizes = [16, 8], strides = [1, 1]} : vector<16x32xf32> to vector<16x8xf32>
    %699 = vector.shape_cast %698 : vector<16x8xf32> to vector<2x8x8xf32>
    %700 = arith.truncf %699 : vector<2x8x8xf32> to vector<2x8x8xbf16>
    "tpu.trace_start"() <{level = 10 : i32, message = "btd,bsd->bts"}> : () -> ()
    %cst_188 = arith.constant dense<0.000000e+00> : vector<2x8x8xf32>
    %701 = tpu.matmul %694, %697, %cst_188 {dimension_numbers = #tpu.dot_dimension_numbers<[2], [2], [1], [1], [0, 0, 0, 1, 1, 1], [0], [0]>} : vector<2x8x8xbf16>, vector<2x8x8xbf16>, vector<2x8x8xf32> -> vector<2x8x8xf32>
    "tpu.trace_stop"() : () -> ()
    %cst_189 = arith.constant dense<0xFF800000> : vector<2x8xf32>
    %702 = vector.multi_reduction <maximumf>, %701, %cst_189 [2] : vector<2x8x8xf32> to vector<2x8xf32>
    %703 = vector.shape_cast %702 : vector<2x8xf32> to vector<2x8x1xf32>
    %704 = vector.broadcast %703 : vector<2x8x1xf32> to vector<2x8x8xf32>
    %705 = arith.subf %701, %704 : vector<2x8x8xf32>
    %706 = math.exp %705 : vector<2x8x8xf32>
    %cst_190 = arith.constant dense<0.000000e+00> : vector<2x8xf32>
    %707 = vector.multi_reduction <add>, %706, %cst_190 [2] : vector<2x8x8xf32> to vector<2x8xf32>
    %708 = vector.shape_cast %707 : vector<2x8xf32> to vector<2x8x1xf32>
    %709 = tpu.reciprocal %708 {approx = true} : vector<2x8x1xf32> -> vector<2x8x1xf32>
    %710 = vector.broadcast %709 : vector<2x8x1xf32> to vector<2x8x8xf32>
    %711 = arith.mulf %706, %710 : vector<2x8x8xf32>
    %712 = arith.truncf %711 : vector<2x8x8xf32> to vector<2x8x8xbf16>
    "tpu.trace_start"() <{level = 10 : i32, message = "bts,bsd->btd"}> : () -> ()
    %cst_191 = arith.constant dense<0.000000e+00> : vector<2x8x8xf32>
    %713 = tpu.matmul %712, %700, %cst_191 {dimension_numbers = #tpu.dot_dimension_numbers<[2], [1], [1], [2], [0, 0, 0, 1, 1, 2], [0], [0]>} : vector<2x8x8xbf16>, vector<2x8x8xbf16>, vector<2x8x8xf32> -> vector<2x8x8xf32>
    "tpu.trace_stop"() : () -> ()
    %714 = vector.shape_cast %713 : vector<2x8x8xf32> to vector<16x8xf32>
    %715 = vector.extract_strided_slice %637 {offsets = [0, 24], sizes = [16, 8], strides = [1, 1]} : vector<16x32xf32> to vector<16x8xf32>
    %716 = vector.shape_cast %715 : vector<16x8xf32> to vector<2x8x8xf32>
    %717 = arith.truncf %716 : vector<2x8x8xf32> to vector<2x8x8xbf16>
    %718 = vector.extract_strided_slice %641 {offsets = [0, 24], sizes = [16, 8], strides = [1, 1]} : vector<16x32xf32> to vector<16x8xf32>
    %719 = vector.shape_cast %718 : vector<16x8xf32> to vector<2x8x8xf32>
    %720 = arith.truncf %719 : vector<2x8x8xf32> to vector<2x8x8xbf16>
    %721 = vector.extract_strided_slice %645 {offsets = [0, 24], sizes = [16, 8], strides = [1, 1]} : vector<16x32xf32> to vector<16x8xf32>
    %722 = vector.shape_cast %721 : vector<16x8xf32> to vector<2x8x8xf32>
    %723 = arith.truncf %722 : vector<2x8x8xf32> to vector<2x8x8xbf16>
    "tpu.trace_start"() <{level = 10 : i32, message = "btd,bsd->bts"}> : () -> ()
    %cst_192 = arith.constant dense<0.000000e+00> : vector<2x8x8xf32>
    %724 = tpu.matmul %717, %720, %cst_192 {dimension_numbers = #tpu.dot_dimension_numbers<[2], [2], [1], [1], [0, 0, 0, 1, 1, 1], [0], [0]>} : vector<2x8x8xbf16>, vector<2x8x8xbf16>, vector<2x8x8xf32> -> vector<2x8x8xf32>
    "tpu.trace_stop"() : () -> ()
    %cst_193 = arith.constant dense<0xFF800000> : vector<2x8xf32>
    %725 = vector.multi_reduction <maximumf>, %724, %cst_193 [2] : vector<2x8x8xf32> to vector<2x8xf32>
    %726 = vector.shape_cast %725 : vector<2x8xf32> to vector<2x8x1xf32>
    %727 = vector.broadcast %726 : vector<2x8x1xf32> to vector<2x8x8xf32>
    %728 = arith.subf %724, %727 : vector<2x8x8xf32>
    %729 = math.exp %728 : vector<2x8x8xf32>
    %cst_194 = arith.constant dense<0.000000e+00> : vector<2x8xf32>
    %730 = vector.multi_reduction <add>, %729, %cst_194 [2] : vector<2x8x8xf32> to vector<2x8xf32>
    %731 = vector.shape_cast %730 : vector<2x8xf32> to vector<2x8x1xf32>
    %732 = tpu.reciprocal %731 {approx = true} : vector<2x8x1xf32> -> vector<2x8x1xf32>
    %733 = vector.broadcast %732 : vector<2x8x1xf32> to vector<2x8x8xf32>
    %734 = arith.mulf %729, %733 : vector<2x8x8xf32>
    %735 = arith.truncf %734 : vector<2x8x8xf32> to vector<2x8x8xbf16>
    "tpu.trace_start"() <{level = 10 : i32, message = "bts,bsd->btd"}> : () -> ()
    %cst_195 = arith.constant dense<0.000000e+00> : vector<2x8x8xf32>
    %736 = tpu.matmul %735, %723, %cst_195 {dimension_numbers = #tpu.dot_dimension_numbers<[2], [1], [1], [2], [0, 0, 0, 1, 1, 2], [0], [0]>} : vector<2x8x8xbf16>, vector<2x8x8xbf16>, vector<2x8x8xf32> -> vector<2x8x8xf32>
    "tpu.trace_stop"() : () -> ()
    %737 = vector.shape_cast %736 : vector<2x8x8xf32> to vector<16x8xf32>
    %738 = tpu.concatenate %668, %691, %714, %737 in 1 : vector<16x8xf32>, vector<16x8xf32>, vector<16x8xf32>, vector<16x8xf32> -> vector<16x32xf32>
    %739 = arith.truncf %738 : vector<16x32xf32> to vector<16x32xbf16>
    %c1_196 = arith.constant 1 : index
    %c0_197 = arith.constant 0 : index
    %c0_198 = arith.constant 0 : index
    %740 = vector.load %arg15[%c1_196, %c0_197, %c0_198] : memref<2x32x32xbf16, #tpu.memory_space<vmem>>, vector<1x32x32xbf16>
    %741 = vector.shape_cast %740 : vector<1x32x32xbf16> to vector<32x32xbf16>
    %cst_199 = arith.constant dense<0.000000e+00> : vector<16x32xf32>
    %742 = tpu.matmul %739, %741, %cst_199 {dimension_numbers = #tpu.dot_dimension_numbers<[1], [0], [0], [1], [0, 0, 1, 1], [], []>} : vector<16x32xbf16>, vector<32x32xbf16>, vector<16x32xf32> -> vector<16x32xf32>
    %743 = arith.addf %603, %742 : vector<16x32xf32>
    %744 = vector.extract_strided_slice %605 {offsets = [5, 0], sizes = [1, 32], strides = [1, 1]} : vector<9x32xf32> to vector<1x32xf32>
    %745 = vector.broadcast %744 : vector<1x32xf32> to vector<16x32xf32>
    %746 = arith.addf %743, %745 : vector<16x32xf32>
    %747 = vector.extract_strided_slice %605 {offsets = [6, 0], sizes = [1, 32], strides = [1, 1]} : vector<9x32xf32> to vector<1x32xf32>
    %748 = vector.extract_strided_slice %605 {offsets = [7, 0], sizes = [1, 32], strides = [1, 1]} : vector<9x32xf32> to vector<1x32xf32>
    %cst_200 = arith.constant dense<0.000000e+00> : vector<16xf32>
    %749 = vector.multi_reduction <add>, %746, %cst_200 [1] : vector<16x32xf32> to vector<16xf32>
    %750 = vector.shape_cast %749 : vector<16xf32> to vector<16x1xf32>
    %cst_201 = arith.constant 3.200000e+01 : f32
    %751 = vector.broadcast %cst_201 : f32 to vector<16x1xf32>
    %752 = arith.divf %750, %751 : vector<16x1xf32>
    %753 = vector.broadcast %752 : vector<16x1xf32> to vector<16x32xf32>
    %754 = arith.subf %746, %753 : vector<16x32xf32>
    %755 = arith.mulf %754, %754 : vector<16x32xf32>
    %cst_202 = arith.constant dense<0.000000e+00> : vector<16xf32>
    %756 = vector.multi_reduction <add>, %755, %cst_202 [1] : vector<16x32xf32> to vector<16xf32>
    %757 = vector.shape_cast %756 : vector<16xf32> to vector<16x1xf32>
    %cst_203 = arith.constant 3.200000e+01 : f32
    %758 = vector.broadcast %cst_203 : f32 to vector<16x1xf32>
    %759 = arith.divf %757, %758 : vector<16x1xf32>
    %760 = vector.broadcast %752 : vector<16x1xf32> to vector<16x32xf32>
    %761 = arith.subf %746, %760 : vector<16x32xf32>
    %cst_204 = arith.constant 9.99999974E-6 : f32
    %762 = vector.broadcast %cst_204 : f32 to vector<16x1xf32>
    %763 = arith.addf %759, %762 : vector<16x1xf32>
    %764 = math.rsqrt %763 : vector<16x1xf32>
    %765 = vector.broadcast %764 : vector<16x1xf32> to vector<16x32xf32>
    %766 = arith.mulf %761, %765 : vector<16x32xf32>
    %767 = vector.broadcast %747 : vector<1x32xf32> to vector<16x32xf32>
    %768 = arith.mulf %766, %767 : vector<16x32xf32>
    %769 = vector.broadcast %748 : vector<1x32xf32> to vector<16x32xf32>
    %770 = arith.addf %768, %769 : vector<16x32xf32>
    %771 = arith.truncf %770 : vector<16x32xf32> to vector<16x32xbf16>
    %c1_205 = arith.constant 1 : index
    %c0_206 = arith.constant 0 : index
    %c0_207 = arith.constant 0 : index
    %772 = vector.load %arg16[%c1_205, %c0_206, %c0_207] : memref<2x32x128xbf16, #tpu.memory_space<vmem>>, vector<1x32x128xbf16>
    %773 = vector.shape_cast %772 : vector<1x32x128xbf16> to vector<32x128xbf16>
    %cst_208 = arith.constant dense<0.000000e+00> : vector<16x128xf32>
    %774 = tpu.matmul %771, %773, %cst_208 {dimension_numbers = #tpu.dot_dimension_numbers<[1], [0], [0], [1], [0, 0, 1, 1], [], []>} : vector<16x32xbf16>, vector<32x128xbf16>, vector<16x128xf32> -> vector<16x128xf32>
    %c1_209 = arith.constant 1 : index
    %c0_210 = arith.constant 0 : index
    %c0_211 = arith.constant 0 : index
    %775 = vector.load %arg19[%c1_209, %c0_210, %c0_211] : memref<2x1x128xf32, #tpu.memory_space<vmem>>, vector<1x1x128xf32>
    %776 = vector.shape_cast %775 : vector<1x1x128xf32> to vector<1x128xf32>
    %777 = vector.broadcast %776 : vector<1x128xf32> to vector<16x128xf32>
    %778 = arith.addf %774, %777 : vector<16x128xf32>
    %cst_212 = arith.constant 1.702000e+00 : f32
    %779 = vector.broadcast %cst_212 : f32 to vector<16x128xf32>
    %780 = arith.mulf %779, %778 : vector<16x128xf32>
    %781 = arith.negf %780 : vector<16x128xf32>
    %782 = math.exp %781 : vector<16x128xf32>
    %cst_213 = arith.constant 1.000000e+00 : f32
    %783 = vector.broadcast %cst_213 : f32 to vector<16x128xf32>
    %784 = arith.addf %783, %782 : vector<16x128xf32>
    %785 = arith.divf %783, %784 : vector<16x128xf32>
    %786 = arith.mulf %778, %785 : vector<16x128xf32>
    %787 = arith.truncf %786 : vector<16x128xf32> to vector<16x128xbf16>
    %c1_214 = arith.constant 1 : index
    %c0_215 = arith.constant 0 : index
    %c0_216 = arith.constant 0 : index
    %788 = vector.load %arg17[%c1_214, %c0_215, %c0_216] : memref<2x128x32xbf16, #tpu.memory_space<vmem>>, vector<1x128x32xbf16>
    %789 = vector.shape_cast %788 : vector<1x128x32xbf16> to vector<128x32xbf16>
    %cst_217 = arith.constant dense<0.000000e+00> : vector<16x32xf32>
    %790 = tpu.matmul %787, %789, %cst_217 {dimension_numbers = #tpu.dot_dimension_numbers<[1], [0], [0], [1], [0, 0, 1, 1], [], []>} : vector<16x128xbf16>, vector<128x32xbf16>, vector<16x32xf32> -> vector<16x32xf32>
    %791 = vector.extract_strided_slice %605 {offsets = [8, 0], sizes = [1, 32], strides = [1, 1]} : vector<9x32xf32> to vector<1x32xf32>
    %792 = vector.broadcast %791 : vector<1x32xf32> to vector<16x32xf32>
    %793 = arith.addf %790, %792 : vector<16x32xf32>
    %794 = arith.addf %746, %793 : vector<16x32xf32>
    %795 = arith.truncf %794 : vector<16x32xf32> to vector<16x32xbf16>
    %c0_218 = arith.constant 0 : index
    %c0_219 = arith.constant 0 : index
    %796 = vector.load %arg20[%c0_218, %c0_219] : memref<32x16xbf16, #tpu.memory_space<vmem>>, vector<32x16xbf16>
    %cst_220 = arith.constant dense<0.000000e+00> : vector<16x16xf32>
    %797 = tpu.matmul %795, %796, %cst_220 {dimension_numbers = #tpu.dot_dimension_numbers<[1], [0], [0], [1], [0, 0, 1, 1], [], []>} : vector<16x32xbf16>, vector<32x16xbf16>, vector<16x16xf32> -> vector<16x16xf32>
    %798 = vector.shape_cast %797 : vector<16x16xf32> to vector<2x8x16xf32>
    %cst_221 = arith.constant dense<0.000000e+00> : vector<2x16xf32>
    %799 = vector.multi_reduction <add>, %798, %cst_221 [1] : vector<2x8x16xf32> to vector<2x16xf32>
    %cst_222 = arith.constant 8.000000e+00 : f32
    %800 = vector.broadcast %cst_222 : f32 to vector<2x16xf32>
    %801 = arith.divf %799, %800 : vector<2x16xf32>
    %802 = arith.mulf %400, %400 : vector<2x16xf32>
    %cst_223 = arith.constant dense<0.000000e+00> : vector<2xf32>
    %803 = vector.multi_reduction <add>, %802, %cst_223 [1] : vector<2x16xf32> to vector<2xf32>
    %804 = vector.shape_cast %803 : vector<2xf32> to vector<2x1xf32>
    %cst_224 = arith.constant 9.99999996E-13 : f32
    %805 = vector.broadcast %cst_224 : f32 to vector<2x1xf32>
    %806 = arith.addf %804, %805 : vector<2x1xf32>
    %807 = math.rsqrt %806 : vector<2x1xf32>
    %808 = vector.broadcast %807 : vector<2x1xf32> to vector<2x16xf32>
    %809 = arith.mulf %400, %808 : vector<2x16xf32>
    %810 = arith.mulf %801, %801 : vector<2x16xf32>
    %cst_225 = arith.constant dense<0.000000e+00> : vector<2xf32>
    %811 = vector.multi_reduction <add>, %810, %cst_225 [1] : vector<2x16xf32> to vector<2xf32>
    %812 = vector.shape_cast %811 : vector<2xf32> to vector<2x1xf32>
    %cst_226 = arith.constant 9.99999996E-13 : f32
    %813 = vector.broadcast %cst_226 : f32 to vector<2x1xf32>
    %814 = arith.addf %812, %813 : vector<2x1xf32>
    %815 = math.rsqrt %814 : vector<2x1xf32>
    %816 = vector.broadcast %815 : vector<2x1xf32> to vector<2x16xf32>
    %817 = arith.mulf %801, %816 : vector<2x16xf32>
    %c0_227 = arith.constant 0 : index
    %c0_228 = arith.constant 0 : index
    %818 = memref.load %arg0[%c0_227, %c0_228] : memref<1x1xf32, #tpu.memory_space<smem>>
    %819 = vector.broadcast %818 : f32 to vector<1x1xf32>
    %820 = math.exp %819 : vector<1x1xf32>
    "tpu.trace_start"() <{level = 10 : i32, message = "be,ce->bc"}> : () -> ()
    %cst_229 = arith.constant dense<0.000000e+00> : vector<2x2xf32>
    %821 = tpu.matmul %809, %817, %cst_229 {dimension_numbers = #tpu.dot_dimension_numbers<[1], [1], [0], [0], [0, 0, 1, 0], [], []>} : vector<2x16xf32>, vector<2x16xf32>, vector<2x2xf32> -> vector<2x2xf32>
    "tpu.trace_stop"() : () -> ()
    %822 = vector.broadcast %820 : vector<1x1xf32> to vector<2x2xf32>
    %823 = arith.mulf %821, %822 : vector<2x2xf32>
    %c0_230 = arith.constant 0 : index
    %c0_231 = arith.constant 0 : index
    %824 = vector.load %arg21[%c0_230, %c0_231] : memref<2x2xf32, #tpu.memory_space<vmem>>, vector<2x2xf32>
    tpu.vector_store %arg21[%c0_230, %c0_231], %823 {strides = array<i32>} : memref<2x2xf32, #tpu.memory_space<vmem>>, vector<2x2xf32>,
    "tpu.trace_start"() <{level = 10 : i32, message = "be,ce->bc"}> : () -> ()
    %cst_232 = arith.constant dense<0.000000e+00> : vector<2x2xf32>
    %825 = tpu.matmul %817, %809, %cst_232 {dimension_numbers = #tpu.dot_dimension_numbers<[1], [1], [0], [0], [0, 0, 1, 0], [], []>} : vector<2x16xf32>, vector<2x16xf32>, vector<2x2xf32> -> vector<2x2xf32>
    "tpu.trace_stop"() : () -> ()
    %826 = vector.broadcast %820 : vector<1x1xf32> to vector<2x2xf32>
    %827 = arith.mulf %825, %826 : vector<2x2xf32>
    %c0_233 = arith.constant 0 : index
    %c0_234 = arith.constant 0 : index
    %828 = vector.load %arg22[%c0_233, %c0_234] : memref<2x2xf32, #tpu.memory_space<vmem>>, vector<2x2xf32>
    tpu.vector_store %arg22[%c0_233, %c0_234], %827 {strides = array<i32>} : memref<2x2xf32, #tpu.memory_space<vmem>>, vector<2x2xf32>,
    return
  }
}

</mosaic_0001>

<bundles_post_ra>
// kernel: clip_forward.1
= control target key start
LH: loop header
LB: loop body
LE: loop exit
PB: predicated region body
PF: predicated region fallthrough
CT: control target
= control target key end

     0   :  { %s8904_s0 = inlined_call_operand.<no memory space> [shape: f32[1,1], index: 0, kind: input, shape index: {}]   ;;  %s8905_s1 = inlined_call_operand.vmem [shape: f32[2,8,12], index: 1, kind: input, shape index: {}]   ;;  %s8906_s2 = inlined_call_operand.vmem [shape: bf16[12,32], index: 2, kind: input, shape index: {}]   ;;  %s8907_s3 = inlined_call_operand.vmem [shape: f32[9,32], index: 3, kind: input, shape index: {}]   ;;  %s8908_s4 = inlined_call_operand.vmem [shape: bf16[2,32,96], index: 4, kind: input, shape index: {}]   ;;  %s8909_s5 = inlined_call_operand.vmem [shape: bf16[2,32,32], index: 5, kind: input, shape index: {}]   ;;  %s8910_s6 = inlined_call_operand.vmem [shape: bf16[2,32,128], index: 6, kind: input, shape index: {}]   ;;  %s8911_s7 = inlined_call_operand.vmem [shape: bf16[2,128,32], index: 7, kind: input, shape index: {}]   ;;  %s8912_s8 = inlined_call_operand.vmem [shape: f32[2,9,32], index: 8, kind: input, shape index: {}]   ;;  %s8913_s9 = inlined_call_operand.vmem [shape: f32[2,1,128], index: 9, kind: input, shape index: {}]   ;;  %s8914_s10 = inlined_call_operand.vmem [shape: bf16[32,16], index: 10, kind: input, shape index: {}]   ;;  %s8915_s11 = inlined_call_operand.vmem [shape: f32[2,8,16], index: 11, kind: input, shape index: {}]   ;;  %s8916_s12 = inlined_call_operand.vmem [shape: bf16[16,32], index: 12, kind: input, shape index: {}]   ;;  %s8917_s13 = inlined_call_operand.vmem [shape: f32[9,32], index: 13, kind: input, shape index: {}]   ;;  %s8918_s14 = inlined_call_operand.vmem [shape: bf16[2,32,96], index: 14, kind: input, shape index: {}]   ;;  %s8919_s15 = inlined_call_operand.vmem [shape: bf16[2,32,32], index: 15, kind: input, shape index: {}]   ;;  %s8920_s16 = inlined_call_operand.vmem [shape: bf16[2,32,128], index: 16, kind: input, shape index: {}]   ;;  %s8921_s17 = inlined_call_operand.vmem [shape: bf16[2,128,32], index: 17, kind: input, shape index: {}]   ;;  %s8922_s18 = inlined_call_operand.vmem [shape: f32[2,9,32], index: 18, kind: input, shape index: {}]   ;;  %s8923_s19 = inlined_call_operand.vmem [shape: f32[2,1,128], index: 19, kind: input, shape index: {}]   ;;  %s8924_s20 = inlined_call_operand.vmem [shape: bf16[32,16], index: 20, kind: input, shape index: {}]   ;;  %s8925_s21 = inlined_call_operand.hbm [shape: f32[2,2], index: 21, kind: output, shape index: {0}]   ;;  %s8926_s22 = inlined_call_operand.hbm [shape: f32[2,2], index: 22, kind: output, shape index: {1}]  }
   0x1   :  { %8962 = sst [smem:[#allocation9_spill]] %s8904_s0 }
   0x2   :  { %8963 = sst [smem:[#allocation10_spill]] %s8905_s1 }
   0x3   :  { %8964 = sst [smem:[#allocation11_spill]] %s8906_s2 }
   0x4   :  { %8965 = sst [smem:[#allocation12_spill]] %s8907_s3 }
   0x5   :  { %8966 = sst [smem:[#allocation13_spill]] %s8908_s4 }
   0x6   :  { %8967 = sst [smem:[#allocation14_spill]] %s8909_s5 }
   0x7   :  { %8968 = sst [smem:[#allocation15_spill]] %s8910_s6 }
   0x8   :  { %8969 = sst [smem:[#allocation16_spill]] %s8925_s21 }
   0x9   :  { %8970 = sst [smem:[#allocation17_spill]] %s8926_s22 }
   0xa   :  { %29 = vsyncpa [#allocation4], 0  ;;  %vm101_vm0 = vcmask 1045504   ;;  %v7426_v0 = vmov 0.0   ;;  %s8971_s29 = sld [smem:[#allocation11_spill]]  ;;  %vm7427_vm1 = vmmov 0  }
   0xb   :  { %6445 = vmatprep.subr.bf16.mxu0 %v7426_v0  ;;  %s8972_s0 = sld [smem:[#allocation10_spill]]  ;;  %6465 = vmatprep.subr.bf16.mxu1 %v7426_v0  ;;  %vm97_vm2 = vcmask 97280  }
   0xc   :  { %6447 = vmatprep.mubr.msk.bf16.mxu0 %vm7427_vm1, %v7426_v0  ;;  %6467 = vmatprep.mubr.msk.bf16.mxu1 %vm7427_vm1, %v7426_v0 }
  0x10   :  { %v7122_v1 = vld [vmem:[%s8971_s29] sm:$0x3f]  }
  0x11   :  { %v83_v2 = vld [vmem:[%s8972_s0] sm:$0xff]  ;;  %v84_v3 = vld [vmem:[%s8972_s0 + $0x8] sm:$0xff]  ;;  %v103_v4 = vsel %vm101_vm0, %v7122_v1, 0 }
  0x12   :  { %v85_v5 = vpack.c.bf16 %v84_v3, %v83_v2  ;;  %6446 = vmatpush3.bf16.msra.mxu0 %v103_v4 }
  0x13   :  { %6451 = vmatprep.subr.bf16.mxu0 %v7426_v0 }
  0x15   :  { %6448 = vmatmul.mubr.msk.bf16.vlgmr.msra.gmra.mxu0 %vm97_vm2, %v85_v5 }
  0x16   :  { %6455 = vmatprep.mubr.msk.bf16.mxu0 %vm7427_vm1, %v7426_v0 }
  0x17   :  { %30 = vsyncpa [#allocation6], 0  ;;  %v88_v6 = vlaneseq  ;;  %s8973_s6 = sld [smem:[#allocation12_spill]]  ;;  %vm78_vm3 = vcmask 1046528   ;;  %vm150_vm4 = vcmask 261120   ;;  %v7617_v38 = vld [vmem:[%s8912_s8] sm:$0xff] }
  0x18   :  { %s8974_s3 = sld [smem:[#allocation13_spill]]  ;;  %s8960_s0 = smov 32   ;;  %vm286_vm5 = vcmask 64512   ;;  %vm412_vm6 = vcmask 1043456   ;;  %vm1193_vm7 = vcmask 130048   ;;  %vm1196_vm8 = vcmask 195584  }
  0x19   :  { %v7578_v7 = vshrl.u32 %v88_v6, 7  ;;  %s8958_s23 = smov 96   ;;  %s8956_s1 = smov 64   ;;  %vm5786_vm9 = vcmask 1041409   ;;  %vm5789_vm10 = vcmask 123904   ;;  %vm5905_vm11 = vcmask 9216  }
  0x1a   :  { %s8954_s5 = smov 88   ;;  %s8952_s24 = smov 120  }
  0x1b   :  { %v7587_v10 = vsub.s32 0, %v7578_v7  ;;  %v7612_v37 = vsub.s32 3, %v7578_v7  ;;  %v7625_v49 = vsub.s32 1, %v7578_v7  ;;  %v7641_v4 = vsub.s32 2, %v7578_v7  ;;  %s8948_s25 = smov 80   ;;  %s8946_s26 = smov 112  }
  0x1c   :  { %s8942_s2 = smov 48   ;;  %s8940_s27 = smov 72  }
  0x1d   :  { %v74_v8 = vld [vmem:[%s8973_s6] sm:$0xff]  ;;  %v75_v9 = vld [vmem:[%s8973_s6 + $0x8] sm:$0x1]  ;;  %v260_v39 = vrot.slane %v7617_v38, %v7612_v37  ;;  %v181_v48 = vrot.slane %v7617_v38, %v7587_v10  ;;  %v187_v53 = vrot.slane %v7617_v38, %v7625_v49  ;;  %v254_v5 = vrot.slane %v7617_v38, %v7641_v4  ;;  %s8950_s6 = smov 56   ;;  %s8938_s28 = smov 104  }
  0x1e   :  { %v79_v11 = vrot.slane %v74_v8, 1  ;;  %v80_v12 = vrot.slane %v75_v9, 1  ;;  %v91_v13 = vrot.slane %v74_v8, %v7587_v10  ;;  %v7123_v35 = vld [vmem:[%s8974_s3 + $0x8] sm:$0xff]   ;;  %v7124_v36 = vld [vmem:[%s8974_s3] sm:$0xff]   ;;  %s8936_s29 = smov 40   ;;  %s8934_s30 = smov 8  }
  0x1f   :  { %6452 = vmatpush3.bf16.msra.mxu0 %v7123_v35  ;;  %s8932_s4 = smov 16   ;;  %s8986_s22 = smov 24  }
  0x20   :  { %v81_v14 = vsel %vm78_vm3, %v79_v11, %v80_v12  ;;  %6453 = vmatprep.subr.bf16.mxu0 %v7426_v0 }
  0x23   :  { %6454 = vmatpush3.bf16.msra.mxu0 %v7124_v36 }
  0x24   :  { %6459 = vmatprep.subr.bf16.mxu0 %v7426_v0 }
  0xd5   :  { %v139_v15 = vpop.f32.mrf.mxu0 }
  0xd6   :  { %v140_v16 = vadd.f32 %v139_v15, %v91_v13 }
  0xd7   :  { %v6449_v17 = vpop.f32.mrf.mxu0 }
  0xd8   :  { %v7591_v18 = vadd.f32 %v140_v16, %v81_v14 }
  0xd9   :  { %v142_v19 = vpop.f32.mrf.mxu0 }
  0xda   :  { %v143_v20 = vadd.f32 %v142_v19, %v91_v13  ;;  %v151_v21 = vsel %vm150_vm4, %v7591_v18, 0.0 }
  0xdb   :  { %v6450_v22 = vpop.f32.mrf.mxu0  ;;  %152 = vadd.xlane.f32.xlu0 %v151_v21 }
  0xdc   :  { %v7595_v23 = vadd.f32 %v143_v20, %v81_v14 }
  0xde   :  { %v154_v24 = vsel %vm150_vm4, %v7595_v23, 0.0 }
  0xdf   :  { %155 = vadd.xlane.f32.xlu0 %v154_v24 }
  0xf5   :  { %262 = vrot.lane.b32.xlu0 %v260_v39, %s8960_s0 }
 0x164   :  { %v153_v25 = vpop.xlane.xlu0 %152 }
 0x165   :  { %v158_v26 = vmul.f32 0.03125, %v153_v25 }
 0x167   :  { %v160_v27 = vsub.f32 %v7591_v18, %v158_v26 }
 0x168   :  { %v156_v28 = vpop.xlane.xlu0 %155 }
 0x169   :  { %v159_v29 = vmul.f32 0.03125, %v156_v28  ;;  %v162_v30 = vmul.f32 %v160_v27, %v160_v27  ;;  %v7664_v28 = vsub.s32 4, %v7578_v7 }
 0x16b   :  { %v161_v31 = vsub.f32 %v7595_v23, %v159_v29  ;;  %v164_v32 = vsel %vm150_vm4, %v162_v30, 0.0  ;;  %v270_v29 = vrot.slane %v7617_v38, %v7664_v28 }
 0x16c   :  { %165 = vadd.xlane.f32.xlu1 %v164_v32  ;;  %v263_v58 = vpop.permute.xlu0 %262 }
 0x16d   :  { %v163_v33 = vmul.f32 %v161_v31, %v161_v31 }
 0x16f   :  { %v167_v34 = vsel %vm150_vm4, %v163_v33, 0.0 }
 0x170   :  { %168 = vadd.xlane.f32.xlu1 %v167_v34 }
 0x1f5   :  { %v166_v40 = vpop.xlane.xlu1 %165 }
 0x1f6   :  { %v170_v41 = vmul.f32 0.03125, %v166_v40 }
 0x1f8   :  { %v172_v42 = vadd.f32 1e-05, %v170_v41 }
 0x1f9   :  { %v169_v43 = vpop.xlane.xlu1 %168 }
 0x1fa   :  { %7184 = vrsqrt.f32 %v172_v42  ;;  %v171_v44 = vmul.f32 0.03125, %v169_v43 }
 0x1fc   :  { %v173_v45 = vadd.f32 1e-05, %v171_v44 }
 0x1fe   :  { %7186 = vrsqrt.f32 %v173_v45 }
 0x207   :  { %v7185_v46 = vpop.eup %7184 }
 0x208   :  { %v176_v47 = vmul.f32 %v7185_v46, %v160_v27 }
 0x20a   :  { %v182_v52 = vmul.f32 %v181_v48, %v176_v47 }
 0x20b   :  { %v7187_v50 = vpop.eup %7186 }
 0x20c   :  { %v177_v51 = vmul.f32 %v7187_v50, %v161_v31  ;;  %v188_v55 = vadd.f32 %v187_v53, %v182_v52 }
 0x20e   :  { %v183_v54 = vmul.f32 %v181_v48, %v177_v51 }
 0x210   :  { %v189_v56 = vadd.f32 %v187_v53, %v183_v54 }
 0x212   :  { %v190_v57 = vpack.c.bf16 %v189_v56, %v188_v55 }
 0x214   :  { %6456 = vmatmul.mubr.msk.bf16.vlgmr.msra.gmra.mxu0 %vm150_vm4, %v190_v57 }
 0x215   :  { %6461 = vmatprep.mubr.msk.bf16.mxu0 %vm7427_vm1, %v7426_v0 }
 0x2d4   :  { %v244_v59 = vpop.f32.mrf.mxu0 }
 0x2d5   :  { %v265_v60 = vadd.f32 %v263_v58, %v244_v59  ;;  %v255_v9 = vadd.f32 %v254_v5, %v244_v59 }
 0x2d6   :  { %v6457_v61 = vpop.f32.mrf.mxu0 }
 0x2d7   :  { %v7632_v62 = vpack.c.bf16 %v265_v60, %v265_v60  ;;  %v7648_v13 = vpack.c.bf16 %v255_v9, %v255_v9 }
 0x2d8   :  { %v247_v63 = vpop.f32.mrf.mxu0 }
 0x2d9   :  { %v266_v1 = vadd.f32 %v263_v58, %v247_v63  ;;  %284 = vrot.lane.b32.xlu1 %v7632_v62, %s8958_s23  ;;  %v256_v14 = vadd.f32 %v254_v5, %v247_v63 }
 0x2da   :  { %v6458_v2 = vpop.f32.mrf.mxu0 }
 0x2db   :  { %v7636_v3 = vpack.c.bf16 %v266_v1, %v266_v1  ;;  %v7655_v15 = vpack.c.bf16 %v256_v14, %v256_v14 }
 0x2dd   :  { %334 = vrot.lane.b32.xlu1 %v7636_v3, %s8958_s23 }
 0x34b   :  { %v285_v6 = vpop.permute.xlu1 %284 }
 0x34c   :  { %v291_v8 = vsel %vm286_vm5, %v285_v6, 0 }
 0x34d   :  { %6460 = vmatpush3.bf16.xpose.msra.mxu0 %v291_v8 }
 0x34e   :  { %6471 = vmatprep.subr.bf16.mxu0 %v7426_v0 }
 0x34f   :  { %v335_v11 = vpop.permute.xlu1 %334 }
 0x350   :  { %v340_v12 = vsel %vm286_vm5, %v335_v11, 0 }
 0x351   :  { %6466 = vmatpush3.bf16.xpose.msra.mxu1 %v340_v12 }
 0x352   :  { %6477 = vmatprep.subr.bf16.mxu1 %v7426_v0 }
 0x354   :  { %6462 = vmatmul.mubr.msk.bf16.vlgmr.msra.gmra.mxu0 %vm286_vm5, %v7648_v13 }
 0x355   :  { %6473 = vmatprep.mubr.msk.bf16.mxu0 %vm7427_vm1, %v7426_v0 }
 0x358   :  { %6468 = vmatmul.mubr.msk.bf16.vlgmr.msra.gmra.mxu1 %vm286_vm5, %v7655_v15 }
 0x359   :  { %6479 = vmatprep.mubr.msk.bf16.mxu1 %vm7427_vm1, %v7426_v0 }
 0x414   :  { %v327_v16 = vpop.f32.mrf.mxu0 }
 0x415   :  { %v382_v17 = vsel %vm286_vm5, %v327_v16, -inf }
 0x416   :  { %383 = vmax.xlane.f32.xlu1 %v382_v17  ;;  %v6463_v19 = vpop.f32.mrf.mxu0 }
 0x418   :  { %v330_v20 = vpop.f32.mrf.mxu0  ;;  %v376_v21 = vpop.f32.mrf.mxu1 }
 0x419   :  { %v385_v22 = vsel %vm286_vm5, %v376_v21, -inf }
 0x41a   :  { %v6464_v24 = vpop.f32.mrf.mxu0  ;;  %386 = vmax.xlane.f32.xlu0 %v385_v22  ;;  %v6469_v25 = vpop.f32.mrf.mxu1 }
 0x41c   :  { %v379_v26 = vpop.f32.mrf.mxu1 }
 0x41e   :  { %v6470_v27 = vpop.f32.mrf.mxu1 }
 0x430   :  { %272 = vrot.lane.b32.xlu0 %v270_v29, %s8956_s1 }
 0x49f   :  { %v384_v36 = vpop.xlane.xlu1 %383 }
 0x4a0   :  { %v388_v39 = vsub.f32 %v327_v16, %v384_v36 }
 0x4a2   :  { %v390_v40 = vmul.f32 1.442695, %v388_v39 }
 0x4a3   :  { %v387_v30 = vpop.xlane.xlu0 %386 }
 0x4a4   :  { %v389_v41 = vsub.f32 %v376_v21, %v387_v30  ;;  %7188 = vpow2.f32 %v390_v40 }
 0x4a6   :  { %v392_v42 = vmul.f32 1.442695, %v389_v41 }
 0x4a7   :  { %v273_v31 = vpop.permute.xlu0 %272 }
 0x4a8   :  { %v275_v32 = vadd.f32 %v273_v31, %v244_v59  ;;  %v276_v33 = vadd.f32 %v273_v31, %v247_v63  ;;  %7190 = vpow2.f32 %v392_v42 }
 0x4aa   :  { %v7669_v34 = vpack.c.bf16 %v275_v32, %v275_v32  ;;  %v7671_v35 = vpack.c.bf16 %v276_v33, %v276_v33 }
 0x4ac   :  { %457 = vrot.lane.b32.xlu0 %v7671_v35, %s8956_s1  ;;  %407 = vrot.lane.b32.xlu1 %v7669_v34, %s8956_s1 }
 0x4b0   :  { %508 = vrot.lane.b32.xlu0 %v7632_v62, %s8954_s5 }
 0x4b1   :  { %v7189_v43 = vpop.eup %7188 }
 0x4b2   :  { %v394_v44 = vsel %vm286_vm5, %v7189_v43, 0.0 }
 0x4b4   :  { %506 = vrot.lane.b32.xlu0 %v7648_v13, %s8952_s24 }
 0x4b5   :  { %v7191_v45 = vpop.eup %7190 }
 0x4b6   :  { %v397_v46 = vsel %vm286_vm5, %v7191_v45, 0.0 }
 0x4d0   :  { %395 = vadd.xlane.f32.xlu1 %v394_v44 }
 0x4d4   :  { %398 = vadd.xlane.f32.xlu1 %v397_v46 }
 0x4e5   :  { %559 = vrot.lane.b32.xlu1 %v7636_v3, %s8954_s5 }
 0x4e9   :  { %557 = vrot.lane.b32.xlu1 %v7655_v15, %s8952_s24 }
 0x51e   :  { %v458_v47 = vpop.permute.xlu0 %457  ;;  %v408_v48 = vpop.permute.xlu1 %407 }
 0x51f   :  { %v463_v50 = vsel %vm412_vm6, %v458_v47, 0  ;;  %v414_v51 = vsel %vm412_vm6, %v408_v48, 0 }
 0x520   :  { %6472 = vmatpush3.bf16.msra.mxu0 %v414_v51  ;;  %6478 = vmatpush3.bf16.msra.mxu1 %v463_v50 }
 0x521   :  { %6483 = vmatprep.subr.bf16.mxu0 %v7426_v0  ;;  %6489 = vmatprep.subr.bf16.mxu1 %v7426_v0 }
 0x522   :  { %v509_v56 = vpop.permute.xlu0 %508 }
 0x523   :  { %v514_v59 = vsel %vm286_vm5, %v509_v56, 0 }
 0x526   :  { %v507_v2 = vpop.permute.xlu0 %506 }
 0x559   :  { %v396_v52 = vpop.xlane.xlu1 %395 }
 0x55a   :  { %7192 = vrcp.f32 %v396_v52 }
 0x55d   :  { %v399_v53 = vpop.xlane.xlu1 %398 }
 0x55e   :  { %7194 = vrcp.f32 %v399_v53 }
 0x561   :  { %v560_v61 = vpop.permute.xlu1 %559 }
 0x562   :  { %v565_v1 = vsel %vm286_vm5, %v560_v61, 0 }
 0x565   :  { %v558_v5 = vpop.permute.xlu1 %557 }
 0x567   :  { %v7193_v54 = vpop.eup %7192 }
 0x568   :  { %v402_v55 = vmul.f32 %v7193_v54, %v7189_v43 }
 0x56a   :  { %v404_v57 = vpack.c.bf16 %v402_v55, %v402_v55 }
 0x56b   :  { %v7195_v58 = vpop.eup %7194 }
 0x56c   :  { %6474 = vmatmul.mubr.msk.bf16.vlgmr.msra.gmra.mxu0 %vm286_vm5, %v404_v57  ;;  %v403_v60 = vmul.f32 %v7195_v58, %v7191_v45 }
 0x56d   :  { %6484 = vmatpush3.bf16.xpose.msra.mxu0 %v514_v59  ;;  %6485 = vmatprep.mubr.msk.bf16.mxu0 %vm7427_vm1, %v7426_v0 }
 0x56e   :  { %v405_v63 = vpack.c.bf16 %v403_v60, %v403_v60  ;;  %6495 = vmatprep.subr.bf16.mxu0 %v7426_v0 }
 0x570   :  { %6480 = vmatmul.mubr.msk.bf16.vlgmr.msra.gmra.mxu1 %vm286_vm5, %v405_v63 }
 0x571   :  { %6490 = vmatpush3.bf16.xpose.msra.mxu1 %v565_v1  ;;  %6491 = vmatprep.mubr.msk.bf16.mxu1 %vm7427_vm1, %v7426_v0 }
 0x572   :  { %6501 = vmatprep.subr.bf16.mxu1 %v7426_v0 }
 0x574   :  { %6486 = vmatmul.mubr.msk.bf16.vlgmr.msra.gmra.mxu0 %vm286_vm5, %v507_v2 }
 0x575   :  { %6497 = vmatprep.mubr.msk.bf16.mxu0 %vm7427_vm1, %v7426_v0 }
 0x578   :  { %6492 = vmatmul.mubr.msk.bf16.vlgmr.msra.gmra.mxu1 %vm286_vm5, %v558_v5 }
 0x579   :  { %6503 = vmatprep.mubr.msk.bf16.mxu1 %vm7427_vm1, %v7426_v0 }
 0x62c   :  { %v7707_v6 = vpop.f32.mrf.mxu0 }
 0x62e   :  { %v6475_v8 = vpop.f32.mrf.mxu0 }
 0x630   :  { %v453_v9 = vpop.f32.mrf.mxu0  ;;  %v7709_v11 = vpop.f32.mrf.mxu1 }
 0x632   :  { %v6476_v12 = vpop.f32.mrf.mxu0  ;;  %v6481_v14 = vpop.f32.mrf.mxu1 }
 0x634   :  { %v502_v16 = vpop.f32.mrf.mxu1  ;;  %v550_v17 = vpop.f32.mrf.mxu0 }
 0x635   :  { %v607_v19 = vsel %vm286_vm5, %v550_v17, -inf }
 0x636   :  { %608 = vmax.xlane.f32.xlu0 %v607_v19  ;;  %v6482_v20 = vpop.f32.mrf.mxu1  ;;  %v6487_v21 = vpop.f32.mrf.mxu0 }
 0x638   :  { %v553_v22 = vpop.f32.mrf.mxu0  ;;  %v601_v24 = vpop.f32.mrf.mxu1 }
 0x639   :  { %v610_v25 = vsel %vm286_vm5, %v601_v24, -inf }
 0x63a   :  { %v6488_v26 = vpop.f32.mrf.mxu0  ;;  %611 = vmax.xlane.f32.xlu1 %v610_v25  ;;  %v6493_v27 = vpop.f32.mrf.mxu1 }
 0x63c   :  { %v604_v29 = vpop.f32.mrf.mxu1 }
 0x63e   :  { %v6494_v30 = vpop.f32.mrf.mxu1 }
 0x64b   :  { %679 = vrot.lane.b32.xlu1 %v7671_v35, %s8950_s6 }
 0x64f   :  { %729 = vrot.lane.b32.xlu1 %v7632_v62, %s8948_s25 }
 0x653   :  { %779 = vrot.lane.b32.xlu1 %v7636_v3, %s8948_s25  ;;  %s8984_s25 = smov 8  }
 0x657   :  { %777 = vrot.lane.b32.xlu1 %v7655_v15, %s8946_s26 }
 0x6bf   :  { %v609_v31 = vpop.xlane.xlu0 %608 }
 0x6c0   :  { %v613_v32 = vsub.f32 %v550_v17, %v609_v31 }
 0x6c2   :  { %v615_v33 = vmul.f32 1.442695, %v613_v32 }
 0x6c3   :  { %v612_v36 = vpop.xlane.xlu1 %611 }
 0x6c4   :  { %7196 = vpow2.f32 %v615_v33  ;;  %v614_v39 = vsub.f32 %v601_v24, %v612_v36 }
 0x6c6   :  { %v617_v40 = vmul.f32 1.442695, %v614_v39 }
 0x6c7   :  { %v680_v41 = vpop.permute.xlu1 %679 }
 0x6c8   :  { %7198 = vpow2.f32 %v617_v40  ;;  %v685_v42 = vsel %vm412_vm6, %v680_v41, 0 }
 0x6c9   :  { %6502 = vmatpush3.bf16.msra.mxu1 %v685_v42 }
 0x6ca   :  { %6513 = vmatprep.subr.bf16.mxu1 %v7426_v0 }
 0x6cb   :  { %v730_v53 = vpop.permute.xlu1 %729 }
 0x6cc   :  { %v735_v57 = vsel %vm286_vm5, %v730_v53, 0 }
 0x6cf   :  { %v780_v59 = vpop.permute.xlu1 %779 }
 0x6d0   :  { %v785_v61 = vsel %vm286_vm5, %v780_v59, 0 }
 0x6d1   :  { %v7197_v43 = vpop.eup %7196 }
 0x6d2   :  { %v619_v44 = vsel %vm286_vm5, %v7197_v43, 0.0 }
 0x6d3   :  { %620 = vadd.xlane.f32.xlu0 %v619_v44  ;;  %v778_v1 = vpop.permute.xlu1 %777 }
 0x6d5   :  { %v7199_v45 = vpop.eup %7198 }
 0x6d6   :  { %v622_v46 = vsel %vm286_vm5, %v7199_v45, 0.0 }
 0x6d7   :  { %623 = vadd.xlane.f32.xlu0 %v622_v46 }
 0x6ed   :  { %631 = vrot.lane.b32.xlu0 %v7669_v34, %s8950_s6  ;;  %s8979_s6 = smov 112  }
 0x6f1   :  { %727 = vrot.lane.b32.xlu0 %v7648_v13, %s8946_s26  ;;  %s8978_s26 = smov 80  }
 0x75c   :  { %v621_v47 = vpop.xlane.xlu0 %620 }
 0x75d   :  { %7200 = vrcp.f32 %v621_v47 }
 0x760   :  { %v624_v48 = vpop.xlane.xlu0 %623 }
 0x761   :  { %7202 = vrcp.f32 %v624_v48 }
 0x764   :  { %v632_v50 = vpop.permute.xlu0 %631 }
 0x765   :  { %v637_v51 = vsel %vm412_vm6, %v632_v50, 0 }
 0x766   :  { %6496 = vmatpush3.bf16.msra.mxu0 %v637_v51 }
 0x767   :  { %6507 = vmatprep.subr.bf16.mxu0 %v7426_v0 }
 0x768   :  { %v728_v63 = vpop.permute.xlu0 %727 }
 0x76a   :  { %v7201_v52 = vpop.eup %7200 }
 0x76b   :  { %v627_v54 = vmul.f32 %v7201_v52, %v7197_v43 }
 0x76d   :  { %v629_v55 = vpack.c.bf16 %v627_v54, %v627_v54 }
 0x76e   :  { %v7203_v56 = vpop.eup %7202 }
 0x76f   :  { %6498 = vmatmul.mubr.msk.bf16.vlgmr.msra.gmra.mxu0 %vm286_vm5, %v629_v55  ;;  %v628_v58 = vmul.f32 %v7203_v56, %v7199_v45 }
 0x770   :  { %6508 = vmatpush3.bf16.xpose.msra.mxu0 %v735_v57  ;;  %6509 = vmatprep.mubr.msk.bf16.mxu0 %vm7427_vm1, %v7426_v0 }
 0x771   :  { %v630_v60 = vpack.c.bf16 %v628_v58, %v628_v58  ;;  %6519 = vmatprep.subr.bf16.mxu0 %v7426_v0 }
 0x773   :  { %6504 = vmatmul.mubr.msk.bf16.vlgmr.msra.gmra.mxu1 %vm286_vm5, %v630_v60 }
 0x774   :  { %6514 = vmatpush3.bf16.xpose.msra.mxu1 %v785_v61  ;;  %6515 = vmatprep.mubr.msk.bf16.mxu1 %vm7427_vm1, %v7426_v0 }
 0x775   :  { %6525 = vmatprep.subr.bf16.mxu1 %v7426_v0 }
 0x777   :  { %6510 = vmatmul.mubr.msk.bf16.vlgmr.msra.gmra.mxu0 %vm286_vm5, %v728_v63 }
 0x778   :  { %6521 = vmatprep.mubr.msk.bf16.mxu0 %vm7427_vm1, %v7426_v0 }
 0x77b   :  { %6516 = vmatmul.mubr.msk.bf16.vlgmr.msra.gmra.mxu1 %vm286_vm5, %v778_v1 }
 0x77c   :  { %6527 = vmatprep.mubr.msk.bf16.mxu1 %vm7427_vm1, %v7426_v0 }
 0x82f   :  { %v7747_v2 = vpop.f32.mrf.mxu0 }
 0x831   :  { %v6499_v5 = vpop.f32.mrf.mxu0 }
 0x833   :  { %v676_v8 = vpop.f32.mrf.mxu0  ;;  %v7749_v9 = vpop.f32.mrf.mxu1 }
 0x834   :  { %v7062_v12 = vpack.i.bf16 %v7749_v9, %v7747_v2 }
 0x835   :  { %v6500_v14 = vpop.f32.mrf.mxu0  ;;  %v6505_v16 = vpop.f32.mrf.mxu1 }
 0x837   :  { %v724_v17 = vpop.f32.mrf.mxu1  ;;  %v771_v19 = vpop.f32.mrf.mxu0 }
 0x838   :  { %v827_v20 = vsel %vm286_vm5, %v771_v19, -inf }
 0x839   :  { %828 = vmax.xlane.f32.xlu0 %v827_v20  ;;  %v6506_v21 = vpop.f32.mrf.mxu1  ;;  %v6511_v22 = vpop.f32.mrf.mxu0 }
 0x83b   :  { %v774_v24 = vpop.f32.mrf.mxu0  ;;  %v821_v25 = vpop.f32.mrf.mxu1 }
 0x83c   :  { %v830_v26 = vsel %vm286_vm5, %v821_v25, -inf }
 0x83d   :  { %v6512_v27 = vpop.f32.mrf.mxu0  ;;  %831 = vmax.xlane.f32.xlu1 %v830_v26  ;;  %v6517_v29 = vpop.f32.mrf.mxu1 }
 0x83f   :  { %v824_v30 = vpop.f32.mrf.mxu1 }
 0x841   :  { %v6518_v31 = vpop.f32.mrf.mxu1 }
 0x84e   :  { %899 = vrot.lane.b32.xlu1 %v7671_v35, %s8942_s2 }
 0x852   :  { %949 = vrot.lane.b32.xlu1 %v7632_v62, %s8940_s27 }
 0x856   :  { %999 = vrot.lane.b32.xlu1 %v7636_v3, %s8940_s27  ;;  %s8981_s27 = smov 72  }
 0x85a   :  { %997 = vrot.lane.b32.xlu1 %v7655_v15, %s8938_s28 }
 0x8c2   :  { %v829_v32 = vpop.xlane.xlu0 %828 }
 0x8c3   :  { %v833_v33 = vsub.f32 %v771_v19, %v829_v32 }
 0x8c5   :  { %v835_v36 = vmul.f32 1.442695, %v833_v33 }
 0x8c6   :  { %v832_v39 = vpop.xlane.xlu1 %831 }
 0x8c7   :  { %7204 = vpow2.f32 %v835_v36  ;;  %v834_v40 = vsub.f32 %v821_v25, %v832_v39 }
 0x8c9   :  { %v837_v41 = vmul.f32 1.442695, %v834_v40 }
 0x8ca   :  { %v900_v42 = vpop.permute.xlu1 %899 }
 0x8cb   :  { %7206 = vpow2.f32 %v837_v41  ;;  %v905_v43 = vsel %vm412_vm6, %v900_v42, 0 }
 0x8cc   :  { %6526 = vmatpush3.bf16.msra.mxu1 %v905_v43 }
 0x8cd   :  { %6537 = vmatprep.subr.bf16.mxu1 %v7426_v0 }
 0x8ce   :  { %v950_v51 = vpop.permute.xlu1 %949 }
 0x8cf   :  { %v955_v55 = vsel %vm286_vm5, %v950_v51, 0 }
 0x8d2   :  { %v1000_v56 = vpop.permute.xlu1 %999 }
 0x8d3   :  { %v1005_v58 = vsel %vm286_vm5, %v1000_v56, 0 }
 0x8d4   :  { %v7205_v62 = vpop.eup %7204 }
 0x8d5   :  { %v839_v3 = vsel %vm286_vm5, %v7205_v62, 0.0 }
 0x8d6   :  { %840 = vadd.xlane.f32.xlu0 %v839_v3  ;;  %v998_v60 = vpop.permute.xlu1 %997 }
 0x8d8   :  { %v7207_v44 = vpop.eup %7206 }
 0x8d9   :  { %v842_v15 = vsel %vm286_vm5, %v7207_v44, 0.0 }
 0x8da   :  { %843 = vadd.xlane.f32.xlu0 %v842_v15 }
 0x8f0   :  { %851 = vrot.lane.b32.xlu0 %v7669_v34, %s8942_s2  ;;  %s8944_s2 = smov 24  }
 0x8f4   :  { %947 = vrot.lane.b32.xlu0 %v7648_v13, %s8938_s28  ;;  %s8982_s28 = smov 104  }
 0x95f   :  { %v841_v45 = vpop.xlane.xlu0 %840 }
 0x960   :  { %7208 = vrcp.f32 %v841_v45 }
 0x963   :  { %v844_v46 = vpop.xlane.xlu0 %843 }
 0x964   :  { %7210 = vrcp.f32 %v844_v46 }
 0x967   :  { %v852_v47 = vpop.permute.xlu0 %851 }
 0x968   :  { %v857_v48 = vsel %vm412_vm6, %v852_v47, 0 }
 0x969   :  { %6520 = vmatpush3.bf16.msra.mxu0 %v857_v48 }
 0x96a   :  { %6531 = vmatprep.subr.bf16.mxu0 %v7426_v0 }
 0x96b   :  { %v948_v59 = vpop.permute.xlu0 %947 }
 0x96d   :  { %v7209_v50 = vpop.eup %7208 }
 0x96e   :  { %v847_v52 = vmul.f32 %v7209_v50, %v7205_v62 }
 0x970   :  { %v849_v53 = vpack.c.bf16 %v847_v52, %v847_v52 }
 0x971   :  { %v7211_v54 = vpop.eup %7210 }
 0x972   :  { %6522 = vmatmul.mubr.msk.bf16.vlgmr.msra.gmra.mxu0 %vm286_vm5, %v849_v53  ;;  %v848_v13 = vmul.f32 %v7211_v54, %v7207_v44 }
 0x973   :  { %6532 = vmatpush3.bf16.xpose.msra.mxu0 %v955_v55  ;;  %6533 = vmatprep.mubr.msk.bf16.mxu0 %vm7427_vm1, %v7426_v0 }
 0x974   :  { %v850_v57 = vpack.c.bf16 %v848_v13, %v848_v13  ;;  %6543 = vmatprep.subr.bf16.mxu0 %v7426_v0 }
 0x976   :  { %6528 = vmatmul.mubr.msk.bf16.vlgmr.msra.gmra.mxu1 %vm286_vm5, %v850_v57 }
 0x977   :  { %6538 = vmatpush3.bf16.xpose.msra.mxu1 %v1005_v58  ;;  %6539 = vmatprep.mubr.msk.bf16.mxu1 %vm7427_vm1, %v7426_v0 }
 0x978   :  { %6549 = vmatprep.subr.bf16.mxu1 %v7426_v0 }
 0x97a   :  { %6534 = vmatmul.mubr.msk.bf16.vlgmr.msra.gmra.mxu0 %vm286_vm5, %v948_v59 }
 0x97b   :  { %6545 = vmatprep.mubr.msk.bf16.mxu0 %vm7427_vm1, %v7426_v0 }
 0x97e   :  { %6540 = vmatmul.mubr.msk.bf16.vlgmr.msra.gmra.mxu1 %vm286_vm5, %v998_v60 }
 0x97f   :  { %6551 = vmatprep.mubr.msk.bf16.mxu1 %vm7427_vm1, %v7426_v0 }
 0xa32   :  { %v893_v61 = vpop.f32.mrf.mxu0 }
 0xa34   :  { %v6523_v63 = vpop.f32.mrf.mxu0 }
 0xa36   :  { %v896_v1 = vpop.f32.mrf.mxu0  ;;  %v941_v5 = vpop.f32.mrf.mxu1 }
 0xa37   :  { %v7067_v31 = vpack.i.bf16 %v941_v5, %v893_v61 }
 0xa38   :  { %v6524_v8 = vpop.f32.mrf.mxu0  ;;  %v6529_v14 = vpop.f32.mrf.mxu1 }
 0xa3a   :  { %v944_v16 = vpop.f32.mrf.mxu1  ;;  %v991_v17 = vpop.f32.mrf.mxu0 }
 0xa3b   :  { %v1047_v19 = vsel %vm286_vm5, %v991_v17, -inf }
 0xa3c   :  { %1048 = vmax.xlane.f32.xlu0 %v1047_v19  ;;  %v6530_v20 = vpop.f32.mrf.mxu1  ;;  %v6535_v21 = vpop.f32.mrf.mxu0 }
 0xa3e   :  { %v994_v22 = vpop.f32.mrf.mxu0  ;;  %v1041_v24 = vpop.f32.mrf.mxu1 }
 0xa3f   :  { %v1050_v25 = vsel %vm286_vm5, %v1041_v24, -inf }
 0xa40   :  { %v6536_v26 = vpop.f32.mrf.mxu0  ;;  %1051 = vmax.xlane.f32.xlu1 %v1050_v25  ;;  %v6541_v27 = vpop.f32.mrf.mxu1 }
 0xa42   :  { %v1044_v29 = vpop.f32.mrf.mxu1 }
 0xa44   :  { %v6542_v30 = vpop.f32.mrf.mxu1 }
 0xa51   :  { %1119 = vrot.lane.b32.xlu1 %v7671_v35, %s8936_s29 }
 0xa55   :  { %7063 = vrot.lane.b32.xlu1 %v7062_v12, %s8934_s30  ;;  %s8976_s30 = sld [smem:[#allocation15_spill]] }
 0xa59   :  { %7068 = vrot.lane.b32.xlu1 %v7067_v31, %s8932_s4  ;;  %s8983_s4 = smov 40  }
 0xac5   :  { %v1049_v32 = vpop.xlane.xlu0 %1048 }
 0xac6   :  { %v1053_v33 = vsub.f32 %v991_v17, %v1049_v32 }
 0xac8   :  { %v1055_v36 = vmul.f32 1.442695, %v1053_v33 }
 0xac9   :  { %v1052_v39 = vpop.xlane.xlu1 %1051 }
 0xaca   :  { %7212 = vpow2.f32 %v1055_v36  ;;  %v1054_v40 = vsub.f32 %v1041_v24, %v1052_v39 }
 0xacc   :  { %v1057_v41 = vmul.f32 1.442695, %v1054_v40 }
 0xacd   :  { %v1120_v42 = vpop.permute.xlu1 %1119 }
 0xace   :  { %7214 = vpow2.f32 %v1057_v41  ;;  %v1125_v35 = vsel %vm412_vm6, %v1120_v42, 0 }
 0xacf   :  { %6550 = vmatpush3.bf16.msra.mxu1 %v1125_v35 }
 0xad0   :  { %6563 = vmatprep.subr.bf16.mxu1 %v7426_v0 }
 0xad1   :  { %v7064_v61 = vpop.permute.xlu1 %7063 }
 0xad2   :  { %v7066_v1 = vunpack.i.h.bf16 %v7064_v61  ;;  %v7065_v5 = vunpack.i.l.bf16 %v7064_v61 }
 0xad4   :  { %v1192_v17 = vsel %vm286_vm5, %v7709_v11, %v7066_v1  ;;  %v1191_v19 = vsel %vm286_vm5, %v7707_v6, %v7065_v5  ;;  %v7833_v11 = vsub.s32 5, %v7578_v7  ;;  %v7131_v5 = vld [vmem:[%s8911_s7 + $0x28] sm:$0xff]  }
 0xad5   :  { %v7069_v63 = vpop.permute.xlu1 %7068 }
 0xad6   :  { %v7071_v8 = vunpack.i.h.bf16 %v7069_v63  ;;  %v7070_v14 = vunpack.i.l.bf16 %v7069_v63  ;;  %v1265_v6 = vrot.slane %v7617_v38, %v7833_v11 }
 0xad7   :  { %v7213_v2 = vpop.eup %7212 }
 0xad8   :  { %v1059_v9 = vsel %vm286_vm5, %v7213_v2, 0.0  ;;  %v1194_v22 = vsel %vm1193_vm7, %v1191_v19, %v7070_v14  ;;  %v1195_v24 = vsel %vm1193_vm7, %v1192_v17, %v7071_v8  ;;  %v7132_v8 = vld [vmem:[%s8911_s7 + $0x20] sm:$0xff]   ;;  %v7133_v14 = vld [vmem:[%s8911_s7 + $0x18] sm:$0xff]   ;;  %v7135_v17 = vld [vmem:[%s8911_s7 + $0x8] sm:$0xff]  }
 0xad9   :  { %1060 = vadd.xlane.f32.xlu0 %v1059_v9  ;;  %v7136_v19 = vld [vmem:[%s8911_s7] sm:$0xff]  }
 0xadb   :  { %v7215_v12 = vpop.eup %7214 }
 0xadc   :  { %v1062_v43 = vsel %vm286_vm5, %v7215_v12, 0.0 }
 0xadd   :  { %1063 = vadd.xlane.f32.xlu0 %v1062_v43 }
 0xaf3   :  { %1071 = vrot.lane.b32.xlu0 %v7669_v34, %s8936_s29  ;;  %s8975_s29 = sld [smem:[#allocation14_spill]] }
 0xaf9   :  { %v7125_v51 = vld [vmem:[%s8975_s29 + $0x8] sm:$0xff]   ;;  %v7126_v52 = vld [vmem:[%s8975_s29] sm:$0xff]  }
 0xb62   :  { %v1061_v62 = vpop.xlane.xlu0 %1060 }
 0xb63   :  { %7216 = vrcp.f32 %v1061_v62 }
 0xb66   :  { %v1064_v3 = vpop.xlane.xlu0 %1063 }
 0xb67   :  { %7218 = vrcp.f32 %v1064_v3 }
 0xb6a   :  { %v1072_v44 = vpop.permute.xlu0 %1071 }
 0xb6b   :  { %v1077_v15 = vsel %vm412_vm6, %v1072_v44, 0 }
 0xb6c   :  { %6544 = vmatpush3.bf16.msra.mxu0 %v1077_v15  ;;  %v7127_v15 = vld [vmem:[%s8976_s30 + $0x8] sm:$0xff]  }
 0xb6d   :  { %6555 = vmatprep.subr.bf16.mxu0 %v7426_v0 }
 0xb70   :  { %v7217_v45 = vpop.eup %7216 }
 0xb71   :  { %v1067_v46 = vmul.f32 %v7217_v45, %v7213_v2  ;;  %v7128_v45 = vld [vmem:[%s8976_s30] sm:$0xff]  }
 0xb73   :  { %v1069_v47 = vpack.c.bf16 %v1067_v46, %v1067_v46 }
 0xb74   :  { %v7219_v48 = vpop.eup %7218 }
 0xb75   :  { %6546 = vmatmul.mubr.msk.bf16.vlgmr.msra.gmra.mxu0 %vm286_vm5, %v1069_v47  ;;  %v1068_v50 = vmul.f32 %v7219_v48, %v7215_v12 }
 0xb76   :  { %6559 = vmatprep.mubr.msk.bf16.mxu0 %vm7427_vm1, %v7426_v0  ;;  %6556 = vmatpush3.bf16.msra.mxu0 %v7125_v51 }
 0xb77   :  { %v1070_v34 = vpack.c.bf16 %v1068_v50, %v1068_v50  ;;  %6557 = vmatprep.subr.bf16.mxu0 %v7426_v0 }
 0xb79   :  { %6552 = vmatmul.mubr.msk.bf16.vlgmr.msra.gmra.mxu1 %vm286_vm5, %v1070_v34 }
 0xb7a   :  { %6567 = vmatprep.mubr.msk.bf16.mxu1 %vm7427_vm1, %v7426_v0  ;;  %6558 = vmatpush3.bf16.msra.mxu0 %v7126_v52  ;;  %v7860_v52 = vsub.s32 6, %v7578_v7 }
 0xb7b   :  { %6571 = vmatprep.subr.bf16.mxu0 %v7426_v0  ;;  %6564 = vmatpush3.bf16.msra.mxu1 %v7127_v15 }
 0xb7c   :  { %6565 = vmatprep.subr.bf16.mxu1 %v7426_v0 }
 0xb7f   :  { %6566 = vmatpush3.bf16.msra.mxu1 %v7128_v45 }
 0xb80   :  { %6591 = vmatprep.subr.bf16.mxu1 %v7426_v0 }
 0xc35   :  { %v1113_v53 = vpop.f32.mrf.mxu0 }
 0xc37   :  { %v6547_v54 = vpop.f32.mrf.mxu0 }
 0xc39   :  { %v1116_v55 = vpop.f32.mrf.mxu0  ;;  %v1161_v13 = vpop.f32.mrf.mxu1 }
 0xc3a   :  { %v7072_v56 = vpack.i.bf16 %v1161_v13, %v1113_v53  ;;  %v1297_v55 = vrot.slane %v7617_v38, %v7860_v52  ;;  %v7865_v13 = vsub.s32 7, %v7578_v7  ;;  %v7129_v7 = vld [vmem:[%s8911_s7 + $0x38] sm:$0xff]  }
 0xc3b   :  { %v6548_v57 = vpop.f32.mrf.mxu0  ;;  %v6553_v58 = vpop.f32.mrf.mxu1 }
 0xc3c   :  { %7073 = vrot.lane.b32.xlu0 %v7072_v56, %s8944_s2  ;;  %s8980_s2 = smov 48  }
 0xc3d   :  { %v1164_v59 = vpop.f32.mrf.mxu1 }
 0xc3e   :  { %v1303_v59 = vrot.slane %v7617_v38, %v7865_v13  ;;  %v7130_v38 = vld [vmem:[%s8911_s7 + $0x30] sm:$0xff]  }
 0xc3f   :  { %v6554_v60 = vpop.f32.mrf.mxu1 }
 0xcae   :  { %v7074_v16 = vpop.permute.xlu0 %7073 }
 0xcaf   :  { %v7076_v20 = vunpack.i.h.bf16 %v7074_v16  ;;  %v7075_v21 = vunpack.i.l.bf16 %v7074_v16  ;;  %v7134_v16 = vld [vmem:[%s8911_s7 + $0x10] sm:$0xff]  }
 0xcb1   :  { %v1198_v25 = vsel %vm1196_vm8, %v1195_v24, %v7076_v20  ;;  %v1197_v26 = vsel %vm1196_vm8, %v1194_v22, %v7075_v21  ;;  %v6031_v20 = vld [vmem:[%s8913_s9] ss:$0 sm:$0xff] }
 0xcb2   :  { %v1199_v27 = vpack.c.bf16 %v1198_v25, %v1197_v26 }
 0xcb4   :  { %6560 = vmatmul.mubr.msk.bf16.vlgmr.msra.gmra.mxu0 %vm150_vm4, %v1199_v27 }
 0xcb5   :  { %6587 = vmatprep.mubr.msk.bf16.mxu0 %vm7427_vm1, %v7426_v0  ;;  %6572 = vmatpush3.bf16.msra.mxu0 %v7129_v7 }
 0xcb6   :  { %6573 = vmatprep.subr.bf16.mxu0 %v7426_v0 }
 0xcb9   :  { %6574 = vmatpush3.bf16.msra.mxu0 %v7130_v38 }
 0xcba   :  { %6575 = vmatprep.subr.bf16.mxu0 %v7426_v0 }
 0xcbd   :  { %6576 = vmatpush3.bf16.msra.mxu0 %v7131_v5 }
 0xcbe   :  { %6577 = vmatprep.subr.bf16.mxu0 %v7426_v0 }
 0xcc1   :  { %6578 = vmatpush3.bf16.msra.mxu0 %v7132_v8 }
 0xcc2   :  { %6579 = vmatprep.subr.bf16.mxu0 %v7426_v0 }
 0xcc5   :  { %6580 = vmatpush3.bf16.msra.mxu0 %v7133_v14 }
 0xcc6   :  { %6581 = vmatprep.subr.bf16.mxu0 %v7426_v0 }
 0xcc9   :  { %6582 = vmatpush3.bf16.msra.mxu0 %v7134_v16 }
 0xcca   :  { %6583 = vmatprep.subr.bf16.mxu0 %v7426_v0 }
 0xccd   :  { %6584 = vmatpush3.bf16.msra.mxu0 %v7135_v17 }
 0xcce   :  { %6585 = vmatprep.subr.bf16.mxu0 %v7426_v0 }
 0xcd1   :  { %6586 = vmatpush3.bf16.msra.mxu0 %v7136_v19 }
 0xcd2   :  { %6617 = vmatprep.subr.bf16.mxu0 %v7426_v0 }
 0xd74   :  { %v1253_v29 = vpop.f32.mrf.mxu0 }
 0xd75   :  { %v1260_v30 = vadd.f32 %v1253_v29, %v7591_v18 }
 0xd76   :  { %v6561_v31 = vpop.f32.mrf.mxu0 }
 0xd77   :  { %v7838_v32 = vadd.f32 %v1265_v6, %v1260_v30 }
 0xd78   :  { %v1256_v33 = vpop.f32.mrf.mxu0 }
 0xd79   :  { %v1261_v36 = vadd.f32 %v1256_v33, %v7595_v23  ;;  %v1268_v39 = vsel %vm150_vm4, %v7838_v32, 0.0 }
 0xd7a   :  { %1269 = vadd.xlane.f32.xlu1 %v1268_v39  ;;  %v6562_v40 = vpop.f32.mrf.mxu0 }
 0xd7b   :  { %v7843_v41 = vadd.f32 %v1265_v6, %v1261_v36 }
 0xd7d   :  { %v1271_v42 = vsel %vm150_vm4, %v7843_v41, 0.0 }
 0xd7e   :  { %1272 = vadd.xlane.f32.xlu0 %v1271_v42 }
 0xe03   :  { %v1270_v35 = vpop.xlane.xlu1 %1269 }
 0xe04   :  { %v1274_v2 = vmul.f32 0.03125, %v1270_v35 }
 0xe06   :  { %v1276_v18 = vsub.f32 %v7838_v32, %v1274_v2 }
 0xe07   :  { %v1273_v9 = vpop.xlane.xlu0 %1272 }
 0xe08   :  { %v1275_v12 = vmul.f32 0.03125, %v1273_v9  ;;  %v1278_v43 = vmul.f32 %v1276_v18, %v1276_v18 }
 0xe0a   :  { %v1277_v23 = vsub.f32 %v7843_v41, %v1275_v12  ;;  %v1280_v62 = vsel %vm150_vm4, %v1278_v43, 0.0  ;;  %v6037_v12 = vld [vmem:[%s8912_s8 + $0x8] ss:$0 sm:$0xff] }
 0xe0b   :  { %1281 = vadd.xlane.f32.xlu0 %v1280_v62 }
 0xe0c   :  { %v1279_v3 = vmul.f32 %v1277_v23, %v1277_v23 }
 0xe0e   :  { %v1283_v44 = vsel %vm150_vm4, %v1279_v3, 0.0 }
 0xe0f   :  { %1284 = vadd.xlane.f32.xlu0 %v1283_v44 }
 0xe94   :  { %v1282_v46 = vpop.xlane.xlu0 %1281 }
 0xe95   :  { %v1286_v47 = vmul.f32 0.03125, %v1282_v46 }
 0xe97   :  { %v1288_v48 = vadd.f32 1e-05, %v1286_v47 }
 0xe98   :  { %v1285_v50 = vpop.xlane.xlu0 %1284 }
 0xe99   :  { %7220 = vrsqrt.f32 %v1288_v48  ;;  %v1287_v34 = vmul.f32 0.03125, %v1285_v50 }
 0xe9b   :  { %v1289_v51 = vadd.f32 1e-05, %v1287_v34 }
 0xe9d   :  { %7222 = vrsqrt.f32 %v1289_v51 }
 0xea6   :  { %v7221_v53 = vpop.eup %7220 }
 0xea7   :  { %v1292_v54 = vmul.f32 %v7221_v53, %v1276_v18 }
 0xea9   :  { %v1298_v58 = vmul.f32 %v1297_v55, %v1292_v54 }
 0xeaa   :  { %v7223_v56 = vpop.eup %7222 }
 0xeab   :  { %v1293_v57 = vmul.f32 %v7223_v56, %v1277_v23  ;;  %v1304_v61 = vadd.f32 %v1303_v59, %v1298_v58  ;;  %v7137_v58 = vld [vmem:[%s8974_s3 + $0x18] sm:$0xff]  }
 0xead   :  { %v1299_v60 = vmul.f32 %v1297_v55, %v1293_v57 }
 0xeaf   :  { %v1305_v63 = vadd.f32 %v1303_v59, %v1299_v60  ;;  %v7138_v59 = vld [vmem:[%s8974_s3 + $0x10] sm:$0xff]   ;;  %s8977_s3 = smov 56  }
 0xeb0   :  { %v7936_v60 = vld [vmem:[%s8912_s8 + $0x10] sm:$0xff] }
 0xeb1   :  { %v1306_v1 = vpack.c.bf16 %v1305_v63, %v1304_v61  ;;  %v1614_v61 = vrot.slane %v7936_v60, %v7612_v37  ;;  %v1534_v17 = vrot.slane %v7936_v60, %v7587_v10 }
 0xeb3   :  { %6568 = vmatmul.mubr.msk.bf16.vlgmr.msra.gmra.mxu1 %vm150_vm4, %v1306_v1 }
 0xeb4   :  { %6595 = vmatprep.mubr.msk.bf16.mxu1 %vm7427_vm1, %v7426_v0  ;;  %6592 = vmatpush3.bf16.msra.mxu1 %v7137_v58 }
 0xeb5   :  { %6593 = vmatprep.subr.bf16.mxu1 %v7426_v0 }
 0xeb8   :  { %6594 = vmatpush3.bf16.msra.mxu1 %v7138_v59 }
 0xeb9   :  { %6599 = vmatprep.subr.bf16.mxu1 %v7426_v0 }
 0xf73   :  { %v1367_v21 = vpop.f32.mrf.mxu1 }
 0xf74   :  { %v1368_v22 = vadd.f32 %v6031_v20, %v1367_v21 }
 0xf75   :  { %v6569_v24 = vpop.f32.mrf.mxu1 }
 0xf76   :  { %v6035_v25 = vmul.f32 -1.702, %v1368_v22 }
 0xf77   :  { %v1370_v26 = vpop.f32.mrf.mxu1 }
 0xf78   :  { %v1378_v27 = vmul.f32 1.442695, %v6035_v25  ;;  %v1371_v6 = vadd.f32 %v6031_v20, %v1370_v26 }
 0xf79   :  { %v6570_v29 = vpop.f32.mrf.mxu1 }
 0xf7a   :  { %7224 = vpow2.f32 %v1378_v27  ;;  %v6036_v30 = vmul.f32 -1.702, %v1371_v6 }
 0xf7c   :  { %v1380_v31 = vmul.f32 1.442695, %v6036_v30 }
 0xf7e   :  { %7226 = vpow2.f32 %v1380_v31 }
 0xf87   :  { %v7225_v33 = vpop.eup %7224 }
 0xf88   :  { %v1382_v36 = vadd.f32 1.0, %v7225_v33 }
 0xf8a   :  { %7228 = vrcp.f32 %v1382_v36 }
 0xf8b   :  { %v7227_v39 = vpop.eup %7226 }
 0xf8c   :  { %v1383_v40 = vadd.f32 1.0, %v7227_v39 }
 0xf8e   :  { %7230 = vrcp.f32 %v1383_v40 }
 0xf97   :  { %v7229_v42 = vpop.eup %7228 }
 0xf98   :  { %v1388_v2 = vmul.f32 %v7229_v42, %v1368_v22  ;;  %v1540_v22 = vrot.slane %v7936_v60, %v7625_v49 }
 0xf9b   :  { %v7231_v35 = vpop.eup %7230 }
 0xf9c   :  { %v1389_v18 = vmul.f32 %v7231_v35, %v1371_v6  ;;  %v1608_v35 = vrot.slane %v7936_v60, %v7641_v4 }
 0xf9e   :  { %v1390_v9 = vpack.c.bf16 %v1389_v18, %v1388_v2 }
 0xfa0   :  { %6588 = vmatmul.mubr.bf16.vlgmr.msra.gmra.mxu0 %v1390_v9 }
 0xfa1   :  { %6619 = vmatprep.mubr.msk.bf16.mxu0 %vm7427_vm1, %v7426_v0 }
0x1060   :  { %v1493_v43 = vpop.f32.mrf.mxu0 }
0x1061   :  { %v1494_v23 = vadd.f32 %v6037_v12, %v1493_v43 }
0x1062   :  { %v6589_v62 = vpop.f32.mrf.mxu0 }
0x1063   :  { %v7913_v3 = vadd.f32 %v1494_v23, %v7838_v32 }
0x1064   :  { %v1496_v44 = vpop.f32.mrf.mxu0 }
0x1065   :  { %v1497_v15 = vadd.f32 %v6037_v12, %v1496_v44  ;;  %v1505_v45 = vsel %vm150_vm4, %v7913_v3, 0.0 }
0x1066   :  { %1506 = vadd.xlane.f32.xlu1 %v1505_v45  ;;  %v6590_v46 = vpop.f32.mrf.mxu0 }
0x1067   :  { %v7918_v47 = vadd.f32 %v1497_v15, %v7843_v41 }
0x1069   :  { %v1508_v48 = vsel %vm150_vm4, %v7918_v47, 0.0 }
0x106a   :  { %1509 = vadd.xlane.f32.xlu0 %v1508_v48 }
0x10ef   :  { %v1507_v50 = vpop.xlane.xlu1 %1506 }
0x10f0   :  { %v1511_v34 = vmul.f32 0.03125, %v1507_v50 }
0x10f2   :  { %v1513_v51 = vsub.f32 %v7913_v3, %v1511_v34 }
0x10f3   :  { %v1510_v32 = vpop.xlane.xlu0 %1509 }
0x10f4   :  { %v1512_v53 = vmul.f32 0.03125, %v1510_v32  ;;  %v1515_v54 = vmul.f32 %v1513_v51, %v1513_v51 }
0x10f6   :  { %v1514_v55 = vsub.f32 %v7918_v47, %v1512_v53  ;;  %v1517_v56 = vsel %vm150_vm4, %v1515_v54, 0.0 }
0x10f7   :  { %1518 = vadd.xlane.f32.xlu1 %v1517_v56 }
0x10f8   :  { %v1516_v57 = vmul.f32 %v1514_v55, %v1514_v55 }
0x10fa   :  { %v1520_v41 = vsel %vm150_vm4, %v1516_v57, 0.0 }
0x10fb   :  { %1521 = vadd.xlane.f32.xlu0 %v1520_v41 }
0x1108   :  { %1616 = vrot.lane.b32.xlu1 %v1614_v61, %s8960_s0 }
0x1180   :  { %v1519_v63 = vpop.xlane.xlu1 %1518 }
0x1181   :  { %v1523_v1 = vmul.f32 0.03125, %v1519_v63 }
0x1183   :  { %v1525_v7 = vadd.f32 1e-05, %v1523_v1 }
0x1184   :  { %v1522_v38 = vpop.xlane.xlu0 %1521  ;;  %v1617_v6 = vpop.permute.xlu1 %1616 }
0x1185   :  { %7232 = vrsqrt.f32 %v1525_v7  ;;  %v1524_v5 = vmul.f32 0.03125, %v1522_v38 }
0x1187   :  { %v1526_v8 = vadd.f32 1e-05, %v1524_v5 }
0x1189   :  { %7234 = vrsqrt.f32 %v1526_v8 }
0x1192   :  { %v7233_v14 = vpop.eup %7232 }
0x1193   :  { %v1529_v16 = vmul.f32 %v7233_v14, %v1513_v51 }
0x1195   :  { %v1535_v21 = vmul.f32 %v1534_v17, %v1529_v16 }
0x1196   :  { %v7235_v19 = vpop.eup %7234 }
0x1197   :  { %v1530_v20 = vmul.f32 %v7235_v19, %v1514_v55  ;;  %v1541_v25 = vadd.f32 %v1540_v22, %v1535_v21  ;;  %v1624_v55 = vrot.slane %v7936_v60, %v7664_v28 }
0x1199   :  { %v1536_v24 = vmul.f32 %v1534_v17, %v1530_v20 }
0x119b   :  { %v1542_v26 = vadd.f32 %v1540_v22, %v1536_v24 }
0x119d   :  { %v1543_v27 = vpack.c.bf16 %v1542_v26, %v1541_v25 }
0x119f   :  { %6596 = vmatmul.mubr.msk.bf16.vlgmr.msra.gmra.mxu1 %vm150_vm4, %v1543_v27 }
0x11a0   :  { %6601 = vmatprep.mubr.msk.bf16.mxu1 %vm7427_vm1, %v7426_v0 }
0x125f   :  { %v1598_v29 = vpop.f32.mrf.mxu1 }
0x1260   :  { %v1619_v30 = vadd.f32 %v1617_v6, %v1598_v29  ;;  %v1609_v9 = vadd.f32 %v1608_v35, %v1598_v29 }
0x1261   :  { %v6597_v31 = vpop.f32.mrf.mxu1 }
0x1262   :  { %v7949_v33 = vpack.c.bf16 %v1619_v30, %v1619_v30  ;;  %v7961_v43 = vpack.c.bf16 %v1609_v9, %v1609_v9 }
0x1263   :  { %v1601_v36 = vpop.f32.mrf.mxu1 }
0x1264   :  { %v1620_v39 = vadd.f32 %v1617_v6, %v1601_v36  ;;  %1638 = vrot.lane.b32.xlu0 %v7949_v33, %s8958_s23  ;;  %v1610_v62 = vadd.f32 %v1608_v35, %v1601_v36 }
0x1265   :  { %v6598_v40 = vpop.f32.mrf.mxu1 }
0x1266   :  { %v7953_v42 = vpack.c.bf16 %v1620_v39, %v1620_v39  ;;  %v7969_v44 = vpack.c.bf16 %v1610_v62, %v1610_v62 }
0x1268   :  { %1687 = vrot.lane.b32.xlu1 %v7953_v42, %s8958_s23  ;;  %s8989_s23 = smov 64  }
0x12d6   :  { %v1639_v2 = vpop.permute.xlu0 %1638 }
0x12d7   :  { %v1644_v18 = vsel %vm286_vm5, %v1639_v2, 0 }
0x12d8   :  { %6600 = vmatpush3.bf16.xpose.msra.mxu1 %v1644_v18 }
0x12d9   :  { %6605 = vmatprep.subr.bf16.mxu1 %v7426_v0 }
0x12da   :  { %v1688_v12 = vpop.permute.xlu1 %1687 }
0x12db   :  { %v1693_v23 = vsel %vm286_vm5, %v1688_v12, 0 }
0x12df   :  { %6602 = vmatmul.mubr.msk.bf16.vlgmr.msra.gmra.mxu1 %vm286_vm5, %v7961_v43 }
0x12e0   :  { %6606 = vmatpush3.bf16.xpose.msra.mxu1 %v1693_v23  ;;  %6607 = vmatprep.mubr.msk.bf16.mxu1 %vm7427_vm1, %v7426_v0 }
0x12e1   :  { %6611 = vmatprep.subr.bf16.mxu1 %v7426_v0 }
0x12e7   :  { %6608 = vmatmul.mubr.msk.bf16.vlgmr.msra.gmra.mxu1 %vm286_vm5, %v7969_v44 }
0x12e8   :  { %6613 = vmatprep.mubr.msk.bf16.mxu1 %vm7427_vm1, %v7426_v0 }
0x139f   :  { %v1680_v15 = vpop.f32.mrf.mxu1 }
0x13a0   :  { %v1735_v45 = vsel %vm286_vm5, %v1680_v15, -inf }
0x13a1   :  { %1736 = vmax.xlane.f32.xlu1 %v1735_v45  ;;  %v6603_v46 = vpop.f32.mrf.mxu1 }
0x13a3   :  { %v1683_v48 = vpop.f32.mrf.mxu1 }
0x13a5   :  { %v6604_v50 = vpop.f32.mrf.mxu1 }
0x13a7   :  { %v1729_v34 = vpop.f32.mrf.mxu1 }
0x13a8   :  { %v1738_v51 = vsel %vm286_vm5, %v1729_v34, -inf }
0x13a9   :  { %1739 = vmax.xlane.f32.xlu0 %v1738_v51  ;;  %v6609_v32 = vpop.f32.mrf.mxu1 }
0x13ab   :  { %v1732_v53 = vpop.f32.mrf.mxu1 }
0x13ad   :  { %v6610_v54 = vpop.f32.mrf.mxu1 }
0x13bf   :  { %1626 = vrot.lane.b32.xlu0 %v1624_v55, %s8956_s1 }
0x142a   :  { %v1737_v63 = vpop.xlane.xlu1 %1736 }
0x142b   :  { %v1741_v1 = vsub.f32 %v1680_v15, %v1737_v63 }
0x142d   :  { %v1743_v7 = vmul.f32 1.442695, %v1741_v1 }
0x142f   :  { %7236 = vpow2.f32 %v1743_v7 }
0x1432   :  { %v1740_v56 = vpop.xlane.xlu0 %1739 }
0x1433   :  { %v1742_v38 = vsub.f32 %v1729_v34, %v1740_v56 }
0x1435   :  { %v1745_v5 = vmul.f32 1.442695, %v1742_v38 }
0x1436   :  { %v1627_v57 = vpop.permute.xlu0 %1626 }
0x1437   :  { %v1629_v41 = vadd.f32 %v1627_v57, %v1598_v29  ;;  %v1630_v58 = vadd.f32 %v1627_v57, %v1601_v36  ;;  %7238 = vpow2.f32 %v1745_v5 }
0x1439   :  { %v7980_v59 = vpack.c.bf16 %v1629_v41, %v1629_v41  ;;  %v7982_v61 = vpack.c.bf16 %v1630_v58, %v1630_v58 }
0x143b   :  { %1809 = vrot.lane.b32.xlu0 %v7982_v61, %s8956_s1  ;;  %1760 = vrot.lane.b32.xlu1 %v7980_v59, %s8956_s1 }
0x143c   :  { %v7237_v8 = vpop.eup %7236 }
0x143d   :  { %v1747_v14 = vsel %vm286_vm5, %v7237_v8, 0.0 }
0x143f   :  { %1911 = vrot.lane.b32.xlu0 %v7953_v42, %s8954_s5 }
0x1443   :  { %1909 = vrot.lane.b32.xlu0 %v7969_v44, %s8952_s24 }
0x1444   :  { %v7239_v16 = vpop.eup %7238 }
0x1445   :  { %v1750_v17 = vsel %vm286_vm5, %v7239_v16, 0.0 }
0x145f   :  { %1748 = vadd.xlane.f32.xlu1 %v1747_v14 }
0x1463   :  { %1751 = vadd.xlane.f32.xlu1 %v1750_v17 }
0x1474   :  { %1860 = vrot.lane.b32.xlu1 %v7949_v33, %s8954_s5 }
0x1478   :  { %1858 = vrot.lane.b32.xlu1 %v7961_v43, %s8952_s24  ;;  %s8985_s24 = smov 16  }
0x14ad   :  { %v1810_v19 = vpop.permute.xlu0 %1809  ;;  %v1761_v20 = vpop.permute.xlu1 %1760 }
0x14ae   :  { %v1815_v21 = vsel %vm412_vm6, %v1810_v19, 0  ;;  %v1766_v22 = vsel %vm412_vm6, %v1761_v20, 0 }
0x14af   :  { %6612 = vmatpush3.bf16.msra.mxu1 %v1766_v22  ;;  %6618 = vmatpush3.bf16.msra.mxu0 %v1815_v21 }
0x14b0   :  { %6623 = vmatprep.subr.bf16.mxu1 %v7426_v0  ;;  %6629 = vmatprep.subr.bf16.mxu0 %v7426_v0 }
0x14b1   :  { %v1912_v39 = vpop.permute.xlu0 %1911 }
0x14b2   :  { %v1917_v35 = vsel %vm286_vm5, %v1912_v39, 0 }
0x14b5   :  { %v1910_v18 = vpop.permute.xlu0 %1909 }
0x14e8   :  { %v1749_v24 = vpop.xlane.xlu1 %1748 }
0x14e9   :  { %7240 = vrcp.f32 %v1749_v24 }
0x14ec   :  { %v1752_v25 = vpop.xlane.xlu1 %1751 }
0x14ed   :  { %7242 = vrcp.f32 %v1752_v25 }
0x14f0   :  { %v1861_v6 = vpop.permute.xlu1 %1860 }
0x14f1   :  { %v1866_v31 = vsel %vm286_vm5, %v1861_v6, 0 }
0x14f4   :  { %v1859_v2 = vpop.permute.xlu1 %1858 }
0x14f6   :  { %v7241_v26 = vpop.eup %7240 }
0x14f7   :  { %v1755_v27 = vmul.f32 %v7241_v26, %v7237_v8 }
0x14f9   :  { %v1757_v29 = vpack.c.bf16 %v1755_v27, %v1755_v27 }
0x14fa   :  { %v7243_v30 = vpop.eup %7242 }
0x14fb   :  { %6614 = vmatmul.mubr.msk.bf16.vlgmr.msra.gmra.mxu1 %vm286_vm5, %v1757_v29  ;;  %v1756_v36 = vmul.f32 %v7243_v30, %v7239_v16 }
0x14fc   :  { %6624 = vmatpush3.bf16.xpose.msra.mxu1 %v1866_v31  ;;  %6625 = vmatprep.mubr.msk.bf16.mxu1 %vm7427_vm1, %v7426_v0 }
0x14fd   :  { %v1758_v40 = vpack.c.bf16 %v1756_v36, %v1756_v36  ;;  %6635 = vmatprep.subr.bf16.mxu1 %v7426_v0 }
0x14ff   :  { %6620 = vmatmul.mubr.msk.bf16.vlgmr.msra.gmra.mxu0 %vm286_vm5, %v1758_v40 }
0x1500   :  { %6630 = vmatpush3.bf16.xpose.msra.mxu0 %v1917_v35  ;;  %6631 = vmatprep.mubr.msk.bf16.mxu0 %vm7427_vm1, %v7426_v0 }
0x1501   :  { %6641 = vmatprep.subr.bf16.mxu0 %v7426_v0 }
0x1503   :  { %6626 = vmatmul.mubr.msk.bf16.vlgmr.msra.gmra.mxu1 %vm286_vm5, %v1859_v2 }
0x1504   :  { %6637 = vmatprep.mubr.msk.bf16.mxu1 %vm7427_vm1, %v7426_v0 }
0x1507   :  { %6632 = vmatmul.mubr.msk.bf16.vlgmr.msra.gmra.mxu0 %vm286_vm5, %v1910_v18 }
0x1508   :  { %6643 = vmatprep.mubr.msk.bf16.mxu0 %vm7427_vm1, %v7426_v0 }
0x15bb   :  { %v8018_v9 = vpop.f32.mrf.mxu1 }
0x15bd   :  { %v6615_v12 = vpop.f32.mrf.mxu1 }
0x15bf   :  { %v1805_v23 = vpop.f32.mrf.mxu1  ;;  %v8020_v62 = vpop.f32.mrf.mxu0 }
0x15c1   :  { %v6616_v15 = vpop.f32.mrf.mxu1  ;;  %v6621_v45 = vpop.f32.mrf.mxu0 }
0x15c3   :  { %v1854_v46 = vpop.f32.mrf.mxu0  ;;  %v1902_v48 = vpop.f32.mrf.mxu1 }
0x15c4   :  { %v1959_v50 = vsel %vm286_vm5, %v1902_v48, -inf }
0x15c5   :  { %v6622_v34 = vpop.f32.mrf.mxu0  ;;  %1960 = vmax.xlane.f32.xlu1 %v1959_v50  ;;  %v6627_v51 = vpop.f32.mrf.mxu1 }
0x15c7   :  { %v1905_v32 = vpop.f32.mrf.mxu1  ;;  %v1953_v53 = vpop.f32.mrf.mxu0 }
0x15c8   :  { %v1962_v54 = vsel %vm286_vm5, %v1953_v53, -inf }
0x15c9   :  { %1963 = vmax.xlane.f32.xlu0 %v1962_v54  ;;  %v6628_v55 = vpop.f32.mrf.mxu1  ;;  %v6633_v56 = vpop.f32.mrf.mxu0 }
0x15cb   :  { %v1956_v57 = vpop.f32.mrf.mxu0 }
0x15cd   :  { %v6634_v41 = vpop.f32.mrf.mxu0 }
0x15d6   :  { %1983 = vrot.lane.b32.xlu1 %v7980_v59, %s8977_s3 }
0x15da   :  { %2081 = vrot.lane.b32.xlu1 %v7949_v33, %s8978_s26 }
0x15de   :  { %2131 = vrot.lane.b32.xlu1 %v7953_v42, %s8978_s26 }
0x15e2   :  { %2079 = vrot.lane.b32.xlu1 %v7961_v43, %s8979_s6 }
0x164e   :  { %v1961_v58 = vpop.xlane.xlu1 %1960 }
0x164f   :  { %v1965_v63 = vsub.f32 %v1902_v48, %v1961_v58 }
0x1651   :  { %v1967_v1 = vmul.f32 1.442695, %v1965_v63 }
0x1652   :  { %v1964_v7 = vpop.xlane.xlu0 %1963  ;;  %v1984_v38 = vpop.permute.xlu1 %1983 }
0x1653   :  { %7244 = vpow2.f32 %v1967_v1  ;;  %v1966_v5 = vsub.f32 %v1953_v53, %v1964_v7  ;;  %v1989_v8 = vsel %vm412_vm6, %v1984_v38, 0 }
0x1654   :  { %6636 = vmatpush3.bf16.msra.mxu1 %v1989_v8 }
0x1655   :  { %v1969_v14 = vmul.f32 1.442695, %v1966_v5  ;;  %6647 = vmatprep.subr.bf16.mxu1 %v7426_v0 }
0x1656   :  { %v2082_v27 = vpop.permute.xlu1 %2081 }
0x1657   :  { %7246 = vpow2.f32 %v1969_v14  ;;  %v2087_v31 = vsel %vm286_vm5, %v2082_v27, 0 }
0x165a   :  { %v2132_v39 = vpop.permute.xlu1 %2131 }
0x165b   :  { %v2137_v35 = vsel %vm286_vm5, %v2132_v39, 0 }
0x165e   :  { %v2080_v2 = vpop.permute.xlu1 %2079 }
0x1660   :  { %v7245_v16 = vpop.eup %7244 }
0x1661   :  { %v1971_v17 = vsel %vm286_vm5, %v7245_v16, 0.0 }
0x1662   :  { %1972 = vadd.xlane.f32.xlu0 %v1971_v17 }
0x1664   :  { %v7247_v19 = vpop.eup %7246 }
0x1665   :  { %v1974_v20 = vsel %vm286_vm5, %v7247_v19, 0.0 }
0x1666   :  { %1975 = vadd.xlane.f32.xlu0 %v1974_v20 }
0x167c   :  { %2031 = vrot.lane.b32.xlu0 %v7982_v61, %s8977_s3 }
0x1680   :  { %2129 = vrot.lane.b32.xlu0 %v7969_v44, %s8979_s6 }
0x16eb   :  { %v1973_v21 = vpop.xlane.xlu0 %1972 }
0x16ec   :  { %7248 = vrcp.f32 %v1973_v21 }
0x16ef   :  { %v1976_v22 = vpop.xlane.xlu0 %1975 }
0x16f0   :  { %7250 = vrcp.f32 %v1976_v22 }
0x16f3   :  { %v2032_v24 = vpop.permute.xlu0 %2031 }
0x16f4   :  { %v2037_v25 = vsel %vm412_vm6, %v2032_v24, 0 }
0x16f5   :  { %6642 = vmatpush3.bf16.msra.mxu0 %v2037_v25 }
0x16f6   :  { %6653 = vmatprep.subr.bf16.mxu0 %v7426_v0 }
0x16f7   :  { %v2130_v18 = vpop.permute.xlu0 %2129 }
0x16f9   :  { %v7249_v26 = vpop.eup %7248 }
0x16fa   :  { %v1979_v6 = vmul.f32 %v7249_v26, %v7245_v16 }
0x16fc   :  { %v1981_v29 = vpack.c.bf16 %v1979_v6, %v1979_v6 }
0x16fd   :  { %v7251_v30 = vpop.eup %7250 }
0x16fe   :  { %6638 = vmatmul.mubr.msk.bf16.vlgmr.msra.gmra.mxu1 %vm286_vm5, %v1981_v29  ;;  %v1980_v36 = vmul.f32 %v7251_v30, %v7247_v19 }
0x16ff   :  { %6648 = vmatpush3.bf16.xpose.msra.mxu1 %v2087_v31  ;;  %6649 = vmatprep.mubr.msk.bf16.mxu1 %vm7427_vm1, %v7426_v0 }
0x1700   :  { %v1982_v40 = vpack.c.bf16 %v1980_v36, %v1980_v36  ;;  %6659 = vmatprep.subr.bf16.mxu1 %v7426_v0 }
0x1702   :  { %6644 = vmatmul.mubr.msk.bf16.vlgmr.msra.gmra.mxu0 %vm286_vm5, %v1982_v40 }
0x1703   :  { %6654 = vmatpush3.bf16.xpose.msra.mxu0 %v2137_v35  ;;  %6655 = vmatprep.mubr.msk.bf16.mxu0 %vm7427_vm1, %v7426_v0 }
0x1704   :  { %6665 = vmatprep.subr.bf16.mxu0 %v7426_v0 }
0x1706   :  { %6650 = vmatmul.mubr.msk.bf16.vlgmr.msra.gmra.mxu1 %vm286_vm5, %v2080_v2 }
0x1707   :  { %6661 = vmatprep.mubr.msk.bf16.mxu1 %vm7427_vm1, %v7426_v0 }
0x170a   :  { %6656 = vmatmul.mubr.msk.bf16.vlgmr.msra.gmra.mxu0 %vm286_vm5, %v2130_v18 }
0x170b   :  { %6667 = vmatprep.mubr.msk.bf16.mxu0 %vm7427_vm1, %v7426_v0 }
0x17be   :  { %v8058_v12 = vpop.f32.mrf.mxu1 }
0x17c0   :  { %v6639_v23 = vpop.f32.mrf.mxu1 }
0x17c2   :  { %v2028_v15 = vpop.f32.mrf.mxu1  ;;  %v8060_v45 = vpop.f32.mrf.mxu0 }
0x17c3   :  { %v7077_v46 = vpack.i.bf16 %v8060_v45, %v8058_v12 }
0x17c4   :  { %v6640_v48 = vpop.f32.mrf.mxu1  ;;  %v6645_v50 = vpop.f32.mrf.mxu0 }
0x17c6   :  { %v2076_v34 = vpop.f32.mrf.mxu0  ;;  %v2123_v51 = vpop.f32.mrf.mxu1 }
0x17c7   :  { %v2179_v32 = vsel %vm286_vm5, %v2123_v51, -inf }
0x17c8   :  { %v6646_v53 = vpop.f32.mrf.mxu0  ;;  %2180 = vmax.xlane.f32.xlu1 %v2179_v32  ;;  %v6651_v54 = vpop.f32.mrf.mxu1 }
0x17ca   :  { %v2126_v55 = vpop.f32.mrf.mxu1  ;;  %v2173_v56 = vpop.f32.mrf.mxu0 }
0x17cb   :  { %v2182_v57 = vsel %vm286_vm5, %v2173_v56, -inf }
0x17cc   :  { %2183 = vmax.xlane.f32.xlu0 %v2182_v57  ;;  %v6652_v41 = vpop.f32.mrf.mxu1  ;;  %v6657_v58 = vpop.f32.mrf.mxu0 }
0x17ce   :  { %v2176_v63 = vpop.f32.mrf.mxu0 }
0x17d0   :  { %v6658_v1 = vpop.f32.mrf.mxu0 }
0x17d9   :  { %2203 = vrot.lane.b32.xlu1 %v7980_v59, %s8980_s2 }
0x17dd   :  { %2301 = vrot.lane.b32.xlu1 %v7949_v33, %s8981_s27 }
0x17e1   :  { %2351 = vrot.lane.b32.xlu1 %v7953_v42, %s8981_s27 }
0x17e5   :  { %2299 = vrot.lane.b32.xlu1 %v7961_v43, %s8982_s28 }
0x1851   :  { %v2181_v7 = vpop.xlane.xlu1 %2180 }
0x1852   :  { %v2185_v38 = vsub.f32 %v2123_v51, %v2181_v7 }
0x1854   :  { %v2187_v5 = vmul.f32 1.442695, %v2185_v38 }
0x1855   :  { %v2184_v8 = vpop.xlane.xlu0 %2183  ;;  %v2204_v14 = vpop.permute.xlu1 %2203 }
0x1856   :  { %7252 = vpow2.f32 %v2187_v5  ;;  %v2186_v16 = vsub.f32 %v2173_v56, %v2184_v8  ;;  %v2209_v17 = vsel %vm412_vm6, %v2204_v14, 0 }
0x1857   :  { %6660 = vmatpush3.bf16.msra.mxu1 %v2209_v17 }
0x1858   :  { %v2189_v19 = vmul.f32 1.442695, %v2186_v16  ;;  %6671 = vmatprep.subr.bf16.mxu1 %v7426_v0 }
0x1859   :  { %v2302_v27 = vpop.permute.xlu1 %2301 }
0x185a   :  { %7254 = vpow2.f32 %v2189_v19  ;;  %v2307_v31 = vsel %vm286_vm5, %v2302_v27, 0 }
0x185d   :  { %v2352_v36 = vpop.permute.xlu1 %2351 }
0x185e   :  { %v2357_v40 = vsel %vm286_vm5, %v2352_v36, 0 }
0x1861   :  { %v2300_v35 = vpop.permute.xlu1 %2299 }
0x1863   :  { %v7253_v33 = vpop.eup %7252 }
0x1864   :  { %v2191_v42 = vsel %vm286_vm5, %v7253_v33, 0.0 }
0x1865   :  { %2192 = vadd.xlane.f32.xlu0 %v2191_v42 }
0x1867   :  { %v7255_v20 = vpop.eup %7254 }
0x1868   :  { %v2194_v43 = vsel %vm286_vm5, %v7255_v20, 0.0 }
0x1869   :  { %2195 = vadd.xlane.f32.xlu0 %v2194_v43 }
0x187f   :  { %2251 = vrot.lane.b32.xlu0 %v7982_v61, %s8980_s2 }
0x1883   :  { %2349 = vrot.lane.b32.xlu0 %v7969_v44, %s8982_s28 }
0x18ee   :  { %v2193_v21 = vpop.xlane.xlu0 %2192 }
0x18ef   :  { %7256 = vrcp.f32 %v2193_v21 }
0x18f2   :  { %v2196_v22 = vpop.xlane.xlu0 %2195 }
0x18f3   :  { %7258 = vrcp.f32 %v2196_v22 }
0x18f6   :  { %v2252_v24 = vpop.permute.xlu0 %2251 }
0x18f7   :  { %v2257_v25 = vsel %vm412_vm6, %v2252_v24, 0 }
0x18f8   :  { %6666 = vmatpush3.bf16.msra.mxu0 %v2257_v25 }
0x18f9   :  { %6677 = vmatprep.subr.bf16.mxu0 %v7426_v0 }
0x18fa   :  { %v2350_v2 = vpop.permute.xlu0 %2349 }
0x18fc   :  { %v7257_v26 = vpop.eup %7256 }
0x18fd   :  { %v2199_v6 = vmul.f32 %v7257_v26, %v7253_v33 }
0x18ff   :  { %v2201_v29 = vpack.c.bf16 %v2199_v6, %v2199_v6 }
0x1900   :  { %v7259_v30 = vpop.eup %7258 }
0x1901   :  { %6662 = vmatmul.mubr.msk.bf16.vlgmr.msra.gmra.mxu1 %vm286_vm5, %v2201_v29  ;;  %v2200_v44 = vmul.f32 %v7259_v30, %v7255_v20  ;;  %v7139_v29 = vld [vmem:[%s8975_s29 + $0x18] sm:$0xff]   ;;  %v7140_v30 = vld [vmem:[%s8975_s29 + $0x10] sm:$0xff]  }
0x1902   :  { %6672 = vmatpush3.bf16.xpose.msra.mxu1 %v2307_v31  ;;  %6673 = vmatprep.mubr.msk.bf16.mxu1 %vm7427_vm1, %v7426_v0 }
0x1903   :  { %v2202_v39 = vpack.c.bf16 %v2200_v44, %v2200_v44  ;;  %6683 = vmatprep.subr.bf16.mxu1 %v7426_v0 }
0x1905   :  { %6668 = vmatmul.mubr.msk.bf16.vlgmr.msra.gmra.mxu0 %vm286_vm5, %v2202_v39 }
0x1906   :  { %6678 = vmatpush3.bf16.xpose.msra.mxu0 %v2357_v40  ;;  %6679 = vmatprep.mubr.msk.bf16.mxu0 %vm7427_vm1, %v7426_v0 }
0x1907   :  { %6689 = vmatprep.subr.bf16.mxu0 %v7426_v0 }
0x1909   :  { %6674 = vmatmul.mubr.msk.bf16.vlgmr.msra.gmra.mxu1 %vm286_vm5, %v2300_v35 }
0x190a   :  { %6685 = vmatprep.mubr.msk.bf16.mxu1 %vm7427_vm1, %v7426_v0 }
0x190d   :  { %6680 = vmatmul.mubr.msk.bf16.vlgmr.msra.gmra.mxu0 %vm286_vm5, %v2350_v2 }
0x190e   :  { %6691 = vmatprep.mubr.msk.bf16.mxu0 %vm7427_vm1, %v7426_v0 }
0x19c1   :  { %v2245_v18 = vpop.f32.mrf.mxu1 }
0x19c3   :  { %v6663_v23 = vpop.f32.mrf.mxu1 }
0x19c5   :  { %v2248_v15 = vpop.f32.mrf.mxu1  ;;  %v2293_v48 = vpop.f32.mrf.mxu0 }
0x19c6   :  { %v7082_v38 = vpack.i.bf16 %v2293_v48, %v2245_v18 }
0x19c7   :  { %v6664_v50 = vpop.f32.mrf.mxu1  ;;  %v6669_v34 = vpop.f32.mrf.mxu0 }
0x19c9   :  { %v2296_v51 = vpop.f32.mrf.mxu0  ;;  %v2343_v32 = vpop.f32.mrf.mxu1 }
0x19ca   :  { %v2399_v53 = vsel %vm286_vm5, %v2343_v32, -inf }
0x19cb   :  { %v6670_v54 = vpop.f32.mrf.mxu0  ;;  %2400 = vmax.xlane.f32.xlu1 %v2399_v53  ;;  %v6675_v55 = vpop.f32.mrf.mxu1 }
0x19cd   :  { %v2346_v56 = vpop.f32.mrf.mxu1  ;;  %v2393_v57 = vpop.f32.mrf.mxu0 }
0x19ce   :  { %v2402_v41 = vsel %vm286_vm5, %v2393_v57, -inf }
0x19cf   :  { %2403 = vmax.xlane.f32.xlu0 %v2402_v41  ;;  %v6676_v58 = vpop.f32.mrf.mxu1  ;;  %v6681_v63 = vpop.f32.mrf.mxu0 }
0x19d1   :  { %v2396_v1 = vpop.f32.mrf.mxu0 }
0x19d3   :  { %v6682_v7 = vpop.f32.mrf.mxu0 }
0x19dc   :  { %2423 = vrot.lane.b32.xlu1 %v7980_v59, %s8983_s4 }
0x19e0   :  { %7078 = vrot.lane.b32.xlu1 %v7077_v46, %s8984_s25 }
0x19e4   :  { %7083 = vrot.lane.b32.xlu1 %v7082_v38, %s8985_s24 }
0x1a54   :  { %v2401_v5 = vpop.xlane.xlu1 %2400 }
0x1a55   :  { %v2405_v8 = vsub.f32 %v2343_v32, %v2401_v5 }
0x1a57   :  { %v2407_v14 = vmul.f32 1.442695, %v2405_v8 }
0x1a58   :  { %v2404_v16 = vpop.xlane.xlu0 %2403  ;;  %v2424_v17 = vpop.permute.xlu1 %2423 }
0x1a59   :  { %7260 = vpow2.f32 %v2407_v14  ;;  %v2406_v19 = vsub.f32 %v2393_v57, %v2404_v16  ;;  %v2429_v33 = vsel %vm412_vm6, %v2424_v17, 0 }
0x1a5a   :  { %6684 = vmatpush3.bf16.msra.mxu1 %v2429_v33 }
0x1a5b   :  { %v2409_v42 = vmul.f32 1.442695, %v2406_v19  ;;  %6695 = vmatprep.subr.bf16.mxu1 %v7426_v0 }
0x1a5c   :  { %v7079_v15 = vpop.permute.xlu1 %7078 }
0x1a5d   :  { %7262 = vpow2.f32 %v2409_v42  ;;  %v7081_v50 = vunpack.i.h.bf16 %v7079_v15  ;;  %v7080_v34 = vunpack.i.l.bf16 %v7079_v15 }
0x1a5f   :  { %v2544_v54 = vsel %vm286_vm5, %v8020_v62, %v7081_v50  ;;  %v2543_v55 = vsel %vm286_vm5, %v8018_v9, %v7080_v34  ;;  %v2616_v62 = vrot.slane %v7936_v60, %v7833_v11  ;;  %v7143_v50 = vld [vmem:[%s8911_s7 + $0x78] sm:$0xff]   ;;  %v7145_v34 = vld [vmem:[%s8911_s7 + $0x68] sm:$0xff]  }
0x1a60   :  { %v7084_v48 = vpop.permute.xlu1 %7083 }
0x1a61   :  { %v7086_v51 = vunpack.i.h.bf16 %v7084_v48  ;;  %v7085_v32 = vunpack.i.l.bf16 %v7084_v48 }
0x1a63   :  { %v2545_v41 = vsel %vm1193_vm7, %v2543_v55, %v7085_v32  ;;  %v2546_v58 = vsel %vm1193_vm7, %v2544_v54, %v7086_v51  ;;  %v7146_v51 = vld [vmem:[%s8911_s7 + $0x60] sm:$0xff]   ;;  %v7147_v32 = vld [vmem:[%s8911_s7 + $0x58] sm:$0xff]   ;;  %v7149_v54 = vld [vmem:[%s8911_s7 + $0x48] sm:$0xff]  }
0x1a64   :  { %v7150_v55 = vld [vmem:[%s8911_s7 + $0x40] sm:$0xff]  }
0x1a66   :  { %v7261_v59 = vpop.eup %7260 }
0x1a67   :  { %v2411_v12 = vsel %vm286_vm5, %v7261_v59, 0.0 }
0x1a68   :  { %2412 = vadd.xlane.f32.xlu0 %v2411_v12 }
0x1a6a   :  { %v7263_v45 = vpop.eup %7262 }
0x1a6b   :  { %v2414_v46 = vsel %vm286_vm5, %v7263_v45, 0.0 }
0x1a6c   :  { %2415 = vadd.xlane.f32.xlu0 %v2414_v46 }
0x1a82   :  { %2471 = vrot.lane.b32.xlu0 %v7982_v61, %s8983_s4 }
0x1af1   :  { %v2413_v20 = vpop.xlane.xlu0 %2412 }
0x1af2   :  { %7264 = vrcp.f32 %v2413_v20 }
0x1af5   :  { %v2416_v43 = vpop.xlane.xlu0 %2415 }
0x1af6   :  { %7266 = vrcp.f32 %v2416_v43 }
0x1af9   :  { %v2472_v21 = vpop.permute.xlu0 %2471 }
0x1afa   :  { %v2477_v22 = vsel %vm412_vm6, %v2472_v21, 0 }
0x1afb   :  { %6690 = vmatpush3.bf16.msra.mxu0 %v2477_v22 }
0x1afc   :  { %6703 = vmatprep.subr.bf16.mxu0 %v7426_v0 }
0x1aff   :  { %v7265_v24 = vpop.eup %7264 }
0x1b00   :  { %v2419_v25 = vmul.f32 %v7265_v24, %v7261_v59  ;;  %v7141_v24 = vld [vmem:[%s8976_s30 + $0x18] sm:$0xff]  }
0x1b02   :  { %v2421_v26 = vpack.c.bf16 %v2419_v25, %v2419_v25  ;;  %v7142_v25 = vld [vmem:[%s8976_s30 + $0x10] sm:$0xff]  }
0x1b03   :  { %v7267_v27 = vpop.eup %7266 }
0x1b04   :  { %6686 = vmatmul.mubr.msk.bf16.vlgmr.msra.gmra.mxu1 %vm286_vm5, %v2421_v26  ;;  %v2420_v6 = vmul.f32 %v7267_v27, %v7263_v45 }
0x1b05   :  { %6699 = vmatprep.mubr.msk.bf16.mxu1 %vm7427_vm1, %v7426_v0  ;;  %6696 = vmatpush3.bf16.msra.mxu1 %v7139_v29 }
0x1b06   :  { %v2422_v61 = vpack.c.bf16 %v2420_v6, %v2420_v6  ;;  %6697 = vmatprep.subr.bf16.mxu1 %v7426_v0 }
0x1b08   :  { %6692 = vmatmul.mubr.msk.bf16.vlgmr.msra.gmra.mxu0 %vm286_vm5, %v2422_v61 }
0x1b09   :  { %6707 = vmatprep.mubr.msk.bf16.mxu0 %vm7427_vm1, %v7426_v0  ;;  %6698 = vmatpush3.bf16.msra.mxu1 %v7140_v30 }
0x1b0a   :  { %6711 = vmatprep.subr.bf16.mxu1 %v7426_v0  ;;  %6704 = vmatpush3.bf16.msra.mxu0 %v7141_v24 }
0x1b0b   :  { %6705 = vmatprep.subr.bf16.mxu0 %v7426_v0 }
0x1b0e   :  { %6706 = vmatpush3.bf16.msra.mxu0 %v7142_v25 }
0x1b0f   :  { %6731 = vmatprep.subr.bf16.mxu0 %v7426_v0 }
0x1bc4   :  { %v2465_v31 = vpop.f32.mrf.mxu1 }
0x1bc6   :  { %v6687_v44 = vpop.f32.mrf.mxu1 }
0x1bc8   :  { %v2468_v36 = vpop.f32.mrf.mxu1  ;;  %v2513_v39 = vpop.f32.mrf.mxu0 }
0x1bc9   :  { %v7087_v40 = vpack.i.bf16 %v2513_v39, %v2465_v31  ;;  %v2648_v36 = vrot.slane %v7936_v60, %v7860_v52 }
0x1bca   :  { %v6688_v35 = vpop.f32.mrf.mxu1  ;;  %v6693_v2 = vpop.f32.mrf.mxu0 }
0x1bcb   :  { %7088 = vrot.lane.b32.xlu1 %v7087_v40, %s8986_s22  ;;  %v2654_v2 = vrot.slane %v7936_v60, %v7865_v13  ;;  %v7144_v60 = vld [vmem:[%s8911_s7 + $0x70] sm:$0xff]  }
0x1bcc   :  { %v2516_v18 = vpop.f32.mrf.mxu0 }
0x1bce   :  { %v6694_v23 = vpop.f32.mrf.mxu0 }
0x1c3d   :  { %v7089_v53 = vpop.permute.xlu1 %7088 }
0x1c3e   :  { %v7091_v56 = vunpack.i.h.bf16 %v7089_v53  ;;  %v7090_v57 = vunpack.i.l.bf16 %v7089_v53  ;;  %v7148_v53 = vld [vmem:[%s8911_s7 + $0x50] sm:$0xff]   ;;  %s8990_s7 = smov 88  }
0x1c40   :  { %v2548_v63 = vsel %vm1196_vm8, %v2546_v58, %v7091_v56  ;;  %v2547_v1 = vsel %vm1196_vm8, %v2545_v41, %v7090_v57  ;;  %v6083_v56 = vld [vmem:[%s8913_s9 + $0x1] ss:$0 sm:$0xff] }
0x1c41   :  { %v2549_v7 = vpack.c.bf16 %v2548_v63, %v2547_v1 }
0x1c43   :  { %6700 = vmatmul.mubr.msk.bf16.vlgmr.msra.gmra.mxu1 %vm150_vm4, %v2549_v7 }
0x1c44   :  { %6727 = vmatprep.mubr.msk.bf16.mxu1 %vm7427_vm1, %v7426_v0  ;;  %6712 = vmatpush3.bf16.msra.mxu1 %v7143_v50 }
0x1c45   :  { %6713 = vmatprep.subr.bf16.mxu1 %v7426_v0 }
0x1c48   :  { %6714 = vmatpush3.bf16.msra.mxu1 %v7144_v60 }
0x1c49   :  { %6715 = vmatprep.subr.bf16.mxu1 %v7426_v0 }
0x1c4c   :  { %6716 = vmatpush3.bf16.msra.mxu1 %v7145_v34 }
0x1c4d   :  { %6717 = vmatprep.subr.bf16.mxu1 %v7426_v0 }
0x1c50   :  { %6718 = vmatpush3.bf16.msra.mxu1 %v7146_v51 }
0x1c51   :  { %6719 = vmatprep.subr.bf16.mxu1 %v7426_v0 }
0x1c54   :  { %6720 = vmatpush3.bf16.msra.mxu1 %v7147_v32 }
0x1c55   :  { %6721 = vmatprep.subr.bf16.mxu1 %v7426_v0 }
0x1c58   :  { %6722 = vmatpush3.bf16.msra.mxu1 %v7148_v53 }
0x1c59   :  { %6723 = vmatprep.subr.bf16.mxu1 %v7426_v0 }
0x1c5c   :  { %6724 = vmatpush3.bf16.msra.mxu1 %v7149_v54 }
0x1c5d   :  { %6725 = vmatprep.subr.bf16.mxu1 %v7426_v0 }
0x1c60   :  { %6726 = vmatpush3.bf16.msra.mxu1 %v7150_v55 }
0x1c61   :  { %6759 = vmatprep.subr.bf16.mxu1 %v7426_v0 }
0x1d03   :  { %v2604_v9 = vpop.f32.mrf.mxu1 }
0x1d04   :  { %v2611_v38 = vadd.f32 %v2604_v9, %v7913_v3 }
0x1d05   :  { %v6701_v5 = vpop.f32.mrf.mxu1 }
0x1d06   :  { %v8146_v8 = vadd.f32 %v2616_v62, %v2611_v38 }
0x1d07   :  { %v2607_v14 = vpop.f32.mrf.mxu1 }
0x1d08   :  { %v2612_v16 = vadd.f32 %v2607_v14, %v7918_v47  ;;  %v2619_v17 = vsel %vm150_vm4, %v8146_v8, 0.0 }
0x1d09   :  { %2620 = vadd.xlane.f32.xlu0 %v2619_v17  ;;  %v6702_v19 = vpop.f32.mrf.mxu1 }
0x1d0a   :  { %v8151_v33 = vadd.f32 %v2616_v62, %v2612_v16 }
0x1d0c   :  { %v2622_v42 = vsel %vm150_vm4, %v8151_v33, 0.0 }
0x1d0d   :  { %2623 = vadd.xlane.f32.xlu1 %v2622_v42 }
0x1d92   :  { %v2621_v59 = vpop.xlane.xlu0 %2620 }
0x1d93   :  { %v2625_v12 = vmul.f32 0.03125, %v2621_v59 }
0x1d95   :  { %v2627_v3 = vsub.f32 %v8146_v8, %v2625_v12 }
0x1d96   :  { %v2624_v45 = vpop.xlane.xlu1 %2623 }
0x1d97   :  { %v2626_v46 = vmul.f32 0.03125, %v2624_v45  ;;  %v2629_v20 = vmul.f32 %v2627_v3, %v2627_v3 }
0x1d99   :  { %v2628_v47 = vsub.f32 %v8151_v33, %v2626_v46  ;;  %v2631_v43 = vsel %vm150_vm4, %v2629_v20, 0.0  ;;  %v7151_v46 = vld [vmem:[%s8914_s10 + $0x8] sm:$0xff]   ;;  %v7152_v20 = vld [vmem:[%s8914_s10] sm:$0xff]   ;;  %s8988_s10 = smov 96  }
0x1d9a   :  { %2632 = vadd.xlane.f32.xlu0 %v2631_v43 }
0x1d9b   :  { %v2630_v21 = vmul.f32 %v2628_v47, %v2628_v47 }
0x1d9d   :  { %v2634_v22 = vsel %vm150_vm4, %v2630_v21, 0.0 }
0x1d9e   :  { %2635 = vadd.xlane.f32.xlu0 %v2634_v22 }
0x1e23   :  { %v2633_v26 = vpop.xlane.xlu0 %2632 }
0x1e24   :  { %v2637_v27 = vmul.f32 0.03125, %v2633_v26 }
0x1e26   :  { %v2639_v6 = vadd.f32 1e-05, %v2637_v27 }
0x1e27   :  { %v2636_v61 = vpop.xlane.xlu0 %2635 }
0x1e28   :  { %7268 = vrsqrt.f32 %v2639_v6  ;;  %v2638_v29 = vmul.f32 0.03125, %v2636_v61  ;;  %v7153_v61 = vld [vmem:[%s8916_s12] sm:$0xff]   ;;  %s8991_s12 = smov 120  }
0x1e2a   :  { %v2640_v30 = vadd.f32 1e-05, %v2638_v29 }
0x1e2c   :  { %7270 = vrsqrt.f32 %v2640_v30  ;;  %v2942_v30 = vld [vmem:[%s8915_s11] sm:$0xff] }
0x1e35   :  { %v7269_v31 = vpop.eup %7268 }
0x1e36   :  { %v2643_v44 = vmul.f32 %v7269_v31, %v2627_v3 }
0x1e38   :  { %v2649_v35 = vmul.f32 %v2648_v36, %v2643_v44  ;;  %v2934_v44 = vld [vmem:[%s8917_s13] sm:$0xff] }
0x1e39   :  { %v7271_v39 = vpop.eup %7270 }
0x1e3a   :  { %v2644_v40 = vmul.f32 %v7271_v39, %v2628_v47  ;;  %v2655_v23 = vadd.f32 %v2654_v2, %v2649_v35  ;;  %v6105_v47 = vld [vmem:[%s8912_s8 + $0x18] ss:$0 sm:$0xff]  ;;  %v2938_v35 = vrot.slane %v2934_v44, 1  ;;  %s8987_s8 = smov 32  }
0x1e3c   :  { %v2650_v18 = vmul.f32 %v2648_v36, %v2644_v40  ;;  %v2935_v36 = vld [vmem:[%s8917_s13 + $0x8] sm:$0x1] }
0x1e3e   :  { %v2656_v15 = vadd.f32 %v2654_v2, %v2650_v18  ;;  %v2939_v2 = vrot.slane %v2935_v36, 1  ;;  %v2950_v18 = vrot.slane %v2934_v44, %v7587_v10 }
0x1e40   :  { %v2657_v48 = vpack.c.bf16 %v2656_v15, %v2655_v23  ;;  %v2940_v15 = vsel %vm78_vm3, %v2938_v35, %v2939_v2 }
0x1e42   :  { %6708 = vmatmul.mubr.msk.bf16.vlgmr.msra.gmra.mxu0 %vm150_vm4, %v2657_v48 }
0x1e43   :  { %6735 = vmatprep.mubr.msk.bf16.mxu0 %vm7427_vm1, %v7426_v0  ;;  %6732 = vmatpush3.bf16.msra.mxu0 %v7151_v46 }
0x1e44   :  { %6733 = vmatprep.subr.bf16.mxu0 %v7426_v0 }
0x1e47   :  { %6734 = vmatpush3.bf16.msra.mxu0 %v7152_v20 }
0x1e48   :  { %6739 = vmatprep.subr.bf16.mxu0 %v7426_v0 }
0x1f02   :  { %v2720_v57 = vpop.f32.mrf.mxu0 }
0x1f03   :  { %v2721_v41 = vadd.f32 %v6083_v56, %v2720_v57 }
0x1f04   :  { %v6709_v58 = vpop.f32.mrf.mxu0 }
0x1f05   :  { %v6087_v63 = vmul.f32 -1.702, %v2721_v41 }
0x1f06   :  { %v2723_v1 = vpop.f32.mrf.mxu0 }
0x1f07   :  { %v2731_v7 = vmul.f32 1.442695, %v6087_v63  ;;  %v2724_v62 = vadd.f32 %v6083_v56, %v2723_v1 }
0x1f08   :  { %v6710_v9 = vpop.f32.mrf.mxu0 }
0x1f09   :  { %7272 = vpow2.f32 %v2731_v7  ;;  %v6088_v38 = vmul.f32 -1.702, %v2724_v62 }
0x1f0b   :  { %v2733_v5 = vmul.f32 1.442695, %v6088_v38 }
0x1f0d   :  { %7274 = vpow2.f32 %v2733_v5 }
0x1f16   :  { %v7273_v14 = vpop.eup %7272 }
0x1f17   :  { %v2735_v16 = vadd.f32 1.0, %v7273_v14  ;;  %v7154_v14 = vld [vmem:[%s8918_s14 + $0x8] sm:$0xff]  }
0x1f19   :  { %7276 = vrcp.f32 %v2735_v16  ;;  %v7155_v16 = vld [vmem:[%s8918_s14] sm:$0xff]  }
0x1f1a   :  { %v7275_v17 = vpop.eup %7274 }
0x1f1b   :  { %v2736_v19 = vadd.f32 1.0, %v7275_v17  ;;  %v8274_v17 = vld [vmem:[%s8922_s18] sm:$0xff] }
0x1f1d   :  { %7278 = vrcp.f32 %v2736_v19  ;;  %v3113_v19 = vrot.slane %v8274_v17, %v7612_v37 }
0x1f26   :  { %v7277_v42 = vpop.eup %7276 }
0x1f27   :  { %v2741_v12 = vmul.f32 %v7277_v42, %v2721_v41 }
0x1f2a   :  { %v7279_v59 = vpop.eup %7278 }
0x1f2b   :  { %v2742_v3 = vmul.f32 %v7279_v59, %v2724_v62 }
0x1f2d   :  { %v2743_v45 = vpack.c.bf16 %v2742_v3, %v2741_v12 }
0x1f2f   :  { %6728 = vmatmul.mubr.bf16.vlgmr.msra.gmra.mxu1 %v2743_v45 }
0x1f30   :  { %6761 = vmatprep.mubr.msk.bf16.mxu1 %vm7427_vm1, %v7426_v0 }
0x1fef   :  { %v2847_v43 = vpop.f32.mrf.mxu1 }
0x1ff0   :  { %v2848_v22 = vadd.f32 %v6105_v47, %v2847_v43  ;;  %v3034_v43 = vrot.slane %v8274_v17, %v7587_v10 }
0x1ff1   :  { %v6729_v21 = vpop.f32.mrf.mxu1 }
0x1ff2   :  { %v2854_v27 = vadd.f32 %v2848_v22, %v8146_v8  ;;  %v2943_v8 = vld [vmem:[%s8915_s11 + $0x8] sm:$0xff] }
0x1ff3   :  { %v2850_v24 = vpop.f32.mrf.mxu1 }
0x1ff4   :  { %v2851_v25 = vadd.f32 %v6105_v47, %v2850_v24 }
0x1ff5   :  { %v6730_v26 = vpop.f32.mrf.mxu1 }
0x1ff6   :  { %v2855_v6 = vadd.f32 %v2851_v25, %v8151_v33  ;;  %v2944_v33 = vpack.c.bf16 %v2943_v8, %v2942_v30  ;;  %v3040_v25 = vrot.slane %v8274_v17, %v7625_v49 }
0x1ff8   :  { %v2856_v29 = vpack.c.bf16 %v2855_v6, %v2854_v27 }
0x1ffa   :  { %6736 = vmatmul.mubr.msk.bf16.vlgmr.msra.gmra.mxu0 %vm150_vm4, %v2856_v29 }
0x1ffb   :  { %6740 = vmatpush3.bf16.msra.mxu0 %v7153_v61  ;;  %6741 = vmatprep.mubr.msk.bf16.mxu0 %vm7427_vm1, %v7426_v0 }
0x1ffc   :  { %6745 = vmatprep.subr.bf16.mxu0 %v7426_v0 }
0x2002   :  { %6742 = vmatmul.mubr.msk.bf16.vlgmr.msra.gmra.mxu0 %vm1193_vm7, %v2944_v33 }
0x2003   :  { %6749 = vmatprep.mubr.msk.bf16.mxu0 %vm7427_vm1, %v7426_v0  ;;  %6746 = vmatpush3.bf16.msra.mxu0 %v7154_v14 }
0x2004   :  { %6747 = vmatprep.subr.bf16.mxu0 %v7426_v0 }
0x2007   :  { %6748 = vmatpush3.bf16.msra.mxu0 %v7155_v16 }
0x2008   :  { %6753 = vmatprep.subr.bf16.mxu0 %v7426_v0 }
0x20ba   :  { %v8240_v31 = vpop.f32.mrf.mxu0 }
0x20bc   :  { %v6737_v39 = vpop.f32.mrf.mxu0 }
0x20be   :  { %v8248_v40 = vpop.f32.mrf.mxu0 }
0x20c0   :  { %v6738_v23 = vpop.f32.mrf.mxu0 }
0x20c2   :  { %v2994_v48 = vpop.f32.mrf.mxu0 }
0x20c3   :  { %v2995_v50 = vadd.f32 %v2994_v48, %v2950_v18 }
0x20c4   :  { %v6743_v60 = vpop.f32.mrf.mxu0 }
0x20c5   :  { %v8252_v34 = vadd.f32 %v2995_v50, %v2940_v15 }
0x20c6   :  { %v2997_v51 = vpop.f32.mrf.mxu0 }
0x20c7   :  { %v2998_v32 = vadd.f32 %v2997_v51, %v2950_v18  ;;  %v3005_v53 = vsel %vm150_vm4, %v8252_v34, 0.0  ;;  %v3107_v18 = vrot.slane %v8274_v17, %v7641_v4 }
0x20c8   :  { %3006 = vadd.xlane.f32.xlu0 %v3005_v53  ;;  %v6744_v54 = vpop.f32.mrf.mxu0 }
0x20c9   :  { %v8256_v55 = vadd.f32 %v2998_v32, %v2940_v15 }
0x20cb   :  { %v3008_v56 = vsel %vm150_vm4, %v8256_v55, 0.0 }
0x20cc   :  { %3009 = vadd.xlane.f32.xlu1 %v3008_v56 }
0x2151   :  { %v3007_v57 = vpop.xlane.xlu0 %3006 }
0x2152   :  { %v3011_v41 = vmul.f32 0.03125, %v3007_v57 }
0x2154   :  { %v3013_v58 = vsub.f32 %v8252_v34, %v3011_v41 }
0x2155   :  { %v3010_v63 = vpop.xlane.xlu1 %3009 }
0x2156   :  { %v3012_v1 = vmul.f32 0.03125, %v3010_v63  ;;  %v3015_v7 = vmul.f32 %v3013_v58, %v3013_v58 }
0x2158   :  { %v3014_v62 = vsub.f32 %v8256_v55, %v3012_v1  ;;  %v3017_v9 = vsel %vm150_vm4, %v3015_v7, 0.0 }
0x2159   :  { %3018 = vadd.xlane.f32.xlu0 %v3017_v9 }
0x215a   :  { %v3016_v38 = vmul.f32 %v3014_v62, %v3014_v62 }
0x215c   :  { %v3020_v5 = vsel %vm150_vm4, %v3016_v38, 0.0  ;;  %v3123_v38 = vrot.slane %v8274_v17, %v7664_v28 }
0x215d   :  { %3021 = vadd.xlane.f32.xlu1 %v3020_v5 }
0x216f   :  { %3115 = vrot.lane.b32.xlu0 %v3113_v19, %s8987_s8 }
0x21e2   :  { %v3019_v42 = vpop.xlane.xlu0 %3018 }
0x21e3   :  { %v3023_v59 = vmul.f32 0.03125, %v3019_v42 }
0x21e5   :  { %v3025_v12 = vadd.f32 1e-05, %v3023_v59 }
0x21e6   :  { %v3022_v3 = vpop.xlane.xlu1 %3021  ;;  %v3116_v29 = vpop.permute.xlu0 %3115 }
0x21e7   :  { %7280 = vrsqrt.f32 %v3025_v12  ;;  %v3024_v45 = vmul.f32 0.03125, %v3022_v3 }
0x21e9   :  { %v3026_v46 = vadd.f32 1e-05, %v3024_v45 }
0x21eb   :  { %7282 = vrsqrt.f32 %v3026_v46 }
0x21f4   :  { %v7281_v20 = vpop.eup %7280 }
0x21f5   :  { %v3029_v47 = vmul.f32 %v7281_v20, %v3013_v58 }
0x21f7   :  { %v3035_v24 = vmul.f32 %v3034_v43, %v3029_v47 }
0x21f8   :  { %v7283_v21 = vpop.eup %7282 }
0x21f9   :  { %v3030_v22 = vmul.f32 %v7283_v21, %v3014_v62  ;;  %v3041_v27 = vadd.f32 %v3040_v25, %v3035_v24 }
0x21fb   :  { %v3036_v26 = vmul.f32 %v3034_v43, %v3030_v22 }
0x21fd   :  { %v3042_v6 = vadd.f32 %v3040_v25, %v3036_v26 }
0x21ff   :  { %v3043_v61 = vpack.c.bf16 %v3042_v6, %v3041_v27 }
0x2201   :  { %6750 = vmatmul.mubr.msk.bf16.vlgmr.msra.gmra.mxu0 %vm150_vm4, %v3043_v61 }
0x2202   :  { %6755 = vmatprep.mubr.msk.bf16.mxu0 %vm7427_vm1, %v7426_v0 }
0x22c1   :  { %v3097_v30 = vpop.f32.mrf.mxu0 }
0x22c2   :  { %v3118_v8 = vadd.f32 %v3116_v29, %v3097_v30  ;;  %v3108_v48 = vadd.f32 %v3107_v18, %v3097_v30 }
0x22c3   :  { %v6751_v33 = vpop.f32.mrf.mxu0 }
0x22c4   :  { %v8287_v44 = vpack.c.bf16 %v3118_v8, %v3118_v8  ;;  %v8300_v51 = vpack.c.bf16 %v3108_v48, %v3108_v48 }
0x22c5   :  { %v3100_v36 = vpop.f32.mrf.mxu0 }
0x22c6   :  { %v3119_v39 = vadd.f32 %v3116_v29, %v3100_v36  ;;  %3137 = vrot.lane.b32.xlu1 %v8287_v44, %s8988_s10  ;;  %v3109_v32 = vadd.f32 %v3107_v18, %v3100_v36 }
0x22c7   :  { %v6752_v35 = vpop.f32.mrf.mxu0 }
0x22c8   :  { %v8291_v2 = vpack.c.bf16 %v3119_v39, %v3119_v39  ;;  %v8307_v53 = vpack.c.bf16 %v3109_v32, %v3109_v32 }
0x22ca   :  { %3186 = vrot.lane.b32.xlu1 %v8291_v2, %s8988_s10 }
0x2338   :  { %v3138_v23 = vpop.permute.xlu1 %3137 }
0x2339   :  { %v3143_v15 = vsel %vm286_vm5, %v3138_v23, 0 }
0x233a   :  { %6754 = vmatpush3.bf16.xpose.msra.mxu0 %v3143_v15 }
0x233b   :  { %6765 = vmatprep.subr.bf16.mxu0 %v7426_v0 }
0x233c   :  { %v3187_v50 = vpop.permute.xlu1 %3186 }
0x233d   :  { %v3192_v60 = vsel %vm286_vm5, %v3187_v50, 0 }
0x233e   :  { %6760 = vmatpush3.bf16.xpose.msra.mxu1 %v3192_v60 }
0x233f   :  { %6771 = vmatprep.subr.bf16.mxu1 %v7426_v0 }
0x2341   :  { %6756 = vmatmul.mubr.msk.bf16.vlgmr.msra.gmra.mxu0 %vm286_vm5, %v8300_v51 }
0x2342   :  { %6767 = vmatprep.mubr.msk.bf16.mxu0 %vm7427_vm1, %v7426_v0 }
0x2345   :  { %6762 = vmatmul.mubr.msk.bf16.vlgmr.msra.gmra.mxu1 %vm286_vm5, %v8307_v53 }
0x2346   :  { %6773 = vmatprep.mubr.msk.bf16.mxu1 %vm7427_vm1, %v7426_v0 }
0x2401   :  { %v3179_v54 = vpop.f32.mrf.mxu0 }
0x2402   :  { %v3234_v56 = vsel %vm286_vm5, %v3179_v54, -inf }
0x2403   :  { %3235 = vmax.xlane.f32.xlu1 %v3234_v56  ;;  %v6757_v57 = vpop.f32.mrf.mxu0 }
0x2405   :  { %v3182_v41 = vpop.f32.mrf.mxu0  ;;  %v3228_v58 = vpop.f32.mrf.mxu1 }
0x2406   :  { %v3237_v63 = vsel %vm286_vm5, %v3228_v58, -inf }
0x2407   :  { %v6758_v1 = vpop.f32.mrf.mxu0  ;;  %3238 = vmax.xlane.f32.xlu0 %v3237_v63  ;;  %v6763_v7 = vpop.f32.mrf.mxu1 }
0x2409   :  { %v3231_v62 = vpop.f32.mrf.mxu1 }
0x240b   :  { %v6764_v9 = vpop.f32.mrf.mxu1 }
0x241d   :  { %3125 = vrot.lane.b32.xlu0 %v3123_v38, %s8989_s23 }
0x248c   :  { %v3236_v12 = vpop.xlane.xlu1 %3235 }
0x248d   :  { %v3240_v3 = vsub.f32 %v3179_v54, %v3236_v12 }
0x248f   :  { %v3242_v45 = vmul.f32 1.442695, %v3240_v3 }
0x2490   :  { %v3239_v5 = vpop.xlane.xlu0 %3238 }
0x2491   :  { %v3241_v46 = vsub.f32 %v3228_v58, %v3239_v5  ;;  %7284 = vpow2.f32 %v3242_v45 }
0x2493   :  { %v3244_v20 = vmul.f32 1.442695, %v3241_v46 }
0x2494   :  { %v3126_v14 = vpop.permute.xlu0 %3125 }
0x2495   :  { %v3128_v16 = vadd.f32 %v3126_v14, %v3097_v30  ;;  %v3129_v19 = vadd.f32 %v3126_v14, %v3100_v36  ;;  %7286 = vpow2.f32 %v3244_v20 }
0x2497   :  { %v8318_v42 = vpack.c.bf16 %v3128_v16, %v3128_v16  ;;  %v8320_v59 = vpack.c.bf16 %v3129_v19, %v3129_v19 }
0x2499   :  { %3308 = vrot.lane.b32.xlu0 %v8320_v59, %s8989_s23  ;;  %3259 = vrot.lane.b32.xlu1 %v8318_v42, %s8989_s23 }
0x249d   :  { %3359 = vrot.lane.b32.xlu0 %v8287_v44, %s8990_s7 }
0x249e   :  { %v7285_v47 = vpop.eup %7284 }
0x249f   :  { %v3246_v43 = vsel %vm286_vm5, %v7285_v47, 0.0 }
0x24a1   :  { %3357 = vrot.lane.b32.xlu0 %v8300_v51, %s8991_s12 }
0x24a2   :  { %v7287_v21 = vpop.eup %7286 }
0x24a3   :  { %v3249_v22 = vsel %vm286_vm5, %v7287_v21, 0.0 }
0x24bd   :  { %3247 = vadd.xlane.f32.xlu1 %v3246_v43 }
0x24c1   :  { %3250 = vadd.xlane.f32.xlu1 %v3249_v22 }
0x24d2   :  { %3410 = vrot.lane.b32.xlu1 %v8291_v2, %s8990_s7 }
0x24d6   :  { %3408 = vrot.lane.b32.xlu1 %v8307_v53, %s8991_s12 }
0x250b   :  { %v3309_v24 = vpop.permute.xlu0 %3308  ;;  %v3260_v25 = vpop.permute.xlu1 %3259 }
0x250c   :  { %v3314_v26 = vsel %vm412_vm6, %v3309_v24, 0  ;;  %v3265_v27 = vsel %vm412_vm6, %v3260_v25, 0 }
0x250d   :  { %6766 = vmatpush3.bf16.msra.mxu0 %v3265_v27  ;;  %6772 = vmatpush3.bf16.msra.mxu1 %v3314_v26 }
0x250e   :  { %6777 = vmatprep.subr.bf16.mxu0 %v7426_v0  ;;  %6783 = vmatprep.subr.bf16.mxu1 %v7426_v0 }
0x250f   :  { %v3360_v8 = vpop.permute.xlu0 %3359 }
0x2510   :  { %v3365_v39 = vsel %vm286_vm5, %v3360_v8, 0 }
0x2513   :  { %v3358_v48 = vpop.permute.xlu0 %3357 }
0x2546   :  { %v3248_v6 = vpop.xlane.xlu1 %3247 }
0x2547   :  { %7288 = vrcp.f32 %v3248_v6 }
0x254a   :  { %v3251_v61 = vpop.xlane.xlu1 %3250 }
0x254b   :  { %7290 = vrcp.f32 %v3251_v61 }
0x254e   :  { %v3411_v18 = vpop.permute.xlu1 %3410 }
0x254f   :  { %v3416_v15 = vsel %vm286_vm5, %v3411_v18, 0 }
0x2552   :  { %v3409_v50 = vpop.permute.xlu1 %3408 }
0x2554   :  { %v7289_v29 = vpop.eup %7288 }
0x2555   :  { %v3254_v30 = vmul.f32 %v7289_v29, %v7285_v47 }
0x2557   :  { %v3256_v33 = vpack.c.bf16 %v3254_v30, %v3254_v30 }
0x2558   :  { %v7291_v36 = vpop.eup %7290 }
0x2559   :  { %6768 = vmatmul.mubr.msk.bf16.vlgmr.msra.gmra.mxu0 %vm286_vm5, %v3256_v33  ;;  %v3255_v35 = vmul.f32 %v7291_v36, %v7287_v21 }
0x255a   :  { %6778 = vmatpush3.bf16.xpose.msra.mxu0 %v3365_v39  ;;  %6779 = vmatprep.mubr.msk.bf16.mxu0 %vm7427_vm1, %v7426_v0 }
0x255b   :  { %v3257_v23 = vpack.c.bf16 %v3255_v35, %v3255_v35  ;;  %6789 = vmatprep.subr.bf16.mxu0 %v7426_v0 }
0x255d   :  { %6774 = vmatmul.mubr.msk.bf16.vlgmr.msra.gmra.mxu1 %vm286_vm5, %v3257_v23 }
0x255e   :  { %6784 = vmatpush3.bf16.xpose.msra.mxu1 %v3416_v15  ;;  %6785 = vmatprep.mubr.msk.bf16.mxu1 %vm7427_vm1, %v7426_v0 }
0x255f   :  { %6795 = vmatprep.subr.bf16.mxu1 %v7426_v0 }
0x2561   :  { %6780 = vmatmul.mubr.msk.bf16.vlgmr.msra.gmra.mxu0 %vm286_vm5, %v3358_v48 }
0x2562   :  { %6791 = vmatprep.mubr.msk.bf16.mxu0 %vm7427_vm1, %v7426_v0 }
0x2565   :  { %6786 = vmatmul.mubr.msk.bf16.vlgmr.msra.gmra.mxu1 %vm286_vm5, %v3409_v50 }
0x2566   :  { %6797 = vmatprep.mubr.msk.bf16.mxu1 %vm7427_vm1, %v7426_v0 }
0x2619   :  { %v8356_v60 = vpop.f32.mrf.mxu0 }
0x261b   :  { %v6769_v32 = vpop.f32.mrf.mxu0 }
0x261d   :  { %v3304_v54 = vpop.f32.mrf.mxu0  ;;  %v8358_v56 = vpop.f32.mrf.mxu1 }
0x261f   :  { %v6770_v57 = vpop.f32.mrf.mxu0  ;;  %v6775_v41 = vpop.f32.mrf.mxu1 }
0x2621   :  { %v3353_v58 = vpop.f32.mrf.mxu1  ;;  %v3401_v63 = vpop.f32.mrf.mxu0 }
0x2622   :  { %v3458_v1 = vsel %vm286_vm5, %v3401_v63, -inf }
0x2623   :  { %3459 = vmax.xlane.f32.xlu0 %v3458_v1  ;;  %v6776_v7 = vpop.f32.mrf.mxu1  ;;  %v6781_v62 = vpop.f32.mrf.mxu0 }
0x2625   :  { %v3404_v9 = vpop.f32.mrf.mxu0  ;;  %v3452_v38 = vpop.f32.mrf.mxu1 }
0x2626   :  { %v3461_v5 = vsel %vm286_vm5, %v3452_v38, -inf }
0x2627   :  { %v6782_v14 = vpop.f32.mrf.mxu0  ;;  %3462 = vmax.xlane.f32.xlu1 %v3461_v5  ;;  %v6787_v16 = vpop.f32.mrf.mxu1 }
0x2629   :  { %v3455_v19 = vpop.f32.mrf.mxu1 }
0x262b   :  { %v6788_v12 = vpop.f32.mrf.mxu1 }
0x2638   :  { %3530 = vrot.lane.b32.xlu1 %v8320_v59, %s8977_s3 }
0x263c   :  { %3580 = vrot.lane.b32.xlu1 %v8287_v44, %s8978_s26 }
0x2640   :  { %3630 = vrot.lane.b32.xlu1 %v8291_v2, %s8978_s26 }
0x2644   :  { %3628 = vrot.lane.b32.xlu1 %v8307_v53, %s8979_s6 }
0x26ac   :  { %v3460_v3 = vpop.xlane.xlu0 %3459 }
0x26ad   :  { %v3464_v45 = vsub.f32 %v3401_v63, %v3460_v3 }
0x26af   :  { %v3466_v46 = vmul.f32 1.442695, %v3464_v45 }
0x26b0   :  { %v3463_v20 = vpop.xlane.xlu1 %3462 }
0x26b1   :  { %7292 = vpow2.f32 %v3466_v46  ;;  %v3465_v47 = vsub.f32 %v3452_v38, %v3463_v20 }
0x26b3   :  { %v3468_v43 = vmul.f32 1.442695, %v3465_v47 }
0x26b4   :  { %v3531_v21 = vpop.permute.xlu1 %3530 }
0x26b5   :  { %7294 = vpow2.f32 %v3468_v43  ;;  %v3536_v22 = vsel %vm412_vm6, %v3531_v21, 0 }
0x26b6   :  { %6796 = vmatpush3.bf16.msra.mxu1 %v3536_v22 }
0x26b7   :  { %6807 = vmatprep.subr.bf16.mxu1 %v7426_v0 }
0x26b8   :  { %v3581_v33 = vpop.permute.xlu1 %3580 }
0x26b9   :  { %v3586_v18 = vsel %vm286_vm5, %v3581_v33, 0 }
0x26bc   :  { %v3631_v15 = vpop.permute.xlu1 %3630 }
0x26bd   :  { %v3636_v50 = vsel %vm286_vm5, %v3631_v15, 0 }
0x26be   :  { %v7293_v24 = vpop.eup %7292 }
0x26bf   :  { %v3470_v25 = vsel %vm286_vm5, %v7293_v24, 0.0 }
0x26c0   :  { %3471 = vadd.xlane.f32.xlu0 %v3470_v25  ;;  %v3629_v54 = vpop.permute.xlu1 %3628 }
0x26c2   :  { %v7295_v26 = vpop.eup %7294 }
0x26c3   :  { %v3473_v27 = vsel %vm286_vm5, %v7295_v26, 0.0 }
0x26c4   :  { %3474 = vadd.xlane.f32.xlu0 %v3473_v27 }
0x26da   :  { %3482 = vrot.lane.b32.xlu0 %v8318_v42, %s8977_s3 }
0x26de   :  { %3578 = vrot.lane.b32.xlu0 %v8300_v51, %s8979_s6 }
0x2749   :  { %v3472_v6 = vpop.xlane.xlu0 %3471 }
0x274a   :  { %7296 = vrcp.f32 %v3472_v6 }
0x274d   :  { %v3475_v61 = vpop.xlane.xlu0 %3474 }
0x274e   :  { %7298 = vrcp.f32 %v3475_v61 }
0x2751   :  { %v3483_v29 = vpop.permute.xlu0 %3482 }
0x2752   :  { %v3488_v30 = vsel %vm412_vm6, %v3483_v29, 0 }
0x2753   :  { %6790 = vmatpush3.bf16.msra.mxu0 %v3488_v30 }
0x2754   :  { %6801 = vmatprep.subr.bf16.mxu0 %v7426_v0 }
0x2755   :  { %v3579_v32 = vpop.permute.xlu0 %3578 }
0x2757   :  { %v7297_v8 = vpop.eup %7296 }
0x2758   :  { %v3478_v36 = vmul.f32 %v7297_v8, %v7293_v24 }
0x275a   :  { %v3480_v39 = vpack.c.bf16 %v3478_v36, %v3478_v36 }
0x275b   :  { %v7299_v35 = vpop.eup %7298 }
0x275c   :  { %6792 = vmatmul.mubr.msk.bf16.vlgmr.msra.gmra.mxu0 %vm286_vm5, %v3480_v39  ;;  %v3479_v23 = vmul.f32 %v7299_v35, %v7295_v26 }
0x275d   :  { %6802 = vmatpush3.bf16.xpose.msra.mxu0 %v3586_v18  ;;  %6803 = vmatprep.mubr.msk.bf16.mxu0 %vm7427_vm1, %v7426_v0 }
0x275e   :  { %v3481_v48 = vpack.c.bf16 %v3479_v23, %v3479_v23  ;;  %6813 = vmatprep.subr.bf16.mxu0 %v7426_v0 }
0x2760   :  { %6798 = vmatmul.mubr.msk.bf16.vlgmr.msra.gmra.mxu1 %vm286_vm5, %v3481_v48 }
0x2761   :  { %6808 = vmatpush3.bf16.xpose.msra.mxu1 %v3636_v50  ;;  %6809 = vmatprep.mubr.msk.bf16.mxu1 %vm7427_vm1, %v7426_v0 }
0x2762   :  { %6819 = vmatprep.subr.bf16.mxu1 %v7426_v0 }
0x2764   :  { %6804 = vmatmul.mubr.msk.bf16.vlgmr.msra.gmra.mxu0 %vm286_vm5, %v3579_v32 }
0x2765   :  { %6815 = vmatprep.mubr.msk.bf16.mxu0 %vm7427_vm1, %v7426_v0 }
0x2768   :  { %6810 = vmatmul.mubr.msk.bf16.vlgmr.msra.gmra.mxu1 %vm286_vm5, %v3629_v54 }
0x2769   :  { %6821 = vmatprep.mubr.msk.bf16.mxu1 %vm7427_vm1, %v7426_v0 }
0x281c   :  { %v8396_v57 = vpop.f32.mrf.mxu0 }
0x281e   :  { %v6793_v41 = vpop.f32.mrf.mxu0 }
0x2820   :  { %v3527_v58 = vpop.f32.mrf.mxu0  ;;  %v8398_v63 = vpop.f32.mrf.mxu1 }
0x2821   :  { %v7092_v1 = vpack.i.bf16 %v8398_v63, %v8396_v57 }
0x2822   :  { %v6794_v7 = vpop.f32.mrf.mxu0  ;;  %v6799_v62 = vpop.f32.mrf.mxu1 }
0x2824   :  { %v3575_v9 = vpop.f32.mrf.mxu1  ;;  %v3622_v38 = vpop.f32.mrf.mxu0 }
0x2825   :  { %v3678_v5 = vsel %vm286_vm5, %v3622_v38, -inf }
0x2826   :  { %3679 = vmax.xlane.f32.xlu0 %v3678_v5  ;;  %v6800_v14 = vpop.f32.mrf.mxu1  ;;  %v6805_v16 = vpop.f32.mrf.mxu0 }
0x2828   :  { %v3625_v19 = vpop.f32.mrf.mxu0  ;;  %v3672_v12 = vpop.f32.mrf.mxu1 }
0x2829   :  { %v3681_v3 = vsel %vm286_vm5, %v3672_v12, -inf }
0x282a   :  { %v6806_v45 = vpop.f32.mrf.mxu0  ;;  %3682 = vmax.xlane.f32.xlu1 %v3681_v3  ;;  %v6811_v46 = vpop.f32.mrf.mxu1 }
0x282c   :  { %v3675_v20 = vpop.f32.mrf.mxu1 }
0x282e   :  { %v6812_v47 = vpop.f32.mrf.mxu1 }
0x283b   :  { %3750 = vrot.lane.b32.xlu1 %v8320_v59, %s8980_s2 }
0x283f   :  { %3800 = vrot.lane.b32.xlu1 %v8287_v44, %s8981_s27 }
0x2843   :  { %3850 = vrot.lane.b32.xlu1 %v8291_v2, %s8981_s27 }
0x2847   :  { %3848 = vrot.lane.b32.xlu1 %v8307_v53, %s8982_s28 }
0x28af   :  { %v3680_v43 = vpop.xlane.xlu0 %3679 }
0x28b0   :  { %v3684_v21 = vsub.f32 %v3622_v38, %v3680_v43 }
0x28b2   :  { %v3686_v22 = vmul.f32 1.442695, %v3684_v21 }
0x28b3   :  { %v3683_v24 = vpop.xlane.xlu1 %3682 }
0x28b4   :  { %7300 = vpow2.f32 %v3686_v22  ;;  %v3685_v25 = vsub.f32 %v3672_v12, %v3683_v24 }
0x28b6   :  { %v3688_v26 = vmul.f32 1.442695, %v3685_v25 }
0x28b7   :  { %v3751_v27 = vpop.permute.xlu1 %3750 }
0x28b8   :  { %7302 = vpow2.f32 %v3688_v26  ;;  %v3756_v6 = vsel %vm412_vm6, %v3751_v27, 0 }
0x28b9   :  { %6820 = vmatpush3.bf16.msra.mxu1 %v3756_v6 }
0x28ba   :  { %6831 = vmatprep.subr.bf16.mxu1 %v7426_v0 }
0x28bb   :  { %v3801_v39 = vpop.permute.xlu1 %3800 }
0x28bc   :  { %v3806_v15 = vsel %vm286_vm5, %v3801_v39, 0 }
0x28bf   :  { %v3851_v48 = vpop.permute.xlu1 %3850 }
0x28c0   :  { %v3856_v32 = vsel %vm286_vm5, %v3851_v48, 0 }
0x28c1   :  { %v7301_v44 = vpop.eup %7300 }
0x28c2   :  { %v3690_v2 = vsel %vm286_vm5, %v7301_v44, 0.0 }
0x28c3   :  { %3691 = vadd.xlane.f32.xlu0 %v3690_v2  ;;  %v3849_v41 = vpop.permute.xlu1 %3848 }
0x28c5   :  { %v7303_v61 = vpop.eup %7302 }
0x28c6   :  { %v3693_v53 = vsel %vm286_vm5, %v7303_v61, 0.0 }
0x28c7   :  { %3694 = vadd.xlane.f32.xlu0 %v3693_v53 }
0x28dd   :  { %3702 = vrot.lane.b32.xlu0 %v8318_v42, %s8980_s2 }
0x28e1   :  { %3798 = vrot.lane.b32.xlu0 %v8300_v51, %s8982_s28 }
0x294c   :  { %v3692_v29 = vpop.xlane.xlu0 %3691 }
0x294d   :  { %7304 = vrcp.f32 %v3692_v29 }
0x2950   :  { %v3695_v30 = vpop.xlane.xlu0 %3694 }
0x2951   :  { %7306 = vrcp.f32 %v3695_v30 }
0x2954   :  { %v3703_v8 = vpop.permute.xlu0 %3702 }
0x2955   :  { %v3708_v33 = vsel %vm412_vm6, %v3703_v8, 0 }
0x2956   :  { %6814 = vmatpush3.bf16.msra.mxu0 %v3708_v33 }
0x2957   :  { %6825 = vmatprep.subr.bf16.mxu0 %v7426_v0 }
0x2958   :  { %v3799_v54 = vpop.permute.xlu0 %3798 }
0x295a   :  { %v7305_v36 = vpop.eup %7304 }
0x295b   :  { %v3698_v35 = vmul.f32 %v7305_v36, %v7301_v44 }
0x295d   :  { %v3700_v18 = vpack.c.bf16 %v3698_v35, %v3698_v35 }
0x295e   :  { %v7307_v23 = vpop.eup %7306 }
0x295f   :  { %6816 = vmatmul.mubr.msk.bf16.vlgmr.msra.gmra.mxu0 %vm286_vm5, %v3700_v18  ;;  %v3699_v51 = vmul.f32 %v7307_v23, %v7303_v61 }
0x2960   :  { %6826 = vmatpush3.bf16.xpose.msra.mxu0 %v3806_v15  ;;  %6827 = vmatprep.mubr.msk.bf16.mxu0 %vm7427_vm1, %v7426_v0  ;;  %v7156_v15 = vld [vmem:[%s8919_s15 + $0x8] sm:$0xff]  }
0x2961   :  { %v3701_v50 = vpack.c.bf16 %v3699_v51, %v3699_v51  ;;  %6837 = vmatprep.subr.bf16.mxu0 %v7426_v0  ;;  %v7157_v51 = vld [vmem:[%s8919_s15] sm:$0xff]  }
0x2963   :  { %6822 = vmatmul.mubr.msk.bf16.vlgmr.msra.gmra.mxu1 %vm286_vm5, %v3701_v50 }
0x2964   :  { %6832 = vmatpush3.bf16.xpose.msra.mxu1 %v3856_v32  ;;  %6833 = vmatprep.mubr.msk.bf16.mxu1 %vm7427_vm1, %v7426_v0 }
0x2965   :  { %6843 = vmatprep.subr.bf16.mxu1 %v7426_v0 }
0x2967   :  { %6828 = vmatmul.mubr.msk.bf16.vlgmr.msra.gmra.mxu0 %vm286_vm5, %v3799_v54 }
0x2968   :  { %6839 = vmatprep.mubr.msk.bf16.mxu0 %vm7427_vm1, %v7426_v0 }
0x296b   :  { %6834 = vmatmul.mubr.msk.bf16.vlgmr.msra.gmra.mxu1 %vm286_vm5, %v3849_v41 }
0x296c   :  { %6845 = vmatprep.mubr.msk.bf16.mxu1 %vm7427_vm1, %v7426_v0 }
0x2a1f   :  { %v3744_v58 = vpop.f32.mrf.mxu0 }
0x2a21   :  { %v6817_v7 = vpop.f32.mrf.mxu0 }
0x2a23   :  { %v3747_v62 = vpop.f32.mrf.mxu0  ;;  %v3792_v9 = vpop.f32.mrf.mxu1 }
0x2a24   :  { %v7097_v24 = vpack.i.bf16 %v3792_v9, %v3744_v58 }
0x2a25   :  { %v6818_v38 = vpop.f32.mrf.mxu0  ;;  %v6823_v5 = vpop.f32.mrf.mxu1 }
0x2a27   :  { %v3795_v14 = vpop.f32.mrf.mxu1  ;;  %v3842_v16 = vpop.f32.mrf.mxu0 }
0x2a28   :  { %v3898_v19 = vsel %vm286_vm5, %v3842_v16, -inf }
0x2a29   :  { %3899 = vmax.xlane.f32.xlu0 %v3898_v19  ;;  %v6824_v12 = vpop.f32.mrf.mxu1  ;;  %v6829_v3 = vpop.f32.mrf.mxu0 }
0x2a2b   :  { %v3845_v45 = vpop.f32.mrf.mxu0  ;;  %v3892_v46 = vpop.f32.mrf.mxu1 }
0x2a2c   :  { %v3901_v20 = vsel %vm286_vm5, %v3892_v46, -inf }
0x2a2d   :  { %v6830_v47 = vpop.f32.mrf.mxu0  ;;  %3902 = vmax.xlane.f32.xlu1 %v3901_v20  ;;  %v6835_v43 = vpop.f32.mrf.mxu1 }
0x2a2f   :  { %v3895_v21 = vpop.f32.mrf.mxu1 }
0x2a31   :  { %v6836_v22 = vpop.f32.mrf.mxu1 }
0x2a3e   :  { %3970 = vrot.lane.b32.xlu1 %v8320_v59, %s8983_s4 }
0x2a42   :  { %7093 = vrot.lane.b32.xlu1 %v7092_v1, %s8984_s25 }
0x2a46   :  { %7098 = vrot.lane.b32.xlu1 %v7097_v24, %s8985_s24 }
0x2ab2   :  { %v3900_v25 = vpop.xlane.xlu0 %3899 }
0x2ab3   :  { %v3904_v26 = vsub.f32 %v3842_v16, %v3900_v25 }
0x2ab5   :  { %v3906_v27 = vmul.f32 1.442695, %v3904_v26 }
0x2ab6   :  { %v3903_v6 = vpop.xlane.xlu1 %3902 }
0x2ab7   :  { %7308 = vpow2.f32 %v3906_v27  ;;  %v3905_v44 = vsub.f32 %v3892_v46, %v3903_v6 }
0x2ab9   :  { %v3908_v2 = vmul.f32 1.442695, %v3905_v44 }
0x2aba   :  { %v3971_v61 = vpop.permute.xlu1 %3970 }
0x2abb   :  { %7310 = vpow2.f32 %v3908_v2  ;;  %v3976_v53 = vsel %vm412_vm6, %v3971_v61, 0 }
0x2abc   :  { %6844 = vmatpush3.bf16.msra.mxu1 %v3976_v53 }
0x2abd   :  { %6857 = vmatprep.subr.bf16.mxu1 %v7426_v0 }
0x2abe   :  { %v7094_v38 = vpop.permute.xlu1 %7093 }
0x2abf   :  { %v7096_v14 = vunpack.i.h.bf16 %v7094_v38  ;;  %v7095_v16 = vunpack.i.l.bf16 %v7094_v38 }
0x2ac1   :  { %v4043_v45 = vsel %vm286_vm5, %v8358_v56, %v7096_v14  ;;  %v4042_v46 = vsel %vm286_vm5, %v8356_v60, %v7095_v16  ;;  %v4114_v56 = vrot.slane %v8274_v17, %v7833_v11 }
0x2ac2   :  { %v7099_v5 = vpop.permute.xlu1 %7098 }
0x2ac3   :  { %v7101_v19 = vunpack.i.h.bf16 %v7099_v5  ;;  %v7100_v12 = vunpack.i.l.bf16 %v7099_v5 }
0x2ac4   :  { %v7309_v59 = vpop.eup %7308 }
0x2ac5   :  { %v3910_v57 = vsel %vm286_vm5, %v7309_v59, 0.0  ;;  %v4044_v43 = vsel %vm1193_vm7, %v4042_v46, %v7100_v12  ;;  %v4045_v21 = vsel %vm1193_vm7, %v4043_v45, %v7101_v19  ;;  %v7160_v19 = vld [vmem:[%s8921_s17 + $0x38] sm:$0xff]   ;;  %v7162_v12 = vld [vmem:[%s8921_s17 + $0x28] sm:$0xff]   ;;  %v7165_v46 = vld [vmem:[%s8921_s17 + $0x10] sm:$0xff]  }
0x2ac6   :  { %3911 = vadd.xlane.f32.xlu0 %v3910_v57  ;;  %v7164_v45 = vld [vmem:[%s8921_s17 + $0x18] sm:$0xff]  }
0x2ac8   :  { %v7311_v63 = vpop.eup %7310 }
0x2ac9   :  { %v3913_v1 = vsel %vm286_vm5, %v7311_v63, 0.0 }
0x2aca   :  { %3914 = vadd.xlane.f32.xlu0 %v3913_v1 }
0x2ae0   :  { %3922 = vrot.lane.b32.xlu0 %v8318_v42, %s8983_s4 }
0x2b4f   :  { %v3912_v29 = vpop.xlane.xlu0 %3911 }
0x2b50   :  { %7312 = vrcp.f32 %v3912_v29 }
0x2b53   :  { %v3915_v30 = vpop.xlane.xlu0 %3914 }
0x2b54   :  { %7314 = vrcp.f32 %v3915_v30 }
0x2b57   :  { %v3923_v8 = vpop.permute.xlu0 %3922 }
0x2b58   :  { %v3928_v33 = vsel %vm412_vm6, %v3923_v8, 0 }
0x2b59   :  { %6838 = vmatpush3.bf16.msra.mxu0 %v3928_v33 }
0x2b5a   :  { %6849 = vmatprep.subr.bf16.mxu0 %v7426_v0 }
0x2b5d   :  { %v7313_v36 = vpop.eup %7312 }
0x2b5e   :  { %v3918_v39 = vmul.f32 %v7313_v36, %v7309_v59 }
0x2b60   :  { %v3920_v35 = vpack.c.bf16 %v3918_v39, %v3918_v39 }
0x2b61   :  { %v7315_v18 = vpop.eup %7314 }
0x2b62   :  { %v3919_v23 = vmul.f32 %v7315_v18, %v7311_v63  ;;  %6840 = vmatmul.mubr.msk.bf16.vlgmr.msra.gmra.mxu0 %vm286_vm5, %v3920_v35  ;;  %v7158_v35 = vld [vmem:[%s8920_s16 + $0x8] sm:$0xff]   ;;  %v7159_v18 = vld [vmem:[%s8920_s16] sm:$0xff]  }
0x2b63   :  { %6853 = vmatprep.mubr.msk.bf16.mxu0 %vm7427_vm1, %v7426_v0  ;;  %6850 = vmatpush3.bf16.msra.mxu0 %v7156_v15 }
0x2b64   :  { %v3921_v42 = vpack.c.bf16 %v3919_v23, %v3919_v23  ;;  %6851 = vmatprep.subr.bf16.mxu0 %v7426_v0 }
0x2b66   :  { %6846 = vmatmul.mubr.msk.bf16.vlgmr.msra.gmra.mxu1 %vm286_vm5, %v3921_v42 }
0x2b67   :  { %6861 = vmatprep.mubr.msk.bf16.mxu1 %vm7427_vm1, %v7426_v0  ;;  %6852 = vmatpush3.bf16.msra.mxu0 %v7157_v51 }
0x2b68   :  { %6865 = vmatprep.subr.bf16.mxu0 %v7426_v0  ;;  %6858 = vmatpush3.bf16.msra.mxu1 %v7158_v35 }
0x2b69   :  { %6859 = vmatprep.subr.bf16.mxu1 %v7426_v0 }
0x2b6c   :  { %6860 = vmatpush3.bf16.msra.mxu1 %v7159_v18 }
0x2b6d   :  { %6885 = vmatprep.subr.bf16.mxu1 %v7426_v0 }
0x2c22   :  { %v3964_v48 = vpop.f32.mrf.mxu0 }
0x2c24   :  { %v6841_v50 = vpop.f32.mrf.mxu0 }
0x2c26   :  { %v3967_v32 = vpop.f32.mrf.mxu0  ;;  %v4012_v54 = vpop.f32.mrf.mxu1 }
0x2c27   :  { %v7102_v41 = vpack.i.bf16 %v4012_v54, %v3964_v48  ;;  %v4146_v54 = vrot.slane %v8274_v17, %v7860_v52 }
0x2c28   :  { %v6842_v58 = vpop.f32.mrf.mxu0  ;;  %v6847_v7 = vpop.f32.mrf.mxu1 }
0x2c29   :  { %7103 = vrot.lane.b32.xlu0 %v7102_v41, %s8986_s22 }
0x2c2a   :  { %v4015_v62 = vpop.f32.mrf.mxu1 }
0x2c2c   :  { %v6848_v9 = vpop.f32.mrf.mxu1 }
0x2c2d   :  { %v4152_v9 = vrot.slane %v8274_v17, %v7865_v13  ;;  %v7161_v17 = vld [vmem:[%s8921_s17 + $0x30] sm:$0xff]  }
0x2c9b   :  { %v7104_v3 = vpop.permute.xlu0 %7103 }
0x2c9c   :  { %v7106_v20 = vunpack.i.h.bf16 %v7104_v3  ;;  %v7105_v47 = vunpack.i.l.bf16 %v7104_v3  ;;  %v7163_v3 = vld [vmem:[%s8921_s17 + $0x20] sm:$0xff]  }
0x2c9e   :  { %v4047_v22 = vsel %vm1196_vm8, %v4045_v21, %v7106_v20  ;;  %v4046_v24 = vsel %vm1196_vm8, %v4044_v43, %v7105_v47  ;;  %v7166_v20 = vld [vmem:[%s8921_s17 + $0x8] sm:$0xff]   ;;  %v7167_v47 = vld [vmem:[%s8921_s17] sm:$0xff]  }
0x2c9f   :  { %v4048_v25 = vpack.c.bf16 %v4047_v22, %v4046_v24  ;;  %v6141_v43 = vld [vmem:[%s8923_s19] ss:$0 sm:$0xff] }
0x2ca1   :  { %6854 = vmatmul.mubr.msk.bf16.vlgmr.msra.gmra.mxu0 %vm150_vm4, %v4048_v25 }
0x2ca2   :  { %6881 = vmatprep.mubr.msk.bf16.mxu0 %vm7427_vm1, %v7426_v0  ;;  %6866 = vmatpush3.bf16.msra.mxu0 %v7160_v19 }
0x2ca3   :  { %6867 = vmatprep.subr.bf16.mxu0 %v7426_v0 }
0x2ca6   :  { %6868 = vmatpush3.bf16.msra.mxu0 %v7161_v17 }
0x2ca7   :  { %6869 = vmatprep.subr.bf16.mxu0 %v7426_v0 }
0x2caa   :  { %6870 = vmatpush3.bf16.msra.mxu0 %v7162_v12 }
0x2cab   :  { %6871 = vmatprep.subr.bf16.mxu0 %v7426_v0 }
0x2cae   :  { %6872 = vmatpush3.bf16.msra.mxu0 %v7163_v3 }
0x2caf   :  { %6873 = vmatprep.subr.bf16.mxu0 %v7426_v0 }
0x2cb2   :  { %6874 = vmatpush3.bf16.msra.mxu0 %v7164_v45 }
0x2cb3   :  { %6875 = vmatprep.subr.bf16.mxu0 %v7426_v0 }
0x2cb6   :  { %6876 = vmatpush3.bf16.msra.mxu0 %v7165_v46 }
0x2cb7   :  { %6877 = vmatprep.subr.bf16.mxu0 %v7426_v0 }
0x2cba   :  { %6878 = vmatpush3.bf16.msra.mxu0 %v7166_v20 }
0x2cbb   :  { %6879 = vmatprep.subr.bf16.mxu0 %v7426_v0 }
0x2cbe   :  { %6880 = vmatpush3.bf16.msra.mxu0 %v7167_v47 }
0x2cbf   :  { %6911 = vmatprep.subr.bf16.mxu0 %v7426_v0 }
0x2d61   :  { %v4102_v60 = vpop.f32.mrf.mxu0 }
0x2d62   :  { %v4109_v26 = vadd.f32 %v4102_v60, %v8252_v34 }
0x2d63   :  { %v6855_v27 = vpop.f32.mrf.mxu0 }
0x2d64   :  { %v8484_v6 = vadd.f32 %v4114_v56, %v4109_v26 }
0x2d65   :  { %v4105_v44 = vpop.f32.mrf.mxu0 }
0x2d66   :  { %v4110_v2 = vadd.f32 %v4105_v44, %v8256_v55  ;;  %v4117_v61 = vsel %vm150_vm4, %v8484_v6, 0.0 }
0x2d67   :  { %4118 = vadd.xlane.f32.xlu1 %v4117_v61  ;;  %v6856_v53 = vpop.f32.mrf.mxu0 }
0x2d68   :  { %v8489_v59 = vadd.f32 %v4114_v56, %v4110_v2 }
0x2d6a   :  { %v4120_v57 = vsel %vm150_vm4, %v8489_v59, 0.0 }
0x2d6b   :  { %4121 = vadd.xlane.f32.xlu0 %v4120_v57 }
0x2df0   :  { %v4119_v63 = vpop.xlane.xlu1 %4118 }
0x2df1   :  { %v4123_v1 = vmul.f32 0.03125, %v4119_v63 }
0x2df3   :  { %v4125_v34 = vsub.f32 %v8484_v6, %v4123_v1 }
0x2df4   :  { %v4122_v29 = vpop.xlane.xlu0 %4121 }
0x2df5   :  { %v4124_v30 = vmul.f32 0.03125, %v4122_v29  ;;  %v4127_v8 = vmul.f32 %v4125_v34, %v4125_v34 }
0x2df7   :  { %v4126_v55 = vsub.f32 %v8489_v59, %v4124_v30  ;;  %v4129_v33 = vsel %vm150_vm4, %v4127_v8, 0.0 }
0x2df8   :  { %4130 = vadd.xlane.f32.xlu0 %v4129_v33 }
0x2df9   :  { %v4128_v36 = vmul.f32 %v4126_v55, %v4126_v55 }
0x2dfb   :  { %v4132_v39 = vsel %vm150_vm4, %v4128_v36, 0.0 }
0x2dfc   :  { %4133 = vadd.xlane.f32.xlu0 %v4132_v39 }
0x2e81   :  { %v4131_v23 = vpop.xlane.xlu0 %4130 }
0x2e82   :  { %v4135_v42 = vmul.f32 0.03125, %v4131_v23 }
0x2e84   :  { %v4137_v15 = vadd.f32 1e-05, %v4135_v42 }
0x2e85   :  { %v4134_v51 = vpop.xlane.xlu0 %4133 }
0x2e86   :  { %7316 = vrsqrt.f32 %v4137_v15  ;;  %v4136_v48 = vmul.f32 0.03125, %v4134_v51 }
0x2e88   :  { %v4138_v50 = vadd.f32 1e-05, %v4136_v48 }
0x2e8a   :  { %7318 = vrsqrt.f32 %v4138_v50 }
0x2e93   :  { %v7317_v32 = vpop.eup %7316 }
0x2e94   :  { %v4141_v41 = vmul.f32 %v7317_v32, %v4125_v34 }
0x2e96   :  { %v4147_v7 = vmul.f32 %v4146_v54, %v4141_v41 }
0x2e97   :  { %v7319_v58 = vpop.eup %7318 }
0x2e98   :  { %v4142_v62 = vmul.f32 %v7319_v58, %v4126_v55  ;;  %v4153_v5 = vadd.f32 %v4152_v9, %v4147_v7  ;;  %v6147_v55 = vld [vmem:[%s8922_s18 + $0x8] ss:$0 sm:$0xff] }
0x2e9a   :  { %v4148_v38 = vmul.f32 %v4146_v54, %v4142_v62 }
0x2e9c   :  { %v4154_v14 = vadd.f32 %v4152_v9, %v4148_v38  ;;  %v7168_v38 = vld [vmem:[%s8918_s14 + $0x18] sm:$0xff]  }
0x2e9e   :  { %v4155_v16 = vpack.c.bf16 %v4154_v14, %v4153_v5  ;;  %v7169_v5 = vld [vmem:[%s8918_s14 + $0x10] sm:$0xff]  }
0x2e9f   :  { %v8576_v14 = vld [vmem:[%s8922_s18 + $0x10] sm:$0xff] }
0x2ea0   :  { %6862 = vmatmul.mubr.msk.bf16.vlgmr.msra.gmra.mxu1 %vm150_vm4, %v4155_v16  ;;  %v4463_v16 = vrot.slane %v8576_v14, %v7612_v37  ;;  %v4383_v47 = vrot.slane %v8576_v14, %v7587_v10  ;;  %v4389_v37 = vrot.slane %v8576_v14, %v7625_v49 }
0x2ea1   :  { %6889 = vmatprep.mubr.msk.bf16.mxu1 %vm7427_vm1, %v7426_v0  ;;  %6886 = vmatpush3.bf16.msra.mxu1 %v7168_v38 }
0x2ea2   :  { %6887 = vmatprep.subr.bf16.mxu1 %v7426_v0 }
0x2ea5   :  { %6888 = vmatpush3.bf16.msra.mxu1 %v7169_v5 }
0x2ea6   :  { %6893 = vmatprep.subr.bf16.mxu1 %v7426_v0 }
0x2f60   :  { %v4216_v21 = vpop.f32.mrf.mxu1 }
0x2f61   :  { %v4217_v22 = vadd.f32 %v6141_v43, %v4216_v21 }
0x2f62   :  { %v6863_v24 = vpop.f32.mrf.mxu1 }
0x2f63   :  { %v6145_v25 = vmul.f32 -1.702, %v4217_v22 }
0x2f64   :  { %v4219_v56 = vpop.f32.mrf.mxu1 }
0x2f65   :  { %v4227_v60 = vmul.f32 1.442695, %v6145_v25  ;;  %v4220_v26 = vadd.f32 %v6141_v43, %v4219_v56 }
0x2f66   :  { %v6864_v27 = vpop.f32.mrf.mxu1 }
0x2f67   :  { %7320 = vpow2.f32 %v4227_v60  ;;  %v6146_v44 = vmul.f32 -1.702, %v4220_v26 }
0x2f69   :  { %v4229_v2 = vmul.f32 1.442695, %v6146_v44 }
0x2f6b   :  { %7322 = vpow2.f32 %v4229_v2 }
0x2f74   :  { %v7321_v61 = vpop.eup %7320 }
0x2f75   :  { %v4231_v53 = vadd.f32 1.0, %v7321_v61 }
0x2f77   :  { %7324 = vrcp.f32 %v4231_v53 }
0x2f78   :  { %v7323_v57 = vpop.eup %7322 }
0x2f79   :  { %v4232_v63 = vadd.f32 1.0, %v7323_v57 }
0x2f7b   :  { %7326 = vrcp.f32 %v4232_v63 }
0x2f84   :  { %v7325_v1 = vpop.eup %7324 }
0x2f85   :  { %v4237_v29 = vmul.f32 %v7325_v1, %v4217_v22  ;;  %v4457_v1 = vrot.slane %v8576_v14, %v7641_v4 }
0x2f88   :  { %v7327_v34 = vpop.eup %7326 }
0x2f89   :  { %v4238_v30 = vmul.f32 %v7327_v34, %v4220_v26 }
0x2f8b   :  { %v4239_v8 = vpack.c.bf16 %v4238_v30, %v4237_v29 }
0x2f8d   :  { %6882 = vmatmul.mubr.bf16.vlgmr.msra.gmra.mxu0 %v4239_v8 }
0x2f8e   :  { %6913 = vmatprep.mubr.msk.bf16.mxu0 %vm7427_vm1, %v7426_v0 }
0x304d   :  { %v4342_v33 = vpop.f32.mrf.mxu0 }
0x304e   :  { %v4343_v36 = vadd.f32 %v6147_v55, %v4342_v33 }
0x304f   :  { %v6883_v39 = vpop.f32.mrf.mxu0 }
0x3050   :  { %v8553_v35 = vadd.f32 %v4343_v36, %v8484_v6 }
0x3051   :  { %v4345_v18 = vpop.f32.mrf.mxu0 }
0x3052   :  { %v4346_v23 = vadd.f32 %v6147_v55, %v4345_v18  ;;  %v4354_v42 = vsel %vm150_vm4, %v8553_v35, 0.0 }
0x3053   :  { %4355 = vadd.xlane.f32.xlu1 %v4354_v42  ;;  %v6884_v15 = vpop.f32.mrf.mxu0 }
0x3054   :  { %v8558_v51 = vadd.f32 %v4346_v23, %v8489_v59 }
0x3056   :  { %v4357_v48 = vsel %vm150_vm4, %v8558_v51, 0.0 }
0x3057   :  { %4358 = vadd.xlane.f32.xlu0 %v4357_v48 }
0x30dc   :  { %v4356_v50 = vpop.xlane.xlu1 %4355 }
0x30dd   :  { %v4360_v32 = vmul.f32 0.03125, %v4356_v50 }
0x30df   :  { %v4362_v54 = vsub.f32 %v8553_v35, %v4360_v32 }
0x30e0   :  { %v4359_v6 = vpop.xlane.xlu0 %4358 }
0x30e1   :  { %v4361_v41 = vmul.f32 0.03125, %v4359_v6  ;;  %v4364_v58 = vmul.f32 %v4362_v54, %v4362_v54 }
0x30e3   :  { %v4363_v7 = vsub.f32 %v8558_v51, %v4361_v41  ;;  %v4366_v62 = vsel %vm150_vm4, %v4364_v58, 0.0  ;;  %v4473_v41 = vrot.slane %v8576_v14, %v7664_v28 }
0x30e4   :  { %4367 = vadd.xlane.f32.xlu1 %v4366_v62 }
0x30e5   :  { %v4365_v9 = vmul.f32 %v4363_v7, %v4363_v7 }
0x30e7   :  { %v4369_v59 = vsel %vm150_vm4, %v4365_v9, 0.0 }
0x30e8   :  { %4370 = vadd.xlane.f32.xlu0 %v4369_v59 }
0x30f5   :  { %4465 = vrot.lane.b32.xlu1 %v4463_v16, %s8987_s8 }
0x316d   :  { %v4368_v19 = vpop.xlane.xlu1 %4367 }
0x316e   :  { %v4372_v17 = vmul.f32 0.03125, %v4368_v19 }
0x3170   :  { %v4374_v12 = vadd.f32 1e-05, %v4372_v17 }
0x3171   :  { %v4371_v3 = vpop.xlane.xlu0 %4370  ;;  %v4466_v27 = vpop.permute.xlu1 %4465 }
0x3172   :  { %7328 = vrsqrt.f32 %v4374_v12  ;;  %v4373_v45 = vmul.f32 0.03125, %v4371_v3 }
0x3174   :  { %v4375_v46 = vadd.f32 1e-05, %v4373_v45 }
0x3176   :  { %7330 = vrsqrt.f32 %v4375_v46 }
0x317f   :  { %v7329_v20 = vpop.eup %7328 }
0x3180   :  { %v4378_v43 = vmul.f32 %v7329_v20, %v4362_v54 }
0x3182   :  { %v4384_v22 = vmul.f32 %v4383_v47, %v4378_v43 }
0x3183   :  { %v7331_v21 = vpop.eup %7330 }
0x3184   :  { %v4379_v24 = vmul.f32 %v7331_v21, %v4363_v7  ;;  %v4390_v56 = vadd.f32 %v4389_v37, %v4384_v22 }
0x3186   :  { %v4385_v25 = vmul.f32 %v4383_v47, %v4379_v24 }
0x3188   :  { %v4391_v60 = vadd.f32 %v4389_v37, %v4385_v25 }
0x318a   :  { %v4392_v26 = vpack.c.bf16 %v4391_v60, %v4390_v56 }
0x318c   :  { %6890 = vmatmul.mubr.msk.bf16.vlgmr.msra.gmra.mxu1 %vm150_vm4, %v4392_v26 }
0x318d   :  { %6895 = vmatprep.mubr.msk.bf16.mxu1 %vm7427_vm1, %v7426_v0 }
0x324c   :  { %v4447_v44 = vpop.f32.mrf.mxu1 }
0x324d   :  { %v4468_v2 = vadd.f32 %v4466_v27, %v4447_v44  ;;  %v4458_v30 = vadd.f32 %v4457_v1, %v4447_v44 }
0x324e   :  { %v6891_v10 = vpop.f32.mrf.mxu1 }
0x324f   :  { %v8589_v61 = vpack.c.bf16 %v4468_v2, %v4468_v2  ;;  %v8601_v55 = vpack.c.bf16 %v4458_v30, %v4458_v30 }
0x3250   :  { %v4450_v53 = vpop.f32.mrf.mxu1 }
0x3251   :  { %v4469_v57 = vadd.f32 %v4466_v27, %v4450_v53  ;;  %4487 = vrot.lane.b32.xlu0 %v8589_v61, %s8988_s10  ;;  %v4459_v4 = vadd.f32 %v4457_v1, %v4450_v53 }
0x3252   :  { %v6892_v49 = vpop.f32.mrf.mxu1 }
0x3253   :  { %v8593_v63 = vpack.c.bf16 %v4469_v57, %v4469_v57  ;;  %v8609_v36 = vpack.c.bf16 %v4459_v4, %v4459_v4 }
0x3255   :  { %4536 = vrot.lane.b32.xlu1 %v8593_v63, %s8988_s10 }
0x32c3   :  { %v4488_v34 = vpop.permute.xlu0 %4487 }
0x32c4   :  { %v4493_v29 = vsel %vm286_vm5, %v4488_v34, 0 }
0x32c5   :  { %6894 = vmatpush3.bf16.xpose.msra.mxu1 %v4493_v29 }
0x32c6   :  { %6899 = vmatprep.subr.bf16.mxu1 %v7426_v0 }
0x32c7   :  { %v4537_v8 = vpop.permute.xlu1 %4536 }
0x32c8   :  { %v4542_v33 = vsel %vm286_vm5, %v4537_v8, 0 }
0x32cc   :  { %6896 = vmatmul.mubr.msk.bf16.vlgmr.msra.gmra.mxu1 %vm286_vm5, %v8601_v55 }
0x32cd   :  { %6900 = vmatpush3.bf16.xpose.msra.mxu1 %v4542_v33  ;;  %6901 = vmatprep.mubr.msk.bf16.mxu1 %vm7427_vm1, %v7426_v0 }
0x32ce   :  { %6905 = vmatprep.subr.bf16.mxu1 %v7426_v0 }
0x32d4   :  { %6902 = vmatmul.mubr.msk.bf16.vlgmr.msra.gmra.mxu1 %vm286_vm5, %v8609_v36 }
0x32d5   :  { %6907 = vmatprep.mubr.msk.bf16.mxu1 %vm7427_vm1, %v7426_v0 }
0x338c   :  { %v4529_v39 = vpop.f32.mrf.mxu1 }
0x338d   :  { %v4584_v18 = vsel %vm286_vm5, %v4529_v39, -inf }
0x338e   :  { %4585 = vmax.xlane.f32.xlu1 %v4584_v18  ;;  %v6897_v23 = vpop.f32.mrf.mxu1 }
0x3390   :  { %v4532_v42 = vpop.f32.mrf.mxu1 }
0x3392   :  { %v6898_v15 = vpop.f32.mrf.mxu1 }
0x3394   :  { %v4578_v48 = vpop.f32.mrf.mxu1 }
0x3395   :  { %v4587_v50 = vsel %vm286_vm5, %v4578_v48, -inf }
0x3396   :  { %4588 = vmax.xlane.f32.xlu0 %v4587_v50  ;;  %v6903_v32 = vpop.f32.mrf.mxu1 }
0x3398   :  { %v4581_v54 = vpop.f32.mrf.mxu1 }
0x339a   :  { %v6904_v6 = vpop.f32.mrf.mxu1 }
0x33ac   :  { %4475 = vrot.lane.b32.xlu0 %v4473_v41, %s8989_s23 }
0x3417   :  { %v4586_v28 = vpop.xlane.xlu1 %4585 }
0x3418   :  { %v4590_v5 = vsub.f32 %v4529_v39, %v4586_v28 }
0x341a   :  { %v4592_v16 = vmul.f32 1.442695, %v4590_v5 }
0x341c   :  { %7332 = vpow2.f32 %v4592_v16 }
0x341f   :  { %v4589_v58 = vpop.xlane.xlu0 %4588 }
0x3420   :  { %v4591_v19 = vsub.f32 %v4578_v48, %v4589_v58 }
0x3422   :  { %v4594_v17 = vmul.f32 1.442695, %v4591_v19 }
0x3423   :  { %v4476_v7 = vpop.permute.xlu0 %4475 }
0x3424   :  { %v4478_v62 = vadd.f32 %v4476_v7, %v4447_v44  ;;  %v4479_v9 = vadd.f32 %v4476_v7, %v4450_v53  ;;  %7334 = vpow2.f32 %v4594_v17 }
0x3426   :  { %v8620_v59 = vpack.c.bf16 %v4478_v62, %v4478_v62  ;;  %v8622_v38 = vpack.c.bf16 %v4479_v9, %v4479_v9 }
0x3428   :  { %4658 = vrot.lane.b32.xlu0 %v8622_v38, %s8989_s23  ;;  %4609 = vrot.lane.b32.xlu1 %v8620_v59, %s8989_s23 }
0x3429   :  { %v7333_v12 = vpop.eup %7332 }
0x342a   :  { %v4596_v3 = vsel %vm286_vm5, %v7333_v12, 0.0 }
0x342c   :  { %4760 = vrot.lane.b32.xlu0 %v8593_v63, %s8990_s7 }
0x3430   :  { %4758 = vrot.lane.b32.xlu0 %v8609_v36, %s8991_s12 }
0x3431   :  { %v7335_v45 = vpop.eup %7334 }
0x3432   :  { %v4599_v46 = vsel %vm286_vm5, %v7335_v45, 0.0 }
0x344c   :  { %4597 = vadd.xlane.f32.xlu1 %v4596_v3 }
0x3450   :  { %4600 = vadd.xlane.f32.xlu1 %v4599_v46 }
0x3461   :  { %4709 = vrot.lane.b32.xlu1 %v8589_v61, %s8990_s7 }
0x3465   :  { %4707 = vrot.lane.b32.xlu1 %v8601_v55, %s8991_s12 }
0x349a   :  { %v4659_v20 = vpop.permute.xlu0 %4658  ;;  %v4610_v47 = vpop.permute.xlu1 %4609 }
0x349b   :  { %v4664_v43 = vsel %vm412_vm6, %v4659_v20, 0  ;;  %v4615_v21 = vsel %vm412_vm6, %v4610_v47, 0 }
0x349c   :  { %6906 = vmatpush3.bf16.msra.mxu1 %v4615_v21  ;;  %6912 = vmatpush3.bf16.msra.mxu0 %v4664_v43 }
0x349d   :  { %6917 = vmatprep.subr.bf16.mxu1 %v7426_v0  ;;  %6923 = vmatprep.subr.bf16.mxu0 %v7426_v0 }
0x349e   :  { %v4761_v2 = vpop.permute.xlu0 %4760 }
0x349f   :  { %v4766_v53 = vsel %vm286_vm5, %v4761_v2, 0 }
0x34a2   :  { %v4759_v49 = vpop.permute.xlu0 %4758 }
0x34d5   :  { %v4598_v22 = vpop.xlane.xlu1 %4597 }
0x34d6   :  { %7336 = vrcp.f32 %v4598_v22 }
0x34d9   :  { %v4601_v24 = vpop.xlane.xlu1 %4600 }
0x34da   :  { %7338 = vrcp.f32 %v4601_v24 }
0x34dd   :  { %v4710_v56 = vpop.permute.xlu1 %4709 }
0x34de   :  { %v4715_v44 = vsel %vm286_vm5, %v4710_v56, 0 }
0x34e1   :  { %v4708_v57 = vpop.permute.xlu1 %4707 }
0x34e3   :  { %v7337_v37 = vpop.eup %7336 }
0x34e4   :  { %v4604_v25 = vmul.f32 %v7337_v37, %v7333_v12 }
0x34e6   :  { %v4606_v60 = vpack.c.bf16 %v4604_v25, %v4604_v25 }
0x34e7   :  { %v7339_v26 = vpop.eup %7338 }
0x34e8   :  { %v4605_v27 = vmul.f32 %v7339_v26, %v7335_v45  ;;  %6908 = vmatmul.mubr.msk.bf16.vlgmr.msra.gmra.mxu1 %vm286_vm5, %v4606_v60 }
0x34e9   :  { %6918 = vmatpush3.bf16.xpose.msra.mxu1 %v4715_v44  ;;  %6919 = vmatprep.mubr.msk.bf16.mxu1 %vm7427_vm1, %v7426_v0 }
0x34ea   :  { %v4607_v10 = vpack.c.bf16 %v4605_v27, %v4605_v27  ;;  %6929 = vmatprep.subr.bf16.mxu1 %v7426_v0 }
0x34ec   :  { %6914 = vmatmul.mubr.msk.bf16.vlgmr.msra.gmra.mxu0 %vm286_vm5, %v4607_v10 }
0x34ed   :  { %6924 = vmatpush3.bf16.xpose.msra.mxu0 %v4766_v53  ;;  %6925 = vmatprep.mubr.msk.bf16.mxu0 %vm7427_vm1, %v7426_v0 }
0x34ee   :  { %6935 = vmatprep.subr.bf16.mxu0 %v7426_v0 }
0x34f0   :  { %6920 = vmatmul.mubr.msk.bf16.vlgmr.msra.gmra.mxu1 %vm286_vm5, %v4708_v57 }
0x34f1   :  { %6931 = vmatprep.mubr.msk.bf16.mxu1 %vm7427_vm1, %v7426_v0 }
0x34f4   :  { %6926 = vmatmul.mubr.msk.bf16.vlgmr.msra.gmra.mxu0 %vm286_vm5, %v4759_v49 }
0x34f5   :  { %6937 = vmatprep.mubr.msk.bf16.mxu0 %vm7427_vm1, %v7426_v0 }
0x35a8   :  { %v8658_v1 = vpop.f32.mrf.mxu1 }
0x35aa   :  { %v6909_v34 = vpop.f32.mrf.mxu1 }
0x35ac   :  { %v4654_v29 = vpop.f32.mrf.mxu1  ;;  %v8660_v30 = vpop.f32.mrf.mxu0 }
0x35ae   :  { %v6910_v8 = vpop.f32.mrf.mxu1  ;;  %v6915_v33 = vpop.f32.mrf.mxu0 }
0x35b0   :  { %v4703_v4 = vpop.f32.mrf.mxu0  ;;  %v4751_v39 = vpop.f32.mrf.mxu1 }
0x35b1   :  { %v4808_v18 = vsel %vm286_vm5, %v4751_v39, -inf }
0x35b2   :  { %v6916_v23 = vpop.f32.mrf.mxu0  ;;  %4809 = vmax.xlane.f32.xlu1 %v4808_v18  ;;  %v6921_v42 = vpop.f32.mrf.mxu1 }
0x35b4   :  { %v4754_v15 = vpop.f32.mrf.mxu1  ;;  %v4802_v48 = vpop.f32.mrf.mxu0 }
0x35b5   :  { %v4811_v50 = vsel %vm286_vm5, %v4802_v48, -inf }
0x35b6   :  { %4812 = vmax.xlane.f32.xlu0 %v4811_v50  ;;  %v6922_v32 = vpop.f32.mrf.mxu1  ;;  %v6927_v54 = vpop.f32.mrf.mxu0 }
0x35b8   :  { %v4805_v6 = vpop.f32.mrf.mxu0 }
0x35ba   :  { %v6928_v41 = vpop.f32.mrf.mxu0 }
0x35c3   :  { %4832 = vrot.lane.b32.xlu1 %v8620_v59, %s8977_s3 }
0x35c7   :  { %4930 = vrot.lane.b32.xlu1 %v8589_v61, %s8978_s26 }
0x35cb   :  { %4980 = vrot.lane.b32.xlu1 %v8593_v63, %s8978_s26  ;;  %s8992_s26 = sld [smem:[#allocation9_spill]] }
0x35cf   :  { %4928 = vrot.lane.b32.xlu1 %v8601_v55, %s8979_s6 }
0x363b   :  { %v4810_v58 = vpop.xlane.xlu1 %4809 }
0x363c   :  { %v4814_v7 = vsub.f32 %v4751_v39, %v4810_v58 }
0x363e   :  { %v4816_v62 = vmul.f32 1.442695, %v4814_v7 }
0x363f   :  { %v4813_v9 = vpop.xlane.xlu0 %4812  ;;  %v4833_v28 = vpop.permute.xlu1 %4832 }
0x3640   :  { %7340 = vpow2.f32 %v4816_v62  ;;  %v4815_v5 = vsub.f32 %v4802_v48, %v4813_v9  ;;  %v4838_v16 = vsel %vm412_vm6, %v4833_v28, 0 }
0x3641   :  { %6930 = vmatpush3.bf16.msra.mxu1 %v4838_v16 }
0x3642   :  { %v4818_v19 = vmul.f32 1.442695, %v4815_v5  ;;  %6941 = vmatprep.subr.bf16.mxu1 %v7426_v0 }
0x3643   :  { %v4931_v22 = vpop.permute.xlu1 %4930 }
0x3644   :  { %7342 = vpow2.f32 %v4818_v19  ;;  %v4936_v56 = vsel %vm286_vm5, %v4931_v22, 0 }
0x3647   :  { %v4981_v26 = vpop.permute.xlu1 %4980 }
0x3648   :  { %v4986_v44 = vsel %vm286_vm5, %v4981_v26, 0 }
0x364b   :  { %v4929_v2 = vpop.permute.xlu1 %4928 }
0x364d   :  { %v7341_v17 = vpop.eup %7340 }
0x364e   :  { %v4820_v12 = vsel %vm286_vm5, %v7341_v17, 0.0 }
0x364f   :  { %4821 = vadd.xlane.f32.xlu0 %v4820_v12 }
0x3651   :  { %v7343_v3 = vpop.eup %7342 }
0x3652   :  { %v4823_v45 = vsel %vm286_vm5, %v7343_v3, 0.0 }
0x3653   :  { %4824 = vadd.xlane.f32.xlu0 %v4823_v45 }
0x3669   :  { %4880 = vrot.lane.b32.xlu0 %v8622_v38, %s8977_s3 }
0x366d   :  { %4978 = vrot.lane.b32.xlu0 %v8609_v36, %s8979_s6  ;;  %s7444_s6 = smov [#allocation5]  }
0x36d8   :  { %v4822_v46 = vpop.xlane.xlu0 %4821 }
0x36d9   :  { %7344 = vrcp.f32 %v4822_v46 }
0x36dc   :  { %v4825_v20 = vpop.xlane.xlu0 %4824 }
0x36dd   :  { %7346 = vrcp.f32 %v4825_v20 }
0x36e0   :  { %v4881_v47 = vpop.permute.xlu0 %4880 }
0x36e1   :  { %v4886_v43 = vsel %vm412_vm6, %v4881_v47, 0 }
0x36e2   :  { %6936 = vmatpush3.bf16.msra.mxu0 %v4886_v43 }
0x36e3   :  { %6947 = vmatprep.subr.bf16.mxu0 %v7426_v0 }
0x36e4   :  { %v4979_v10 = vpop.permute.xlu0 %4978 }
0x36e6   :  { %v7345_v21 = vpop.eup %7344 }
0x36e7   :  { %v4828_v24 = vmul.f32 %v7345_v21, %v7341_v17 }
0x36e9   :  { %v4830_v37 = vpack.c.bf16 %v4828_v24, %v4828_v24 }
0x36ea   :  { %v7347_v25 = vpop.eup %7346 }
0x36eb   :  { %v4829_v60 = vmul.f32 %v7347_v25, %v7343_v3  ;;  %6932 = vmatmul.mubr.msk.bf16.vlgmr.msra.gmra.mxu1 %vm286_vm5, %v4830_v37 }
0x36ec   :  { %6942 = vmatpush3.bf16.xpose.msra.mxu1 %v4936_v56  ;;  %6943 = vmatprep.mubr.msk.bf16.mxu1 %vm7427_vm1, %v7426_v0 }
0x36ed   :  { %v4831_v27 = vpack.c.bf16 %v4829_v60, %v4829_v60  ;;  %6953 = vmatprep.subr.bf16.mxu1 %v7426_v0 }
0x36ef   :  { %6938 = vmatmul.mubr.msk.bf16.vlgmr.msra.gmra.mxu0 %vm286_vm5, %v4831_v27 }
0x36f0   :  { %6948 = vmatpush3.bf16.xpose.msra.mxu0 %v4986_v44  ;;  %6949 = vmatprep.mubr.msk.bf16.mxu0 %vm7427_vm1, %v7426_v0 }
0x36f1   :  { %6959 = vmatprep.subr.bf16.mxu0 %v7426_v0 }
0x36f3   :  { %6944 = vmatmul.mubr.msk.bf16.vlgmr.msra.gmra.mxu1 %vm286_vm5, %v4929_v2 }
0x36f4   :  { %6955 = vmatprep.mubr.msk.bf16.mxu1 %vm7427_vm1, %v7426_v0 }
0x36f7   :  { %6950 = vmatmul.mubr.msk.bf16.vlgmr.msra.gmra.mxu0 %vm286_vm5, %v4979_v10 }
0x36f8   :  { %6961 = vmatprep.mubr.msk.bf16.mxu0 %vm7427_vm1, %v7426_v0 }
0x37ab   :  { %v8698_v53 = vpop.f32.mrf.mxu1 }
0x37ad   :  { %v6933_v57 = vpop.f32.mrf.mxu1 }
0x37af   :  { %v4877_v49 = vpop.f32.mrf.mxu1  ;;  %v8700_v34 = vpop.f32.mrf.mxu0 }
0x37b0   :  { %v7107_v29 = vpack.i.bf16 %v8700_v34, %v8698_v53 }
0x37b1   :  { %v6934_v8 = vpop.f32.mrf.mxu1  ;;  %v6939_v33 = vpop.f32.mrf.mxu0 }
0x37b3   :  { %v4925_v4 = vpop.f32.mrf.mxu0  ;;  %v4972_v39 = vpop.f32.mrf.mxu1 }
0x37b4   :  { %v5028_v18 = vsel %vm286_vm5, %v4972_v39, -inf }
0x37b5   :  { %v6940_v23 = vpop.f32.mrf.mxu0  ;;  %5029 = vmax.xlane.f32.xlu1 %v5028_v18  ;;  %v6945_v42 = vpop.f32.mrf.mxu1 }
0x37b7   :  { %v4975_v15 = vpop.f32.mrf.mxu1  ;;  %v5022_v48 = vpop.f32.mrf.mxu0 }
0x37b8   :  { %v5031_v50 = vsel %vm286_vm5, %v5022_v48, -inf }
0x37b9   :  { %5032 = vmax.xlane.f32.xlu0 %v5031_v50  ;;  %v6946_v32 = vpop.f32.mrf.mxu1  ;;  %v6951_v54 = vpop.f32.mrf.mxu0 }
0x37bb   :  { %v5025_v6 = vpop.f32.mrf.mxu0 }
0x37bd   :  { %v6952_v41 = vpop.f32.mrf.mxu0 }
0x37c6   :  { %5052 = vrot.lane.b32.xlu1 %v8620_v59, %s8980_s2 }
0x37ca   :  { %5150 = vrot.lane.b32.xlu1 %v8589_v61, %s8981_s27 }
0x37ce   :  { %5200 = vrot.lane.b32.xlu1 %v8593_v63, %s8981_s27 }
0x37d2   :  { %5148 = vrot.lane.b32.xlu1 %v8601_v55, %s8982_s28 }
0x383e   :  { %v5030_v58 = vpop.xlane.xlu1 %5029 }
0x383f   :  { %v5034_v7 = vsub.f32 %v4972_v39, %v5030_v58 }
0x3841   :  { %v5036_v62 = vmul.f32 1.442695, %v5034_v7 }
0x3842   :  { %v5033_v9 = vpop.xlane.xlu0 %5032  ;;  %v5053_v28 = vpop.permute.xlu1 %5052 }
0x3843   :  { %7348 = vpow2.f32 %v5036_v62  ;;  %v5035_v5 = vsub.f32 %v5022_v48, %v5033_v9  ;;  %v5058_v16 = vsel %vm412_vm6, %v5053_v28, 0 }
0x3844   :  { %6954 = vmatpush3.bf16.msra.mxu1 %v5058_v16 }
0x3845   :  { %v5038_v19 = vmul.f32 1.442695, %v5035_v5  ;;  %6965 = vmatprep.subr.bf16.mxu1 %v7426_v0 }
0x3846   :  { %v5151_v47 = vpop.permute.xlu1 %5150 }
0x3847   :  { %7350 = vpow2.f32 %v5038_v19  ;;  %v5156_v24 = vsel %vm286_vm5, %v5151_v47, 0  ;;  %v7171_v47 = vld [vmem:[%s8919_s15 + $0x10] sm:$0xff]  }
0x3850   :  { %v7349_v61 = vpop.eup %7348 }
0x3851   :  { %v5040_v63 = vsel %vm286_vm5, %v7349_v61, 0.0 }
0x3852   :  { %5041 = vadd.xlane.f32.xlu0 %v5040_v63 }
0x3854   :  { %v7351_v17 = vpop.eup %7350 }
0x3855   :  { %v5043_v55 = vsel %vm286_vm5, %v7351_v17, 0.0 }
0x3856   :  { %5044 = vadd.xlane.f32.xlu0 %v5043_v55 }
0x386c   :  { %5100 = vrot.lane.b32.xlu0 %v8622_v38, %s8980_s2  ;;  %s5995_s2 = sshll.u32 %s7444_s6, 4  ;;  %s5996_s2 = int_to_ptr.vmem [resolvable:$true] %s5995_s2 }
0x3870   :  { %5198 = vrot.lane.b32.xlu0 %v8609_v36, %s8982_s28  ;;  %v5201_v36 = vpop.permute.xlu1 %5200 }
0x3871   :  { %v5206_v56 = vsel %vm286_vm5, %v5201_v36, 0 }
0x3874   :  { %v5149_v60 = vpop.permute.xlu1 %5148 }
0x38db   :  { %v5042_v12 = vpop.xlane.xlu0 %5041 }
0x38dc   :  { %7352 = vrcp.f32 %v5042_v12 }
0x38df   :  { %v5045_v3 = vpop.xlane.xlu0 %5044 }
0x38e0   :  { %7354 = vrcp.f32 %v5045_v3 }
0x38e3   :  { %v5101_v45 = vpop.permute.xlu0 %5100 }
0x38e4   :  { %v5106_v46 = vsel %vm412_vm6, %v5101_v45, 0 }
0x38e5   :  { %6960 = vmatpush3.bf16.msra.mxu0 %v5106_v46 }
0x38e6   :  { %6971 = vmatprep.subr.bf16.mxu0 %v7426_v0 }
0x38e7   :  { %v5199_v26 = vpop.permute.xlu0 %5198 }
0x38e9   :  { %v7353_v20 = vpop.eup %7352 }
0x38ea   :  { %v5048_v43 = vmul.f32 %v7353_v20, %v7349_v61  ;;  %v7170_v20 = vld [vmem:[%s8919_s15 + $0x18] sm:$0xff]   ;;  %s7443_s15 = smov [#allocation3]  }
0x38ec   :  { %v5050_v21 = vpack.c.bf16 %v5048_v43, %v5048_v43 }
0x38ed   :  { %v7355_v22 = vpop.eup %7354 }
0x38ee   :  { %v5049_v37 = vmul.f32 %v7355_v22, %v7351_v17  ;;  %6956 = vmatmul.mubr.msk.bf16.vlgmr.msra.gmra.mxu1 %vm286_vm5, %v5050_v21 }
0x38ef   :  { %6966 = vmatpush3.bf16.xpose.msra.mxu1 %v5156_v24  ;;  %6967 = vmatprep.mubr.msk.bf16.mxu1 %vm7427_vm1, %v7426_v0 }
0x38f0   :  { %v5051_v25 = vpack.c.bf16 %v5049_v37, %v5049_v37  ;;  %6977 = vmatprep.subr.bf16.mxu1 %v7426_v0 }
0x38f2   :  { %6962 = vmatmul.mubr.msk.bf16.vlgmr.msra.gmra.mxu0 %vm286_vm5, %v5051_v25 }
0x38f3   :  { %6972 = vmatpush3.bf16.xpose.msra.mxu0 %v5206_v56  ;;  %6973 = vmatprep.mubr.msk.bf16.mxu0 %vm7427_vm1, %v7426_v0 }
0x38f4   :  { %6983 = vmatprep.subr.bf16.mxu0 %v7426_v0 }
0x38f6   :  { %6968 = vmatmul.mubr.msk.bf16.vlgmr.msra.gmra.mxu1 %vm286_vm5, %v5149_v60 }
0x38f7   :  { %6979 = vmatprep.mubr.msk.bf16.mxu1 %vm7427_vm1, %v7426_v0 }
0x38fa   :  { %6974 = vmatmul.mubr.msk.bf16.vlgmr.msra.gmra.mxu0 %vm286_vm5, %v5199_v26 }
0x38fb   :  { %6985 = vmatprep.mubr.msk.bf16.mxu0 %vm7427_vm1, %v7426_v0 }
0x39ae   :  { %v5094_v27 = vpop.f32.mrf.mxu1 }
0x39b0   :  { %v6957_v44 = vpop.f32.mrf.mxu1 }
0x39b2   :  { %v5097_v2 = vpop.f32.mrf.mxu1  ;;  %v5142_v10 = vpop.f32.mrf.mxu0 }
0x39b3   :  { %v7112_v6 = vpack.i.bf16 %v5142_v10, %v5094_v27 }
0x39b4   :  { %v6958_v57 = vpop.f32.mrf.mxu1  ;;  %v6963_v49 = vpop.f32.mrf.mxu0 }
0x39b6   :  { %v5145_v8 = vpop.f32.mrf.mxu0  ;;  %v5192_v33 = vpop.f32.mrf.mxu1 }
0x39b7   :  { %v5248_v4 = vsel %vm286_vm5, %v5192_v33, -inf }
0x39b8   :  { %v6964_v39 = vpop.f32.mrf.mxu0  ;;  %5249 = vmax.xlane.f32.xlu1 %v5248_v4  ;;  %v6969_v18 = vpop.f32.mrf.mxu1 }
0x39ba   :  { %v5195_v23 = vpop.f32.mrf.mxu1  ;;  %v5242_v42 = vpop.f32.mrf.mxu0 }
0x39bb   :  { %v5251_v15 = vsel %vm286_vm5, %v5242_v42, -inf }
0x39bc   :  { %5252 = vmax.xlane.f32.xlu0 %v5251_v15  ;;  %v6970_v48 = vpop.f32.mrf.mxu1  ;;  %v6975_v50 = vpop.f32.mrf.mxu0 }
0x39be   :  { %v5245_v32 = vpop.f32.mrf.mxu0 }
0x39c0   :  { %v6976_v54 = vpop.f32.mrf.mxu0 }
0x39c9   :  { %5272 = vrot.lane.b32.xlu1 %v8620_v59, %s8983_s4 }
0x39cd   :  { %7108 = vrot.lane.b32.xlu1 %v7107_v29, %s8984_s25 }
0x39d1   :  { %7113 = vrot.lane.b32.xlu1 %v7112_v6, %s8985_s24 }
0x3a41   :  { %v5250_v41 = vpop.xlane.xlu1 %5249 }
0x3a42   :  { %v5254_v58 = vsub.f32 %v5192_v33, %v5250_v41 }
0x3a44   :  { %v5256_v7 = vmul.f32 1.442695, %v5254_v58 }
0x3a45   :  { %v5253_v62 = vpop.xlane.xlu0 %5252  ;;  %v5273_v9 = vpop.permute.xlu1 %5272 }
0x3a46   :  { %7356 = vpow2.f32 %v5256_v7  ;;  %v5255_v28 = vsub.f32 %v5242_v42, %v5253_v62  ;;  %v5278_v5 = vsel %vm412_vm6, %v5273_v9, 0 }
0x3a47   :  { %6978 = vmatpush3.bf16.msra.mxu1 %v5278_v5 }
0x3a48   :  { %v5258_v16 = vmul.f32 1.442695, %v5255_v28  ;;  %6989 = vmatprep.subr.bf16.mxu1 %v7426_v0 }
0x3a49   :  { %v7109_v26 = vpop.permute.xlu1 %7108 }
0x3a4a   :  { %7358 = vpow2.f32 %v5258_v16  ;;  %v7111_v44 = vunpack.i.h.bf16 %v7109_v26  ;;  %v7110_v2 = vunpack.i.l.bf16 %v7109_v26  ;;  %v5465_v16 = vrot.slane %v8576_v14, %v7833_v11 }
0x3a4c   :  { %v5393_v8 = vsel %vm286_vm5, %v8660_v30, %v7111_v44  ;;  %v5392_v33 = vsel %vm286_vm5, %v8658_v1, %v7110_v2  ;;  %v2924_v30 = vsel %vm1193_vm7, %v8248_v40, 0.0  ;;  %v2917_v1 = vsel %vm1193_vm7, %v8240_v31, 0.0 }
0x3a4d   :  { %v7114_v27 = vpop.permute.xlu1 %7113  ;;  %v2925_v50 = vrot.slane %v2924_v30, 4  ;;  %v2918_v32 = vrot.slane %v2917_v1, 4 }
0x3a4e   :  { %v7116_v10 = vunpack.i.h.bf16 %v7114_v27  ;;  %v7115_v57 = vunpack.i.l.bf16 %v7114_v27 }
0x3a4f   :  { %v2926_v54 = vadd.f32 %v2925_v50, %v2924_v30  ;;  %v2919_v6 = vadd.f32 %v2918_v32, %v2917_v1  ;;  %v7177_v30 = vld [vmem:[%s8921_s17 + $0x60] sm:$0xff]   ;;  %v7178_v1 = vld [vmem:[%s8921_s17 + $0x58] sm:$0xff]   ;;  %v7179_v50 = vld [vmem:[%s8921_s17 + $0x50] sm:$0xff]  }
0x3a50   :  { %v5394_v18 = vsel %vm1193_vm7, %v5392_v33, %v7115_v57  ;;  %v5395_v23 = vsel %vm1193_vm7, %v5393_v8, %v7116_v10  ;;  %v7180_v32 = vld [vmem:[%s8921_s17 + $0x48] sm:$0xff]  }
0x3a51   :  { %v2927_v41 = vrot.slane %v2926_v54, 2  ;;  %v2920_v58 = vrot.slane %v2919_v6, 2 }
0x3a53   :  { %v7357_v59 = vpop.eup %7356  ;;  %v2928_v7 = vadd.f32 %v2927_v41, %v2926_v54  ;;  %v2921_v62 = vadd.f32 %v2920_v58, %v2919_v6  ;;  %v7181_v54 = vld [vmem:[%s8921_s17 + $0x40] sm:$0xff]  }
0x3a54   :  { %v5260_v53 = vsel %vm286_vm5, %v7357_v59, 0.0  ;;  %v6193_v6 = vld [vmem:[%s8923_s19 + $0x1] ss:$0 sm:$0xff] }
0x3a55   :  { %5261 = vadd.xlane.f32.xlu0 %v5260_v53  ;;  %v2929_v9 = vrot.slane %v2928_v7, 1  ;;  %v2922_v28 = vrot.slane %v2921_v62, 1 }
0x3a57   :  { %v7359_v34 = vpop.eup %7358  ;;  %v2930_v5 = vadd.f32 %v2929_v9, %v2928_v7 }
0x3a58   :  { %v5263_v29 = vsel %vm286_vm5, %v7359_v34, 0.0 }
0x3a59   :  { %5264 = vadd.xlane.f32.xlu0 %v5263_v29 }
0x3a6f   :  { %5320 = vrot.lane.b32.xlu0 %v8622_v38, %s8983_s4 }
0x3ade   :  { %v5262_v19 = vpop.xlane.xlu0 %5261 }
0x3adf   :  { %7360 = vrcp.f32 %v5262_v19 }
0x3ae2   :  { %v5265_v61 = vpop.xlane.xlu0 %5264 }
0x3ae3   :  { %7362 = vrcp.f32 %v5265_v61 }
0x3ae6   :  { %v5321_v63 = vpop.permute.xlu0 %5320 }
0x3ae7   :  { %v5326_v17 = vsel %vm412_vm6, %v5321_v63, 0 }
0x3ae8   :  { %6984 = vmatpush3.bf16.msra.mxu0 %v5326_v17 }
0x3ae9   :  { %6997 = vmatprep.subr.bf16.mxu0 %v7426_v0 }
0x3aec   :  { %v7361_v55 = vpop.eup %7360 }
0x3aed   :  { %v5268_v12 = vmul.f32 %v7361_v55, %v7357_v59  ;;  %v2923_v59 = vadd.f32 %v2922_v28, %v2921_v62 }
0x3aef   :  { %v5270_v3 = vpack.c.bf16 %v5268_v12, %v5268_v12  ;;  %v8794_v19 = vmul.f32 0.125, %v2923_v59 }
0x3af0   :  { %v7363_v45 = vpop.eup %7362 }
0x3af1   :  { %v5269_v46 = vmul.f32 %v7363_v45, %v7359_v34  ;;  %6980 = vmatmul.mubr.msk.bf16.vlgmr.msra.gmra.mxu1 %vm286_vm5, %v5270_v3  ;;  %v8790_v34 = vmul.f32 0.125, %v2930_v5 }
0x3af2   :  { %6993 = vmatprep.mubr.msk.bf16.mxu1 %vm7427_vm1, %v7426_v0  ;;  %6990 = vmatpush3.bf16.msra.mxu1 %v7170_v20 }
0x3af3   :  { %v5271_v38 = vpack.c.bf16 %v5269_v46, %v5269_v46  ;;  %6991 = vmatprep.subr.bf16.mxu1 %v7426_v0  ;;  %v5783_v11 = vmul.f32 %v8790_v34, %v8790_v34 }
0x3af5   :  { %6986 = vmatmul.mubr.msk.bf16.vlgmr.msra.gmra.mxu0 %vm286_vm5, %v5271_v38 }
0x3af6   :  { %7001 = vmatprep.mubr.msk.bf16.mxu0 %vm7427_vm1, %v7426_v0  ;;  %6992 = vmatpush3.bf16.msra.mxu1 %v7171_v47 }
0x3af7   :  { %7005 = vmatprep.subr.bf16.mxu1 %v7426_v0 }
0x3bb1   :  { %v5314_v43 = vpop.f32.mrf.mxu1 }
0x3bb3   :  { %v6981_v21 = vpop.f32.mrf.mxu1 }
0x3bb5   :  { %v5317_v22 = vpop.f32.mrf.mxu1  ;;  %v5362_v24 = vpop.f32.mrf.mxu0 }
0x3bb6   :  { %v7117_v37 = vpack.i.bf16 %v5362_v24, %v5314_v43 }
0x3bb7   :  { %v6982_v36 = vpop.f32.mrf.mxu1  ;;  %v6987_v25 = vpop.f32.mrf.mxu0 }
0x3bb8   :  { %7118 = vrot.lane.b32.xlu1 %v7117_v37, %s8986_s22  ;;  %v7172_v25 = vld [vmem:[%s8920_s16 + $0x18] sm:$0xff]   ;;  %s5985_s22 = sshll.u32 %s7443_s15, 4  ;;  %s5986_s22 = int_to_ptr.vmem [resolvable:$true] %s5985_s22 }
0x3bb9   :  { %v5365_v56 = vpop.f32.mrf.mxu0  ;;  %6998 = vmatpush3.bf16.msra.mxu0 %v7172_v25  ;;  %p7387_p1 = scmp.lt.s32.totalorder %s5986_s22, %s5986_s22 }
0x3bba   :  { %v7173_v56 = vld [vmem:[%s8920_s16 + $0x10] sm:$0xff]   ;;  %6999 = vmatprep.subr.bf16.mxu0 %v7426_v0  ;;  %s7382_s16 = scalar_lea.vmem %s5986_s22, 32 }
0x3bbb   :  { %v6988_v60 = vpop.f32.mrf.mxu0  ;;  %p7383_p0 = scmp.ne.s32.totalorder %s5986_s22, %s7382_s16  ;;  %p7388_p2 = scmp.lt.s32.totalorder %s7382_s16, %s7382_s16 }
0x3bbd   :  { %7000 = vmatpush3.bf16.msra.mxu0 %v7173_v56  ;;  %p7389_p3 = por %p7388_p2, %p7387_p1 }
0x3bbe   :  { %7025 = vmatprep.subr.bf16.mxu0 %v7426_v0 }
0x3bbf   :  { %p7390_p4 = pnand %p7389_p3, %p7383_p0 }
0x3c2a   :  { %v7119_v49 = vpop.permute.xlu1 %7118 }
0x3c2b   :  { %v7121_v4 = vunpack.i.h.bf16 %v7119_v49  ;;  %v7120_v39 = vunpack.i.l.bf16 %v7119_v49  ;;  %v5497_v49 = vrot.slane %v8576_v14, %v7860_v52  ;;  %v7174_v52 = vld [vmem:[%s8921_s17 + $0x78] sm:$0xff]  }
0x3c2d   :  { %v5397_v42 = vsel %vm1196_vm8, %v5395_v23, %v7121_v4  ;;  %v5396_v15 = vsel %vm1196_vm8, %v5394_v18, %v7120_v39  ;;  %v5503_v18 = vrot.slane %v8576_v14, %v7865_v13  ;;  %v7175_v13 = vld [vmem:[%s8921_s17 + $0x70] sm:$0xff]   ;;  %v7176_v14 = vld [vmem:[%s8921_s17 + $0x68] sm:$0xff]  }
0x3c2e   :  { %v5398_v48 = vpack.c.bf16 %v5397_v42, %v5396_v15 }
0x3c30   :  { %6994 = vmatmul.mubr.msk.bf16.vlgmr.msra.gmra.mxu1 %vm150_vm4, %v5398_v48 }
0x3c31   :  { %7021 = vmatprep.mubr.msk.bf16.mxu1 %vm7427_vm1, %v7426_v0  ;;  %7006 = vmatpush3.bf16.msra.mxu1 %v7174_v52 }
0x3c32   :  { %7007 = vmatprep.subr.bf16.mxu1 %v7426_v0 }
0x3c35   :  { %7008 = vmatpush3.bf16.msra.mxu1 %v7175_v13 }
0x3c36   :  { %7009 = vmatprep.subr.bf16.mxu1 %v7426_v0 }
0x3c39   :  { %7010 = vmatpush3.bf16.msra.mxu1 %v7176_v14 }
0x3c3a   :  { %7011 = vmatprep.subr.bf16.mxu1 %v7426_v0 }
0x3c3d   :  { %7012 = vmatpush3.bf16.msra.mxu1 %v7177_v30 }
0x3c3e   :  { %7013 = vmatprep.subr.bf16.mxu1 %v7426_v0 }
0x3c41   :  { %7014 = vmatpush3.bf16.msra.mxu1 %v7178_v1 }
0x3c42   :  { %7015 = vmatprep.subr.bf16.mxu1 %v7426_v0 }
0x3c45   :  { %7016 = vmatpush3.bf16.msra.mxu1 %v7179_v50 }
0x3c46   :  { %7017 = vmatprep.subr.bf16.mxu1 %v7426_v0 }
0x3c49   :  { %7018 = vmatpush3.bf16.msra.mxu1 %v7180_v32 }
0x3c4a   :  { %7019 = vmatprep.subr.bf16.mxu1 %v7426_v0 }
0x3c4d   :  { %7020 = vmatpush3.bf16.msra.mxu1 %v7181_v54 }
0x3cf0   :  { %v5453_v53 = vpop.f32.mrf.mxu1 }
0x3cf1   :  { %v5460_v40 = vadd.f32 %v5453_v53, %v8553_v35  ;;  %v5782_v35 = vmul.f32 %v8794_v19, %v8794_v19 }
0x3cf2   :  { %v6995_v31 = vpop.f32.mrf.mxu1 }
0x3cf3   :  { %v8792_v29 = vadd.f32 %v5465_v16, %v5460_v40 }
0x3cf4   :  { %v5456_v61 = vpop.f32.mrf.mxu1 }
0x3cf5   :  { %v5461_v63 = vadd.f32 %v5456_v61, %v8558_v51  ;;  %v5468_v17 = vsel %vm150_vm4, %v8792_v29, 0.0  ;;  %v5787_v51 = vsel %vm5786_vm9, %v5783_v11, %v5782_v35 }
0x3cf6   :  { %5469 = vadd.xlane.f32.xlu0 %v5468_v17  ;;  %v6996_v55 = vpop.f32.mrf.mxu1  ;;  %v5790_v45 = vsel %vm5789_vm10, %v5787_v51, 0.0  ;;  %v7182_v51 = vld [vmem:[%s8924_s20 + $0x8] sm:$0xff]  }
0x3cf7   :  { %v8801_v12 = vadd.f32 %v5465_v16, %v5461_v63 }
0x3cf9   :  { %v5471_v3 = vsel %vm150_vm4, %v8801_v12, 0.0 }
0x3cfa   :  { %5472 = vadd.xlane.f32.xlu1 %v5471_v3 }
0x3cfe   :  { %5791 = vadd.xlane.f32.xlu1 %v5790_v45  ;;  %v7183_v45 = vld [vmem:[%s8924_s20] sm:$0xff]  }
0x3d7f   :  { %v5470_v46 = vpop.xlane.xlu0 %5469 }
0x3d80   :  { %v5474_v38 = vmul.f32 0.03125, %v5470_v46  ;;  %v6215_v46 = vld [vmem:[%s8922_s18 + $0x18] ss:$0 sm:$0xff] }
0x3d82   :  { %v5476_v20 = vsub.f32 %v8792_v29, %v5474_v38 }
0x3d83   :  { %v5473_v47 = vpop.xlane.xlu1 %5472 }
0x3d84   :  { %v5475_v43 = vmul.f32 0.03125, %v5473_v47  ;;  %v5478_v21 = vmul.f32 %v5476_v20, %v5476_v20 }
0x3d86   :  { %v5477_v22 = vsub.f32 %v8801_v12, %v5475_v43  ;;  %v5480_v24 = vsel %vm150_vm4, %v5478_v21, 0.0 }
0x3d87   :  { %5481 = vadd.xlane.f32.xlu0 %v5480_v24  ;;  %v5792_v30 = vpop.xlane.xlu1 %5791 }
0x3d88   :  { %v5479_v37 = vmul.f32 %v5477_v22, %v5477_v22  ;;  %v5793_v1 = vadd.f32 1e-12, %v5792_v30 }
0x3d8a   :  { %v5483_v36 = vsel %vm150_vm4, %v5479_v37, 0.0 }
0x3d8b   :  { %5484 = vadd.xlane.f32.xlu0 %v5483_v36 }
0x3e10   :  { %v5482_v60 = vpop.xlane.xlu0 %5481 }
0x3e11   :  { %v5486_v26 = vmul.f32 0.03125, %v5482_v60 }
0x3e13   :  { %v5488_v27 = vadd.f32 1e-05, %v5486_v26 }
0x3e14   :  { %v5485_v44 = vpop.xlane.xlu0 %5484 }
0x3e15   :  { %7364 = vrsqrt.f32 %v5488_v27  ;;  %v5487_v2 = vmul.f32 0.03125, %v5485_v44 }
0x3e17   :  { %v5489_v10 = vadd.f32 1e-05, %v5487_v2 }
0x3e19   :  { %7366 = vrsqrt.f32 %v5489_v10 }
0x3e22   :  { %v7365_v57 = vpop.eup %7364 }
0x3e23   :  { %v5492_v8 = vmul.f32 %v7365_v57, %v5476_v20 }
0x3e25   :  { %v5498_v4 = vmul.f32 %v5497_v49, %v5492_v8 }
0x3e26   :  { %v7367_v33 = vpop.eup %7366 }
0x3e27   :  { %v5493_v39 = vmul.f32 %v7367_v33, %v5477_v22  ;;  %v5504_v42 = vadd.f32 %v5503_v18, %v5498_v4 }
0x3e29   :  { %v5499_v23 = vmul.f32 %v5497_v49, %v5493_v39 }
0x3e2b   :  { %v5505_v15 = vadd.f32 %v5503_v18, %v5499_v23 }
0x3e2d   :  { %v5506_v48 = vpack.c.bf16 %v5505_v15, %v5504_v42 }
0x3e2f   :  { %7002 = vmatmul.mubr.msk.bf16.vlgmr.msra.gmra.mxu0 %vm150_vm4, %v5506_v48 }
0x3e30   :  { %7029 = vmatprep.mubr.msk.bf16.mxu0 %vm7427_vm1, %v7426_v0  ;;  %7026 = vmatpush3.bf16.msra.mxu0 %v7182_v51 }
0x3e31   :  { %7027 = vmatprep.subr.bf16.mxu0 %v7426_v0 }
0x3e34   :  { %7028 = vmatpush3.bf16.msra.mxu0 %v7183_v45 }
0x3e35   :  { %7033 = vmatprep.subr.mxu0 %v7426_v0 }
0x3eef   :  { %v5569_v41 = vpop.f32.mrf.mxu0 }
0x3ef0   :  { %v5570_v58 = vadd.f32 %v6193_v6, %v5569_v41 }
0x3ef1   :  { %v7003_v7 = vpop.f32.mrf.mxu0 }
0x3ef2   :  { %v6197_v62 = vmul.f32 -1.702, %v5570_v58 }
0x3ef3   :  { %v5572_v9 = vpop.f32.mrf.mxu0 }
0x3ef4   :  { %v5580_v28 = vmul.f32 1.442695, %v6197_v62  ;;  %v5573_v5 = vadd.f32 %v6193_v6, %v5572_v9 }
0x3ef5   :  { %v7004_v16 = vpop.f32.mrf.mxu0 }
0x3ef6   :  { %7368 = vpow2.f32 %v5580_v28  ;;  %v6198_v59 = vmul.f32 -1.702, %v5573_v5 }
0x3ef8   :  { %v5582_v53 = vmul.f32 1.442695, %v6198_v59 }
0x3efa   :  { %7370 = vpow2.f32 %v5582_v53 }
0x3f03   :  { %v7369_v40 = vpop.eup %7368 }
0x3f04   :  { %v5584_v31 = vadd.f32 1.0, %v7369_v40 }
0x3f06   :  { %7372 = vrcp.f32 %v5584_v31 }
0x3f07   :  { %v7371_v61 = vpop.eup %7370 }
0x3f08   :  { %v5585_v63 = vadd.f32 1.0, %v7371_v61 }
0x3f0a   :  { %7374 = vrcp.f32 %v5585_v63 }
0x3f0b   :  { %7376 = vrsqrt.f32 %v5793_v1 }
0x3f13   :  { %v7373_v17 = vpop.eup %7372 }
0x3f14   :  { %v5590_v11 = vmul.f32 %v7373_v17, %v5570_v58 }
0x3f17   :  { %v7375_v55 = vpop.eup %7374 }
0x3f18   :  { %v5591_v35 = vmul.f32 %v7375_v55, %v5573_v5  ;;  %v7377_v54 = vpop.eup %7376 }
0x3f19   :  { %v5796_v6 = vrot.slane %v7377_v54, 1  ;;  %v5799_v59 = vmul.f32 %v7377_v54, %v8794_v19 }
0x3f1a   :  { %v5592_v3 = vpack.c.bf16 %v5591_v35, %v5590_v11 }
0x3f1b   :  { %v5800_v7 = vmul.f32 %v5796_v6, %v8790_v34  ;;  %v5819_v34 = vstv %s8992_s26 }
0x3f1c   :  { %7022 = vmatmul.mubr.bf16.vlgmr.msra.gmra.mxu1 %v5592_v3  ;;  %v5820_v40 = vmul.f32 1.442695, %v5819_v34 }
0x3f1d   :  { %v5824_v5 = vrot.slane %v5800_v7, 7 }
0x3f1f   :  { %v5825_v53 = vsel %vm5786_vm9, %v5824_v5, %v5799_v59 }
0x3fdc   :  { %v5696_v38 = vpop.f32.mrf.mxu1 }
0x3fdd   :  { %v5697_v47 = vadd.f32 %v6215_v46, %v5696_v38 }
0x3fde   :  { %v7023_v20 = vpop.f32.mrf.mxu1 }
0x3fdf   :  { %v5703_v24 = vadd.f32 %v5697_v47, %v8792_v29 }
0x3fe0   :  { %v5699_v43 = vpop.f32.mrf.mxu1 }
0x3fe1   :  { %v5700_v21 = vadd.f32 %v6215_v46, %v5699_v43 }
0x3fe2   :  { %v7024_v22 = vpop.f32.mrf.mxu1 }
0x3fe3   :  { %v5704_v37 = vadd.f32 %v5700_v21, %v8801_v12 }
0x3fe5   :  { %v5705_v36 = vpack.c.bf16 %v5704_v37, %v5703_v24 }
0x3fe7   :  { %7030 = vmatmul.mubr.msk.bf16.vlgmr.msra.gmra.mxu0 %vm150_vm4, %v5705_v36 }
0x3fe8   :  { %7035 = vmatprep.mubr.msk.f32.mxu0 %vm7427_vm1, %v7426_v0 }
0x40a7   :  { %v5759_v25 = vpop.f32.mrf.mxu0 }
0x40a8   :  { %v5766_v56 = vsel %vm1193_vm7, %v5759_v25, 0.0 }
0x40a9   :  { %v5767_v60 = vrot.slane %v5766_v56, 4  ;;  %v7031_v26 = vpop.f32.mrf.mxu0 }
0x40ab   :  { %v5768_v27 = vadd.f32 %v5767_v60, %v5766_v56  ;;  %v5762_v44 = vpop.f32.mrf.mxu0 }
0x40ac   :  { %v5773_v2 = vsel %vm1193_vm7, %v5762_v44, 0.0 }
0x40ad   :  { %v5769_v10 = vrot.slane %v5768_v27, 2  ;;  %v5774_v57 = vrot.slane %v5773_v2, 4  ;;  %v7032_v29 = vpop.f32.mrf.mxu0 }
0x40af   :  { %v5770_v49 = vadd.f32 %v5769_v10, %v5768_v27  ;;  %v5775_v12 = vadd.f32 %v5774_v57, %v5773_v2 }
0x40b1   :  { %v5771_v8 = vrot.slane %v5770_v49, 1  ;;  %v5776_v33 = vrot.slane %v5775_v12, 2 }
0x40b3   :  { %v5772_v4 = vadd.f32 %v5771_v8, %v5770_v49  ;;  %v5777_v39 = vadd.f32 %v5776_v33, %v5775_v12 }
0x40b5   :  { %v5778_v18 = vrot.slane %v5777_v39, 1  ;;  %v5780_v23 = vmul.f32 0.125, %v5772_v4 }
0x40b7   :  { %v5779_v42 = vadd.f32 %v5778_v18, %v5777_v39  ;;  %v5801_v48 = vmul.f32 %v5780_v23, %v5780_v23 }
0x40b9   :  { %v5781_v15 = vmul.f32 0.125, %v5779_v42 }
0x40bb   :  { %v5802_v52 = vmul.f32 %v5781_v15, %v5781_v15 }
0x40bd   :  { %v5805_v13 = vsel %vm5786_vm9, %v5802_v52, %v5801_v48 }
0x40be   :  { %v5807_v14 = vsel %vm5789_vm10, %v5805_v13, 0.0 }
0x40bf   :  { %5808 = vadd.xlane.f32.xlu0 %v5807_v14 }
0x4148   :  { %v5809_v50 = vpop.xlane.xlu0 %5808 }
0x4149   :  { %v5810_v32 = vadd.f32 1e-12, %v5809_v50 }
0x414b   :  { %7378 = vrsqrt.f32 %v5810_v32 }
0x414c   :  { %7380 = vpow2.f32 %v5820_v40 }
0x4158   :  { %v7379_v41 = vpop.eup %7378 }
0x4159   :  { %v5813_v58 = vrot.slane %v7379_v41, 1  ;;  %v5816_v9 = vmul.f32 %v7379_v41, %v5780_v23  ;;  %v7381_v19 = vpop.eup %7380 }
0x415b   :  { %v5817_v62 = vmul.f32 %v5813_v58, %v5781_v15 }
0x415d   :  { %v5828_v28 = vrot.slane %v5817_v62, 7 }
0x415f   :  { %v5829_v16 = vsel %vm5786_vm9, %v5828_v28, %v5816_v9 }
0x4160   :  { %7034 = vmatpush3.xpose.msk.msra.mxu0 %vm1193_vm7, %v5829_v16 }
0x4161   :  { %7038 = vmatprep.subr.mxu0 %v7426_v0 }
0x4163   :  { %7036 = vmatmul.mubr.msk.f32.vlgmr.msra.gmra.mxu0 %vm1193_vm7, %v5825_v53 }
0x4164   :  { %7039 = vmatpush3.xpose.msk.msra.mxu0 %vm1193_vm7, %v5825_v53  ;;  %7040 = vmatprep.mubr.msk.f32.mxu0 %vm7427_vm1, %v7426_v0 }
0x4167   :  { %7041 = vmatmul.mubr.msk.f32.vlgmr.msra.gmra.mxu0 %vm1193_vm7, %v5829_v16 }
0x4223   :  { %v5900_v31 = vpop.f32.mrf.mxu0 }
0x4224   :  { %v5904_v61 = vmul.f32 %v7381_v19, %v5900_v31 }
0x4225   :  { %v7037_v63 = vpop.f32.mrf.mxu0 }
0x4226   :  { %5906 = vst.msk [vmem:[#allocation3] sm:$0x3] %vm5905_vm11, %v5904_v61 }
0x4227   :  { %v5973_v0 = vpop.f32.mrf.mxu0 }
0x4228   :  { %7393 = shalt.err (!%p7390_p4)
}
0x4229   :  { %s8993_s4 = sld [smem:[#allocation16_spill]]  ;;  %v5977_v17 = vmul.f32 %v7381_v19, %v5973_v0  ;;  %v7042_v55 = vpop.f32.mrf.mxu0  ;;  %s7402_s25 = scalar_lea.vmem %s5996_s2, 32 }
0x422a   :  { %p7403_p5 = scmp.ne.s32.totalorder %s5996_s2, %s7402_s25  ;;  %p7407_p6 = scmp.lt.s32.totalorder %s5996_s2, %s5996_s2 }
0x422b   :  { %5978 = vst.msk [vmem:[#allocation5] sm:$0x3] %vm5905_vm11, %v5977_v17  ;;  %p7408_p7 = scmp.lt.s32.totalorder %s7402_s25, %s7402_s25 }
0x422d   :  { %p7409_p8 = por %p7408_p7, %p7407_p6 }
0x422f   :  { %5988 = dma.vmem_to_hbm [thread:$0]  %s5986_s22, 32, %s8993_s4, [#allocation4]  }
0x4230   :  { %p7410_p9 = pnand %p7409_p8, %p7403_p5 }
0x4232   :  { %7413 = shalt.err (!%p7410_p9)
}
0x4233   :  { %s8994_s23 = sld [smem:[#allocation17_spill]] }
0x4239   :  { %5998 = dma.vmem_to_hbm [thread:$0]  %s5996_s2, 32, %s8994_s23, [#allocation6]  }
0x423a   :  { %7422 = dma.done.wait [#allocation4], 32  }
0x423b   :  { %7423 = vsyncadd [#allocation4], 4294967264 }
0x423c   :  { %7424 = dma.done.wait [#allocation6], 32  }
0x423d   :  { %7425 = vsyncadd [#allocation6], 4294967264 }
0x423e   :  { %6005 = vsyncpa [#allocation4], 1 }
0x423f   :  { %6006 = vsyncpa [#allocation6], 1 }

</bundles_post_ra>
